<compile_context>
chip_gen: v6e
topology: v6e:2x2x1
jax: 0.10.0
libtpu: 0.0.40
codegen_flags: <defaults>
</compile_context>

<pallas_src>
import math
import functools

import jax
import jax.numpy as jnp
from jax.experimental import pallas as pl
from jax.experimental.pallas import tpu as pltpu

LN_EPS = 1e-5  # layer_norm_eps (encoder-layer norms and final norm)


# ----------------------------------------------------------------------------
# In-kernel helpers
# ----------------------------------------------------------------------------
def _layernorm(x, w, b, eps=LN_EPS):
    mu = jnp.mean(x, axis=-1, keepdims=True)
    xc = x - mu
    var = jnp.mean(xc * xc, axis=-1, keepdims=True)
    return xc * jax.lax.rsqrt(var + eps) * w + b


def _bf16_dot(a, w, b):
    """(x @ W) with bf16 MXU inputs, f32 accumulation, f32 bias add."""
    r = jnp.dot(a.astype(jnp.bfloat16), w.astype(jnp.bfloat16),
                preferred_element_type=jnp.float32)
    return r + b


# ----------------------------------------------------------------------------
# Fused forward kernel (no grid: whole problem in one VMEM-resident block)
# ----------------------------------------------------------------------------
def _fused_forward_kernel(emb_ref, pe_ref, mask_ref,
                          wq_ref, bq_ref, wk_ref, bk_ref, wv_ref, bv_ref,
                          wo_ref, bo_ref, ln1w_ref, ln1b_ref,
                          w1_ref, b1_ref, w2_ref, b2_ref,
                          ln2w_ref, ln2b_ref,
                          lnf_w_ref, lnf_b_ref, wout_ref, bout_ref,
                          o_ref, *, nhead):
    B, S, D = emb_ref.shape
    L = wq_ref.shape[0]
    n_pad = wout_ref.shape[1]
    hd = D // nhead
    scale = 1.0 / math.sqrt(hd)
    BS = B * S

    # embedding * sqrt(D) + sinusoidal positional encoding (broadcast over B)
    x = emb_ref[...] * math.sqrt(D) + pe_ref[...][None, :, :]      # (B,S,D) f32
    x = x.reshape(BS, D)                                           # fold B into M

    # additive key-padding mask, shared by every layer/head: (B,1,S)
    neg = jnp.where(mask_ref[...] > 0.5, -1e30, 0.0)[:, None, :]

    for l in range(L):                       # static unroll over encoder layers
        # ---- multi-head self-attention (post-norm nn.TransformerEncoderLayer)
        q = _bf16_dot(x, wq_ref[l], bq_ref[l]).reshape(B, S, D)
        k = _bf16_dot(x, wk_ref[l], bk_ref[l]).reshape(B, S, D)
        v = _bf16_dot(x, wv_ref[l], bv_ref[l]).reshape(B, S, D)

        ctx_heads = []
        for h in range(nhead):               # static unroll; batched over B
            sl = slice(h * hd, (h + 1) * hd)
            qh = q[:, :, sl].astype(jnp.bfloat16)
            kh = k[:, :, sl].astype(jnp.bfloat16)
            vh = v[:, :, sl].astype(jnp.bfloat16)
            s = jnp.einsum('bqd,bkd->bqk', qh, kh,
                           preferred_element_type=jnp.float32) * scale   # (B,S,S)
            s = s + neg
            s = s - jnp.max(s, axis=-1, keepdims=True)
            e = jnp.exp(s)
            p = e * pl.reciprocal(jnp.sum(e, axis=-1, keepdims=True), approx=True)
            ctx_heads.append(
                jnp.einsum('bqk,bkd->bqd', p.astype(jnp.bfloat16), vh,
                           preferred_element_type=jnp.float32))          # (B,S,hd)
        ctx = jnp.concatenate(ctx_heads, axis=-1).reshape(BS, D)
        attn = _bf16_dot(ctx, wo_ref[l], bo_ref[l])

        # residual + norm1 (f32)
        y = _layernorm(x + attn, ln1w_ref[l], ln1b_ref[l])

        # feed-forward (relu) + residual + norm2
        h1 = jnp.maximum(_bf16_dot(y, w1_ref[l], b1_ref[l]), 0.0)
        h2 = _bf16_dot(h1, w2_ref[l], b2_ref[l])
        x = _layernorm(y + h2, ln2w_ref[l], ln2b_ref[l])

    # final encoder LayerNorm + output Linear (lane-dense padded num_items)
    yf = _layernorm(x, lnf_w_ref[...], lnf_b_ref[...])
    logits = _bf16_dot(yf, wout_ref[...], bout_ref[...])               # (BS, n_pad)
    o_ref[...] = logits.reshape(B, S, n_pad)


_VMEM_SPEC = pl.BlockSpec(memory_space=pltpu.MemorySpace.VMEM)


def _fused_forward(emb, pe, mask, stacked, lnf_w, lnf_b, wout_p, bout_p, *, nhead):
    B, S, _ = emb.shape
    n_pad = wout_p.shape[1]
    args = (emb, pe, mask,
            stacked["wq_t"], stacked["bq"], stacked["wk_t"], stacked["bk"],
            stacked["wv_t"], stacked["bv"], stacked["wo_t"], stacked["bo"],
            stacked["ln1_w"], stacked["ln1_b"],
            stacked["w1_t"], stacked["b1"], stacked["w2_t"], stacked["b2"],
            stacked["ln2_w"], stacked["ln2_b"],
            lnf_w, lnf_b, wout_p, bout_p)
    return pl.pallas_call(
        functools.partial(_fused_forward_kernel, nhead=nhead),
        out_shape=jax.ShapeDtypeStruct((B, S, n_pad), jnp.float32),
        in_specs=[_VMEM_SPEC] * len(args),
        out_specs=_VMEM_SPEC,
    )(*args)


# ----------------------------------------------------------------------------
# Parameter init (deterministic, synthetic) and full forward
# ----------------------------------------------------------------------------
def init_params(key, num_items, dim_model=32, nhead=2, num_layers=2,
                dim_ff=2048, maxseqlen=20, padding_idx=-1):
    std = 0.02
    keys = jax.random.split(key, 2 + num_layers)

    emb = jax.random.normal(keys[0], (num_items, dim_model), jnp.float32) * std
    pad_row = padding_idx % num_items           # nn.Embedding normalizes padding_idx=-1
    emb = emb.at[pad_row].set(0.0)              # padding row is zero

    # Sinusoidal positional encoding (same recipe as PositionalEncoding).
    position = jnp.arange(maxseqlen, dtype=jnp.float32)[:, None]
    div_term = jnp.exp(jnp.arange(0, dim_model, 2, dtype=jnp.float32)
                       * (-math.log(10000.0) / dim_model))
    pe = jnp.zeros((maxseqlen, dim_model), jnp.float32)
    pe = pe.at[:, 0::2].set(jnp.sin(position * div_term))
    pe = pe.at[:, 1::2].set(jnp.cos(position * div_term))

    def n(k, shape):
        return jax.random.normal(k, shape, jnp.float32) * std

    layers = []
    for i in range(num_layers):
        lk = jax.random.split(keys[1 + i], 12)
        layers.append(dict(
            # weights stored transposed (in, out) so kernels do x @ W_t + b
            wq_t=n(lk[0], (dim_model, dim_model)), bq=n(lk[1], (1, dim_model)),
            wk_t=n(lk[2], (dim_model, dim_model)), bk=n(lk[3], (1, dim_model)),
            wv_t=n(lk[4], (dim_model, dim_model)), bv=n(lk[5], (1, dim_model)),
            wo_t=n(lk[6], (dim_model, dim_model)), bo=n(lk[7], (1, dim_model)),
            ln1_w=jnp.ones((1, dim_model), jnp.float32),
            ln1_b=jnp.zeros((1, dim_model), jnp.float32),
            w1_t=n(lk[8], (dim_model, dim_ff)), b1=n(lk[9], (1, dim_ff)),
            w2_t=n(lk[10], (dim_ff, dim_model)), b2=n(lk[11], (1, dim_model)),
            ln2_w=jnp.ones((1, dim_model), jnp.float32),
            ln2_b=jnp.zeros((1, dim_model), jnp.float32),
        ))

    ok = jax.random.split(keys[1 + num_layers], 2)
    return dict(
        emb=emb, pe=pe, layers=layers,
        final_ln_w=jnp.ones((1, dim_model), jnp.float32),
        final_ln_b=jnp.zeros((1, dim_model), jnp.float32),
        out_w_t=jax.random.normal(ok[0], (dim_model, num_items), jnp.float32) * std,
        out_b=jax.random.normal(ok[1], (1, num_items), jnp.float32) * std,
    )


@functools.partial(jax.jit, static_argnames=("nhead",))
def transformer4rec_forward(params, curr_sess, curr_sess_lens, key_mask, nhead=2):
    """curr_sess: (B, S) int32 item ids; key_mask: (B, S) bool, True = padded."""
    del curr_sess_lens  # present in the PyTorch signature but unused in forward
    B, S = curr_sess.shape
    num_items, _ = params["emb"].shape

    # TODO(synk): embedding gather could be fused into the kernel via
    # PrefetchScalarGridSpec + pl.Element row-gather; kept as plain-JAX gather.
    emb = params["emb"][curr_sess]                      # (B, S, D)
    pe = params["pe"][:S]                               # (S, D)
    mask = key_mask.astype(jnp.float32)                 # (B, S), 1.0 => padded key

    # Stack per-layer weights along a leading layer axis (folds away under jit).
    stacked = {k: jnp.stack([lp[k] for lp in params["layers"]])
               for k in params["layers"][0]}

    # Lane-dense output: pad num_items up to a multiple of 128 for the kernel.
    n_pad = ((num_items + 127) // 128) * 128
    wout_p = jnp.pad(params["out_w_t"], ((0, 0), (0, n_pad - num_items)))
    bout_p = jnp.pad(params["out_b"], ((0, 0), (0, n_pad - num_items)))

    out = _fused_forward(emb, pe, mask, stacked,
                         params["final_ln_w"], params["final_ln_b"],
                         wout_p, bout_p, nhead=nhead)   # (B, S, n_pad)
    out = out[:, :, :num_items]                         # drop lane padding
    return jnp.transpose(out, (1, 0, 2))                # (S, B, num_items)


# ----------------------------------------------------------------------------
if __name__ == "__main__":
    B, S = 2, 8
    num_items, dim_model, nhead = 50, 32, 2

    key = jax.random.PRNGKey(0)
    pkey, skey = jax.random.split(key)
    params = init_params(pkey, num_items=num_items, dim_model=dim_model,
                         nhead=nhead, num_layers=2, dim_ff=2048, maxseqlen=20)

    curr_sess = jax.random.randint(skey, (B, S), 0, num_items - 1, dtype=jnp.int32)
    curr_sess_lens = jnp.array([S, S - 2], dtype=jnp.int32)
    key_mask = jnp.zeros((B, S), dtype=bool).at[1, S - 2:].set(True)  # True = padding

    out = transformer4rec_forward(params, curr_sess, curr_sess_lens, key_mask,
                                  nhead=nhead)
    out = jax.block_until_ready(out)
    assert out.shape == (S, B, num_items), out.shape
    assert bool(jnp.all(jnp.isfinite(out)))
    print("KERNEL_OK")
</pallas_src>

<mosaic_0001>
module attributes {stable_mosaic.version = 11 : i64} {
  func.func @_fused_forward_kernel(%arg0: memref<2x8x32xf32, #tpu.memory_space<vmem>>, %arg1: memref<8x32xf32, #tpu.memory_space<vmem>>, %arg2: memref<2x8xf32, #tpu.memory_space<vmem>>, %arg3: memref<2x32x32xf32, #tpu.memory_space<vmem>>, %arg4: memref<2x1x32xf32, #tpu.memory_space<vmem>>, %arg5: memref<2x32x32xf32, #tpu.memory_space<vmem>>, %arg6: memref<2x1x32xf32, #tpu.memory_space<vmem>>, %arg7: memref<2x32x32xf32, #tpu.memory_space<vmem>>, %arg8: memref<2x1x32xf32, #tpu.memory_space<vmem>>, %arg9: memref<2x32x32xf32, #tpu.memory_space<vmem>>, %arg10: memref<2x1x32xf32, #tpu.memory_space<vmem>>, %arg11: memref<2x1x32xf32, #tpu.memory_space<vmem>>, %arg12: memref<2x1x32xf32, #tpu.memory_space<vmem>>, %arg13: memref<2x32x2048xf32, #tpu.memory_space<vmem>>, %arg14: memref<2x1x2048xf32, #tpu.memory_space<vmem>>, %arg15: memref<2x2048x32xf32, #tpu.memory_space<vmem>>, %arg16: memref<2x1x32xf32, #tpu.memory_space<vmem>>, %arg17: memref<2x1x32xf32, #tpu.memory_space<vmem>>, %arg18: memref<2x1x32xf32, #tpu.memory_space<vmem>>, %arg19: memref<1x32xf32, #tpu.memory_space<vmem>>, %arg20: memref<1x32xf32, #tpu.memory_space<vmem>>, %arg21: memref<32x128xf32, #tpu.memory_space<vmem>>, %arg22: memref<1x128xf32, #tpu.memory_space<vmem>>, %arg23: memref<2x8x128xf32, #tpu.memory_space<vmem>>) attributes {dimension_semantics = [], scalar_prefetch = 0 : i64, scratch_operands = 0 : i64, tpu.core_type = #tpu.core_type<tc>} {
    %c0 = arith.constant 0 : index
    %c0_0 = arith.constant 0 : index
    %c0_1 = arith.constant 0 : index
    %0 = vector.load %arg0[%c0, %c0_0, %c0_1] : memref<2x8x32xf32, #tpu.memory_space<vmem>>, vector<2x8x32xf32>
    %cst = arith.constant 5.65685415 : f32
    %1 = vector.broadcast %cst : f32 to vector<2x8x32xf32>
    %2 = arith.mulf %0, %1 : vector<2x8x32xf32>
    %c0_2 = arith.constant 0 : index
    %c0_3 = arith.constant 0 : index
    %3 = vector.load %arg1[%c0_2, %c0_3] : memref<8x32xf32, #tpu.memory_space<vmem>>, vector<8x32xf32>
    %4 = vector.shape_cast %3 : vector<8x32xf32> to vector<1x8x32xf32>
    %5 = vector.broadcast %4 : vector<1x8x32xf32> to vector<2x8x32xf32>
    %6 = arith.addf %2, %5 : vector<2x8x32xf32>
    %7 = vector.shape_cast %6 : vector<2x8x32xf32> to vector<16x32xf32>
    %c0_4 = arith.constant 0 : index
    %c0_5 = arith.constant 0 : index
    %8 = vector.load %arg2[%c0_4, %c0_5] : memref<2x8xf32, #tpu.memory_space<vmem>>, vector<2x8xf32>
    %cst_6 = arith.constant 5.000000e-01 : f32
    %9 = vector.broadcast %cst_6 : f32 to vector<2x8xf32>
    %10 = arith.cmpf ogt, %8, %9 : vector<2x8xf32>
    %cst_7 = arith.constant -1.000000e+30 : f32
    %cst_8 = arith.constant 0.000000e+00 : f32
    %11 = vector.broadcast %cst_7 : f32 to vector<2x8xf32>
    %12 = vector.broadcast %cst_8 : f32 to vector<2x8xf32>
    %13 = arith.select %10, %11, %12 : vector<2x8xi1>, vector<2x8xf32>
    %14 = vector.shape_cast %13 : vector<2x8xf32> to vector<2x1x8xf32>
    %c0_9 = arith.constant 0 : index
    %c0_10 = arith.constant 0 : index
    %c0_11 = arith.constant 0 : index
    %15 = vector.load %arg3[%c0_9, %c0_10, %c0_11] : memref<2x32x32xf32, #tpu.memory_space<vmem>>, vector<1x32x32xf32>
    %16 = vector.shape_cast %15 : vector<1x32x32xf32> to vector<32x32xf32>
    %c0_12 = arith.constant 0 : index
    %c0_13 = arith.constant 0 : index
    %c0_14 = arith.constant 0 : index
    %17 = vector.load %arg4[%c0_12, %c0_13, %c0_14] : memref<2x1x32xf32, #tpu.memory_space<vmem>>, vector<1x1x32xf32>
    %18 = vector.shape_cast %17 : vector<1x1x32xf32> to vector<1x32xf32>
    %19 = arith.truncf %7 : vector<16x32xf32> to vector<16x32xbf16>
    %20 = arith.truncf %16 : vector<32x32xf32> to vector<32x32xbf16>
    %cst_15 = arith.constant dense<0.000000e+00> : vector<16x32xf32>
    %21 = tpu.matmul %19, %20, %cst_15 {dimension_numbers = #tpu.dot_dimension_numbers<[1], [0], [0], [1], [0, 0, 1, 1], [], []>} : vector<16x32xbf16>, vector<32x32xbf16>, vector<16x32xf32> -> vector<16x32xf32>
    %22 = vector.broadcast %18 : vector<1x32xf32> to vector<16x32xf32>
    %23 = arith.addf %21, %22 : vector<16x32xf32>
    %24 = vector.shape_cast %23 : vector<16x32xf32> to vector<2x8x32xf32>
    %c0_16 = arith.constant 0 : index
    %c0_17 = arith.constant 0 : index
    %c0_18 = arith.constant 0 : index
    %25 = vector.load %arg5[%c0_16, %c0_17, %c0_18] : memref<2x32x32xf32, #tpu.memory_space<vmem>>, vector<1x32x32xf32>
    %26 = vector.shape_cast %25 : vector<1x32x32xf32> to vector<32x32xf32>
    %c0_19 = arith.constant 0 : index
    %c0_20 = arith.constant 0 : index
    %c0_21 = arith.constant 0 : index
    %27 = vector.load %arg6[%c0_19, %c0_20, %c0_21] : memref<2x1x32xf32, #tpu.memory_space<vmem>>, vector<1x1x32xf32>
    %28 = vector.shape_cast %27 : vector<1x1x32xf32> to vector<1x32xf32>
    %29 = arith.truncf %7 : vector<16x32xf32> to vector<16x32xbf16>
    %30 = arith.truncf %26 : vector<32x32xf32> to vector<32x32xbf16>
    %cst_22 = arith.constant dense<0.000000e+00> : vector<16x32xf32>
    %31 = tpu.matmul %29, %30, %cst_22 {dimension_numbers = #tpu.dot_dimension_numbers<[1], [0], [0], [1], [0, 0, 1, 1], [], []>} : vector<16x32xbf16>, vector<32x32xbf16>, vector<16x32xf32> -> vector<16x32xf32>
    %32 = vector.broadcast %28 : vector<1x32xf32> to vector<16x32xf32>
    %33 = arith.addf %31, %32 : vector<16x32xf32>
    %34 = vector.shape_cast %33 : vector<16x32xf32> to vector<2x8x32xf32>
    %c0_23 = arith.constant 0 : index
    %c0_24 = arith.constant 0 : index
    %c0_25 = arith.constant 0 : index
    %35 = vector.load %arg7[%c0_23, %c0_24, %c0_25] : memref<2x32x32xf32, #tpu.memory_space<vmem>>, vector<1x32x32xf32>
    %36 = vector.shape_cast %35 : vector<1x32x32xf32> to vector<32x32xf32>
    %c0_26 = arith.constant 0 : index
    %c0_27 = arith.constant 0 : index
    %c0_28 = arith.constant 0 : index
    %37 = vector.load %arg8[%c0_26, %c0_27, %c0_28] : memref<2x1x32xf32, #tpu.memory_space<vmem>>, vector<1x1x32xf32>
    %38 = vector.shape_cast %37 : vector<1x1x32xf32> to vector<1x32xf32>
    %39 = arith.truncf %7 : vector<16x32xf32> to vector<16x32xbf16>
    %40 = arith.truncf %36 : vector<32x32xf32> to vector<32x32xbf16>
    %cst_29 = arith.constant dense<0.000000e+00> : vector<16x32xf32>
    %41 = tpu.matmul %39, %40, %cst_29 {dimension_numbers = #tpu.dot_dimension_numbers<[1], [0], [0], [1], [0, 0, 1, 1], [], []>} : vector<16x32xbf16>, vector<32x32xbf16>, vector<16x32xf32> -> vector<16x32xf32>
    %42 = vector.broadcast %38 : vector<1x32xf32> to vector<16x32xf32>
    %43 = arith.addf %41, %42 : vector<16x32xf32>
    %44 = vector.shape_cast %43 : vector<16x32xf32> to vector<2x8x32xf32>
    %45 = vector.extract_strided_slice %24 {offsets = [0, 0, 0], sizes = [2, 8, 16], strides = [1, 1, 1]} : vector<2x8x32xf32> to vector<2x8x16xf32>
    %46 = arith.truncf %45 : vector<2x8x16xf32> to vector<2x8x16xbf16>
    %47 = vector.extract_strided_slice %34 {offsets = [0, 0, 0], sizes = [2, 8, 16], strides = [1, 1, 1]} : vector<2x8x32xf32> to vector<2x8x16xf32>
    %48 = arith.truncf %47 : vector<2x8x16xf32> to vector<2x8x16xbf16>
    %49 = vector.extract_strided_slice %44 {offsets = [0, 0, 0], sizes = [2, 8, 16], strides = [1, 1, 1]} : vector<2x8x32xf32> to vector<2x8x16xf32>
    %50 = arith.truncf %49 : vector<2x8x16xf32> to vector<2x8x16xbf16>
    "tpu.trace_start"() <{level = 10 : i32, message = "bqd,bkd->bqk"}> : () -> ()
    %cst_30 = arith.constant dense<0.000000e+00> : vector<2x8x8xf32>
    %51 = tpu.matmul %46, %48, %cst_30 {dimension_numbers = #tpu.dot_dimension_numbers<[2], [2], [1], [1], [0, 0, 0, 1, 1, 1], [0], [0]>} : vector<2x8x16xbf16>, vector<2x8x16xbf16>, vector<2x8x8xf32> -> vector<2x8x8xf32>
    "tpu.trace_stop"() : () -> ()
    %cst_31 = arith.constant 2.500000e-01 : f32
    %52 = vector.broadcast %cst_31 : f32 to vector<2x8x8xf32>
    %53 = arith.mulf %51, %52 : vector<2x8x8xf32>
    %54 = vector.broadcast %14 : vector<2x1x8xf32> to vector<2x8x8xf32>
    %55 = arith.addf %53, %54 : vector<2x8x8xf32>
    %cst_32 = arith.constant dense<0xFF800000> : vector<2x8xf32>
    %56 = vector.multi_reduction <maximumf>, %55, %cst_32 [2] : vector<2x8x8xf32> to vector<2x8xf32>
    %57 = vector.shape_cast %56 : vector<2x8xf32> to vector<2x8x1xf32>
    %58 = vector.broadcast %57 : vector<2x8x1xf32> to vector<2x8x8xf32>
    %59 = arith.subf %55, %58 : vector<2x8x8xf32>
    %60 = math.exp %59 : vector<2x8x8xf32>
    %cst_33 = arith.constant dense<0.000000e+00> : vector<2x8xf32>
    %61 = vector.multi_reduction <add>, %60, %cst_33 [2] : vector<2x8x8xf32> to vector<2x8xf32>
    %62 = vector.shape_cast %61 : vector<2x8xf32> to vector<2x8x1xf32>
    %63 = tpu.reciprocal %62 {approx = true} : vector<2x8x1xf32> -> vector<2x8x1xf32>
    %64 = vector.broadcast %63 : vector<2x8x1xf32> to vector<2x8x8xf32>
    %65 = arith.mulf %60, %64 : vector<2x8x8xf32>
    %66 = arith.truncf %65 : vector<2x8x8xf32> to vector<2x8x8xbf16>
    "tpu.trace_start"() <{level = 10 : i32, message = "bqk,bkd->bqd"}> : () -> ()
    %cst_34 = arith.constant dense<0.000000e+00> : vector<2x8x16xf32>
    %67 = tpu.matmul %66, %50, %cst_34 {dimension_numbers = #tpu.dot_dimension_numbers<[2], [1], [1], [2], [0, 0, 0, 1, 1, 2], [0], [0]>} : vector<2x8x8xbf16>, vector<2x8x16xbf16>, vector<2x8x16xf32> -> vector<2x8x16xf32>
    "tpu.trace_stop"() : () -> ()
    %68 = vector.extract_strided_slice %24 {offsets = [0, 0, 16], sizes = [2, 8, 16], strides = [1, 1, 1]} : vector<2x8x32xf32> to vector<2x8x16xf32>
    %69 = arith.truncf %68 : vector<2x8x16xf32> to vector<2x8x16xbf16>
    %70 = vector.extract_strided_slice %34 {offsets = [0, 0, 16], sizes = [2, 8, 16], strides = [1, 1, 1]} : vector<2x8x32xf32> to vector<2x8x16xf32>
    %71 = arith.truncf %70 : vector<2x8x16xf32> to vector<2x8x16xbf16>
    %72 = vector.extract_strided_slice %44 {offsets = [0, 0, 16], sizes = [2, 8, 16], strides = [1, 1, 1]} : vector<2x8x32xf32> to vector<2x8x16xf32>
    %73 = arith.truncf %72 : vector<2x8x16xf32> to vector<2x8x16xbf16>
    "tpu.trace_start"() <{level = 10 : i32, message = "bqd,bkd->bqk"}> : () -> ()
    %cst_35 = arith.constant dense<0.000000e+00> : vector<2x8x8xf32>
    %74 = tpu.matmul %69, %71, %cst_35 {dimension_numbers = #tpu.dot_dimension_numbers<[2], [2], [1], [1], [0, 0, 0, 1, 1, 1], [0], [0]>} : vector<2x8x16xbf16>, vector<2x8x16xbf16>, vector<2x8x8xf32> -> vector<2x8x8xf32>
    "tpu.trace_stop"() : () -> ()
    %cst_36 = arith.constant 2.500000e-01 : f32
    %75 = vector.broadcast %cst_36 : f32 to vector<2x8x8xf32>
    %76 = arith.mulf %74, %75 : vector<2x8x8xf32>
    %77 = vector.broadcast %14 : vector<2x1x8xf32> to vector<2x8x8xf32>
    %78 = arith.addf %76, %77 : vector<2x8x8xf32>
    %cst_37 = arith.constant dense<0xFF800000> : vector<2x8xf32>
    %79 = vector.multi_reduction <maximumf>, %78, %cst_37 [2] : vector<2x8x8xf32> to vector<2x8xf32>
    %80 = vector.shape_cast %79 : vector<2x8xf32> to vector<2x8x1xf32>
    %81 = vector.broadcast %80 : vector<2x8x1xf32> to vector<2x8x8xf32>
    %82 = arith.subf %78, %81 : vector<2x8x8xf32>
    %83 = math.exp %82 : vector<2x8x8xf32>
    %cst_38 = arith.constant dense<0.000000e+00> : vector<2x8xf32>
    %84 = vector.multi_reduction <add>, %83, %cst_38 [2] : vector<2x8x8xf32> to vector<2x8xf32>
    %85 = vector.shape_cast %84 : vector<2x8xf32> to vector<2x8x1xf32>
    %86 = tpu.reciprocal %85 {approx = true} : vector<2x8x1xf32> -> vector<2x8x1xf32>
    %87 = vector.broadcast %86 : vector<2x8x1xf32> to vector<2x8x8xf32>
    %88 = arith.mulf %83, %87 : vector<2x8x8xf32>
    %89 = arith.truncf %88 : vector<2x8x8xf32> to vector<2x8x8xbf16>
    "tpu.trace_start"() <{level = 10 : i32, message = "bqk,bkd->bqd"}> : () -> ()
    %cst_39 = arith.constant dense<0.000000e+00> : vector<2x8x16xf32>
    %90 = tpu.matmul %89, %73, %cst_39 {dimension_numbers = #tpu.dot_dimension_numbers<[2], [1], [1], [2], [0, 0, 0, 1, 1, 2], [0], [0]>} : vector<2x8x8xbf16>, vector<2x8x16xbf16>, vector<2x8x16xf32> -> vector<2x8x16xf32>
    "tpu.trace_stop"() : () -> ()
    %91 = tpu.concatenate %67, %90 in 2 : vector<2x8x16xf32>, vector<2x8x16xf32> -> vector<2x8x32xf32>
    %92 = vector.shape_cast %91 : vector<2x8x32xf32> to vector<16x32xf32>
    %c0_40 = arith.constant 0 : index
    %c0_41 = arith.constant 0 : index
    %c0_42 = arith.constant 0 : index
    %93 = vector.load %arg9[%c0_40, %c0_41, %c0_42] : memref<2x32x32xf32, #tpu.memory_space<vmem>>, vector<1x32x32xf32>
    %94 = vector.shape_cast %93 : vector<1x32x32xf32> to vector<32x32xf32>
    %c0_43 = arith.constant 0 : index
    %c0_44 = arith.constant 0 : index
    %c0_45 = arith.constant 0 : index
    %95 = vector.load %arg10[%c0_43, %c0_44, %c0_45] : memref<2x1x32xf32, #tpu.memory_space<vmem>>, vector<1x1x32xf32>
    %96 = vector.shape_cast %95 : vector<1x1x32xf32> to vector<1x32xf32>
    %97 = arith.truncf %92 : vector<16x32xf32> to vector<16x32xbf16>
    %98 = arith.truncf %94 : vector<32x32xf32> to vector<32x32xbf16>
    %cst_46 = arith.constant dense<0.000000e+00> : vector<16x32xf32>
    %99 = tpu.matmul %97, %98, %cst_46 {dimension_numbers = #tpu.dot_dimension_numbers<[1], [0], [0], [1], [0, 0, 1, 1], [], []>} : vector<16x32xbf16>, vector<32x32xbf16>, vector<16x32xf32> -> vector<16x32xf32>
    %100 = vector.broadcast %96 : vector<1x32xf32> to vector<16x32xf32>
    %101 = arith.addf %99, %100 : vector<16x32xf32>
    %102 = arith.addf %7, %101 : vector<16x32xf32>
    %c0_47 = arith.constant 0 : index
    %c0_48 = arith.constant 0 : index
    %c0_49 = arith.constant 0 : index
    %103 = vector.load %arg11[%c0_47, %c0_48, %c0_49] : memref<2x1x32xf32, #tpu.memory_space<vmem>>, vector<1x1x32xf32>
    %104 = vector.shape_cast %103 : vector<1x1x32xf32> to vector<1x32xf32>
    %c0_50 = arith.constant 0 : index
    %c0_51 = arith.constant 0 : index
    %c0_52 = arith.constant 0 : index
    %105 = vector.load %arg12[%c0_50, %c0_51, %c0_52] : memref<2x1x32xf32, #tpu.memory_space<vmem>>, vector<1x1x32xf32>
    %106 = vector.shape_cast %105 : vector<1x1x32xf32> to vector<1x32xf32>
    %cst_53 = arith.constant dense<0.000000e+00> : vector<16xf32>
    %107 = vector.multi_reduction <add>, %102, %cst_53 [1] : vector<16x32xf32> to vector<16xf32>
    %108 = vector.shape_cast %107 : vector<16xf32> to vector<16x1xf32>
    %cst_54 = arith.constant 3.200000e+01 : f32
    %109 = vector.broadcast %cst_54 : f32 to vector<16x1xf32>
    %110 = arith.divf %108, %109 : vector<16x1xf32>
    %111 = vector.broadcast %110 : vector<16x1xf32> to vector<16x32xf32>
    %112 = arith.subf %102, %111 : vector<16x32xf32>
    %113 = arith.mulf %112, %112 : vector<16x32xf32>
    %cst_55 = arith.constant dense<0.000000e+00> : vector<16xf32>
    %114 = vector.multi_reduction <add>, %113, %cst_55 [1] : vector<16x32xf32> to vector<16xf32>
    %115 = vector.shape_cast %114 : vector<16xf32> to vector<16x1xf32>
    %cst_56 = arith.constant 3.200000e+01 : f32
    %116 = vector.broadcast %cst_56 : f32 to vector<16x1xf32>
    %117 = arith.divf %115, %116 : vector<16x1xf32>
    %cst_57 = arith.constant 9.99999974E-6 : f32
    %118 = vector.broadcast %cst_57 : f32 to vector<16x1xf32>
    %119 = arith.addf %117, %118 : vector<16x1xf32>
    %120 = math.rsqrt %119 : vector<16x1xf32>
    %121 = vector.broadcast %120 : vector<16x1xf32> to vector<16x32xf32>
    %122 = arith.mulf %112, %121 : vector<16x32xf32>
    %123 = vector.broadcast %104 : vector<1x32xf32> to vector<16x32xf32>
    %124 = arith.mulf %122, %123 : vector<16x32xf32>
    %125 = vector.broadcast %106 : vector<1x32xf32> to vector<16x32xf32>
    %126 = arith.addf %124, %125 : vector<16x32xf32>
    %c0_58 = arith.constant 0 : index
    %c0_59 = arith.constant 0 : index
    %c0_60 = arith.constant 0 : index
    %127 = vector.load %arg13[%c0_58, %c0_59, %c0_60] : memref<2x32x2048xf32, #tpu.memory_space<vmem>>, vector<1x32x2048xf32>
    %128 = vector.shape_cast %127 : vector<1x32x2048xf32> to vector<32x2048xf32>
    %c0_61 = arith.constant 0 : index
    %c0_62 = arith.constant 0 : index
    %c0_63 = arith.constant 0 : index
    %129 = vector.load %arg14[%c0_61, %c0_62, %c0_63] : memref<2x1x2048xf32, #tpu.memory_space<vmem>>, vector<1x1x2048xf32>
    %130 = vector.shape_cast %129 : vector<1x1x2048xf32> to vector<1x2048xf32>
    %131 = arith.truncf %126 : vector<16x32xf32> to vector<16x32xbf16>
    %132 = arith.truncf %128 : vector<32x2048xf32> to vector<32x2048xbf16>
    %cst_64 = arith.constant dense<0.000000e+00> : vector<16x2048xf32>
    %133 = tpu.matmul %131, %132, %cst_64 {dimension_numbers = #tpu.dot_dimension_numbers<[1], [0], [0], [1], [0, 0, 1, 1], [], []>} : vector<16x32xbf16>, vector<32x2048xbf16>, vector<16x2048xf32> -> vector<16x2048xf32>
    %134 = vector.broadcast %130 : vector<1x2048xf32> to vector<16x2048xf32>
    %135 = arith.addf %133, %134 : vector<16x2048xf32>
    %cst_65 = arith.constant 0.000000e+00 : f32
    %136 = vector.broadcast %cst_65 : f32 to vector<16x2048xf32>
    %137 = arith.maximumf %135, %136 : vector<16x2048xf32>
    %c0_66 = arith.constant 0 : index
    %c0_67 = arith.constant 0 : index
    %c0_68 = arith.constant 0 : index
    %138 = vector.load %arg15[%c0_66, %c0_67, %c0_68] : memref<2x2048x32xf32, #tpu.memory_space<vmem>>, vector<1x2048x32xf32>
    %139 = vector.shape_cast %138 : vector<1x2048x32xf32> to vector<2048x32xf32>
    %c0_69 = arith.constant 0 : index
    %c0_70 = arith.constant 0 : index
    %c0_71 = arith.constant 0 : index
    %140 = vector.load %arg16[%c0_69, %c0_70, %c0_71] : memref<2x1x32xf32, #tpu.memory_space<vmem>>, vector<1x1x32xf32>
    %141 = vector.shape_cast %140 : vector<1x1x32xf32> to vector<1x32xf32>
    %142 = arith.truncf %137 : vector<16x2048xf32> to vector<16x2048xbf16>
    %143 = arith.truncf %139 : vector<2048x32xf32> to vector<2048x32xbf16>
    %cst_72 = arith.constant dense<0.000000e+00> : vector<16x32xf32>
    %144 = tpu.matmul %142, %143, %cst_72 {dimension_numbers = #tpu.dot_dimension_numbers<[1], [0], [0], [1], [0, 0, 1, 1], [], []>} : vector<16x2048xbf16>, vector<2048x32xbf16>, vector<16x32xf32> -> vector<16x32xf32>
    %145 = vector.broadcast %141 : vector<1x32xf32> to vector<16x32xf32>
    %146 = arith.addf %144, %145 : vector<16x32xf32>
    %147 = arith.addf %126, %146 : vector<16x32xf32>
    %c0_73 = arith.constant 0 : index
    %c0_74 = arith.constant 0 : index
    %c0_75 = arith.constant 0 : index
    %148 = vector.load %arg17[%c0_73, %c0_74, %c0_75] : memref<2x1x32xf32, #tpu.memory_space<vmem>>, vector<1x1x32xf32>
    %149 = vector.shape_cast %148 : vector<1x1x32xf32> to vector<1x32xf32>
    %c0_76 = arith.constant 0 : index
    %c0_77 = arith.constant 0 : index
    %c0_78 = arith.constant 0 : index
    %150 = vector.load %arg18[%c0_76, %c0_77, %c0_78] : memref<2x1x32xf32, #tpu.memory_space<vmem>>, vector<1x1x32xf32>
    %151 = vector.shape_cast %150 : vector<1x1x32xf32> to vector<1x32xf32>
    %cst_79 = arith.constant dense<0.000000e+00> : vector<16xf32>
    %152 = vector.multi_reduction <add>, %147, %cst_79 [1] : vector<16x32xf32> to vector<16xf32>
    %153 = vector.shape_cast %152 : vector<16xf32> to vector<16x1xf32>
    %cst_80 = arith.constant 3.200000e+01 : f32
    %154 = vector.broadcast %cst_80 : f32 to vector<16x1xf32>
    %155 = arith.divf %153, %154 : vector<16x1xf32>
    %156 = vector.broadcast %155 : vector<16x1xf32> to vector<16x32xf32>
    %157 = arith.subf %147, %156 : vector<16x32xf32>
    %158 = arith.mulf %157, %157 : vector<16x32xf32>
    %cst_81 = arith.constant dense<0.000000e+00> : vector<16xf32>
    %159 = vector.multi_reduction <add>, %158, %cst_81 [1] : vector<16x32xf32> to vector<16xf32>
    %160 = vector.shape_cast %159 : vector<16xf32> to vector<16x1xf32>
    %cst_82 = arith.constant 3.200000e+01 : f32
    %161 = vector.broadcast %cst_82 : f32 to vector<16x1xf32>
    %162 = arith.divf %160, %161 : vector<16x1xf32>
    %cst_83 = arith.constant 9.99999974E-6 : f32
    %163 = vector.broadcast %cst_83 : f32 to vector<16x1xf32>
    %164 = arith.addf %162, %163 : vector<16x1xf32>
    %165 = math.rsqrt %164 : vector<16x1xf32>
    %166 = vector.broadcast %165 : vector<16x1xf32> to vector<16x32xf32>
    %167 = arith.mulf %157, %166 : vector<16x32xf32>
    %168 = vector.broadcast %149 : vector<1x32xf32> to vector<16x32xf32>
    %169 = arith.mulf %167, %168 : vector<16x32xf32>
    %170 = vector.broadcast %151 : vector<1x32xf32> to vector<16x32xf32>
    %171 = arith.addf %169, %170 : vector<16x32xf32>
    %c1 = arith.constant 1 : index
    %c0_84 = arith.constant 0 : index
    %c0_85 = arith.constant 0 : index
    %172 = vector.load %arg3[%c1, %c0_84, %c0_85] : memref<2x32x32xf32, #tpu.memory_space<vmem>>, vector<1x32x32xf32>
    %173 = vector.shape_cast %172 : vector<1x32x32xf32> to vector<32x32xf32>
    %c1_86 = arith.constant 1 : index
    %c0_87 = arith.constant 0 : index
    %c0_88 = arith.constant 0 : index
    %174 = vector.load %arg4[%c1_86, %c0_87, %c0_88] : memref<2x1x32xf32, #tpu.memory_space<vmem>>, vector<1x1x32xf32>
    %175 = vector.shape_cast %174 : vector<1x1x32xf32> to vector<1x32xf32>
    %176 = arith.truncf %171 : vector<16x32xf32> to vector<16x32xbf16>
    %177 = arith.truncf %173 : vector<32x32xf32> to vector<32x32xbf16>
    %cst_89 = arith.constant dense<0.000000e+00> : vector<16x32xf32>
    %178 = tpu.matmul %176, %177, %cst_89 {dimension_numbers = #tpu.dot_dimension_numbers<[1], [0], [0], [1], [0, 0, 1, 1], [], []>} : vector<16x32xbf16>, vector<32x32xbf16>, vector<16x32xf32> -> vector<16x32xf32>
    %179 = vector.broadcast %175 : vector<1x32xf32> to vector<16x32xf32>
    %180 = arith.addf %178, %179 : vector<16x32xf32>
    %181 = vector.shape_cast %180 : vector<16x32xf32> to vector<2x8x32xf32>
    %c1_90 = arith.constant 1 : index
    %c0_91 = arith.constant 0 : index
    %c0_92 = arith.constant 0 : index
    %182 = vector.load %arg5[%c1_90, %c0_91, %c0_92] : memref<2x32x32xf32, #tpu.memory_space<vmem>>, vector<1x32x32xf32>
    %183 = vector.shape_cast %182 : vector<1x32x32xf32> to vector<32x32xf32>
    %c1_93 = arith.constant 1 : index
    %c0_94 = arith.constant 0 : index
    %c0_95 = arith.constant 0 : index
    %184 = vector.load %arg6[%c1_93, %c0_94, %c0_95] : memref<2x1x32xf32, #tpu.memory_space<vmem>>, vector<1x1x32xf32>
    %185 = vector.shape_cast %184 : vector<1x1x32xf32> to vector<1x32xf32>
    %186 = arith.truncf %171 : vector<16x32xf32> to vector<16x32xbf16>
    %187 = arith.truncf %183 : vector<32x32xf32> to vector<32x32xbf16>
    %cst_96 = arith.constant dense<0.000000e+00> : vector<16x32xf32>
    %188 = tpu.matmul %186, %187, %cst_96 {dimension_numbers = #tpu.dot_dimension_numbers<[1], [0], [0], [1], [0, 0, 1, 1], [], []>} : vector<16x32xbf16>, vector<32x32xbf16>, vector<16x32xf32> -> vector<16x32xf32>
    %189 = vector.broadcast %185 : vector<1x32xf32> to vector<16x32xf32>
    %190 = arith.addf %188, %189 : vector<16x32xf32>
    %191 = vector.shape_cast %190 : vector<16x32xf32> to vector<2x8x32xf32>
    %c1_97 = arith.constant 1 : index
    %c0_98 = arith.constant 0 : index
    %c0_99 = arith.constant 0 : index
    %192 = vector.load %arg7[%c1_97, %c0_98, %c0_99] : memref<2x32x32xf32, #tpu.memory_space<vmem>>, vector<1x32x32xf32>
    %193 = vector.shape_cast %192 : vector<1x32x32xf32> to vector<32x32xf32>
    %c1_100 = arith.constant 1 : index
    %c0_101 = arith.constant 0 : index
    %c0_102 = arith.constant 0 : index
    %194 = vector.load %arg8[%c1_100, %c0_101, %c0_102] : memref<2x1x32xf32, #tpu.memory_space<vmem>>, vector<1x1x32xf32>
    %195 = vector.shape_cast %194 : vector<1x1x32xf32> to vector<1x32xf32>
    %196 = arith.truncf %171 : vector<16x32xf32> to vector<16x32xbf16>
    %197 = arith.truncf %193 : vector<32x32xf32> to vector<32x32xbf16>
    %cst_103 = arith.constant dense<0.000000e+00> : vector<16x32xf32>
    %198 = tpu.matmul %196, %197, %cst_103 {dimension_numbers = #tpu.dot_dimension_numbers<[1], [0], [0], [1], [0, 0, 1, 1], [], []>} : vector<16x32xbf16>, vector<32x32xbf16>, vector<16x32xf32> -> vector<16x32xf32>
    %199 = vector.broadcast %195 : vector<1x32xf32> to vector<16x32xf32>
    %200 = arith.addf %198, %199 : vector<16x32xf32>
    %201 = vector.shape_cast %200 : vector<16x32xf32> to vector<2x8x32xf32>
    %202 = vector.extract_strided_slice %181 {offsets = [0, 0, 0], sizes = [2, 8, 16], strides = [1, 1, 1]} : vector<2x8x32xf32> to vector<2x8x16xf32>
    %203 = arith.truncf %202 : vector<2x8x16xf32> to vector<2x8x16xbf16>
    %204 = vector.extract_strided_slice %191 {offsets = [0, 0, 0], sizes = [2, 8, 16], strides = [1, 1, 1]} : vector<2x8x32xf32> to vector<2x8x16xf32>
    %205 = arith.truncf %204 : vector<2x8x16xf32> to vector<2x8x16xbf16>
    %206 = vector.extract_strided_slice %201 {offsets = [0, 0, 0], sizes = [2, 8, 16], strides = [1, 1, 1]} : vector<2x8x32xf32> to vector<2x8x16xf32>
    %207 = arith.truncf %206 : vector<2x8x16xf32> to vector<2x8x16xbf16>
    "tpu.trace_start"() <{level = 10 : i32, message = "bqd,bkd->bqk"}> : () -> ()
    %cst_104 = arith.constant dense<0.000000e+00> : vector<2x8x8xf32>
    %208 = tpu.matmul %203, %205, %cst_104 {dimension_numbers = #tpu.dot_dimension_numbers<[2], [2], [1], [1], [0, 0, 0, 1, 1, 1], [0], [0]>} : vector<2x8x16xbf16>, vector<2x8x16xbf16>, vector<2x8x8xf32> -> vector<2x8x8xf32>
    "tpu.trace_stop"() : () -> ()
    %cst_105 = arith.constant 2.500000e-01 : f32
    %209 = vector.broadcast %cst_105 : f32 to vector<2x8x8xf32>
    %210 = arith.mulf %208, %209 : vector<2x8x8xf32>
    %211 = vector.broadcast %14 : vector<2x1x8xf32> to vector<2x8x8xf32>
    %212 = arith.addf %210, %211 : vector<2x8x8xf32>
    %cst_106 = arith.constant dense<0xFF800000> : vector<2x8xf32>
    %213 = vector.multi_reduction <maximumf>, %212, %cst_106 [2] : vector<2x8x8xf32> to vector<2x8xf32>
    %214 = vector.shape_cast %213 : vector<2x8xf32> to vector<2x8x1xf32>
    %215 = vector.broadcast %214 : vector<2x8x1xf32> to vector<2x8x8xf32>
    %216 = arith.subf %212, %215 : vector<2x8x8xf32>
    %217 = math.exp %216 : vector<2x8x8xf32>
    %cst_107 = arith.constant dense<0.000000e+00> : vector<2x8xf32>
    %218 = vector.multi_reduction <add>, %217, %cst_107 [2] : vector<2x8x8xf32> to vector<2x8xf32>
    %219 = vector.shape_cast %218 : vector<2x8xf32> to vector<2x8x1xf32>
    %220 = tpu.reciprocal %219 {approx = true} : vector<2x8x1xf32> -> vector<2x8x1xf32>
    %221 = vector.broadcast %220 : vector<2x8x1xf32> to vector<2x8x8xf32>
    %222 = arith.mulf %217, %221 : vector<2x8x8xf32>
    %223 = arith.truncf %222 : vector<2x8x8xf32> to vector<2x8x8xbf16>
    "tpu.trace_start"() <{level = 10 : i32, message = "bqk,bkd->bqd"}> : () -> ()
    %cst_108 = arith.constant dense<0.000000e+00> : vector<2x8x16xf32>
    %224 = tpu.matmul %223, %207, %cst_108 {dimension_numbers = #tpu.dot_dimension_numbers<[2], [1], [1], [2], [0, 0, 0, 1, 1, 2], [0], [0]>} : vector<2x8x8xbf16>, vector<2x8x16xbf16>, vector<2x8x16xf32> -> vector<2x8x16xf32>
    "tpu.trace_stop"() : () -> ()
    %225 = vector.extract_strided_slice %181 {offsets = [0, 0, 16], sizes = [2, 8, 16], strides = [1, 1, 1]} : vector<2x8x32xf32> to vector<2x8x16xf32>
    %226 = arith.truncf %225 : vector<2x8x16xf32> to vector<2x8x16xbf16>
    %227 = vector.extract_strided_slice %191 {offsets = [0, 0, 16], sizes = [2, 8, 16], strides = [1, 1, 1]} : vector<2x8x32xf32> to vector<2x8x16xf32>
    %228 = arith.truncf %227 : vector<2x8x16xf32> to vector<2x8x16xbf16>
    %229 = vector.extract_strided_slice %201 {offsets = [0, 0, 16], sizes = [2, 8, 16], strides = [1, 1, 1]} : vector<2x8x32xf32> to vector<2x8x16xf32>
    %230 = arith.truncf %229 : vector<2x8x16xf32> to vector<2x8x16xbf16>
    "tpu.trace_start"() <{level = 10 : i32, message = "bqd,bkd->bqk"}> : () -> ()
    %cst_109 = arith.constant dense<0.000000e+00> : vector<2x8x8xf32>
    %231 = tpu.matmul %226, %228, %cst_109 {dimension_numbers = #tpu.dot_dimension_numbers<[2], [2], [1], [1], [0, 0, 0, 1, 1, 1], [0], [0]>} : vector<2x8x16xbf16>, vector<2x8x16xbf16>, vector<2x8x8xf32> -> vector<2x8x8xf32>
    "tpu.trace_stop"() : () -> ()
    %cst_110 = arith.constant 2.500000e-01 : f32
    %232 = vector.broadcast %cst_110 : f32 to vector<2x8x8xf32>
    %233 = arith.mulf %231, %232 : vector<2x8x8xf32>
    %234 = vector.broadcast %14 : vector<2x1x8xf32> to vector<2x8x8xf32>
    %235 = arith.addf %233, %234 : vector<2x8x8xf32>
    %cst_111 = arith.constant dense<0xFF800000> : vector<2x8xf32>
    %236 = vector.multi_reduction <maximumf>, %235, %cst_111 [2] : vector<2x8x8xf32> to vector<2x8xf32>
    %237 = vector.shape_cast %236 : vector<2x8xf32> to vector<2x8x1xf32>
    %238 = vector.broadcast %237 : vector<2x8x1xf32> to vector<2x8x8xf32>
    %239 = arith.subf %235, %238 : vector<2x8x8xf32>
    %240 = math.exp %239 : vector<2x8x8xf32>
    %cst_112 = arith.constant dense<0.000000e+00> : vector<2x8xf32>
    %241 = vector.multi_reduction <add>, %240, %cst_112 [2] : vector<2x8x8xf32> to vector<2x8xf32>
    %242 = vector.shape_cast %241 : vector<2x8xf32> to vector<2x8x1xf32>
    %243 = tpu.reciprocal %242 {approx = true} : vector<2x8x1xf32> -> vector<2x8x1xf32>
    %244 = vector.broadcast %243 : vector<2x8x1xf32> to vector<2x8x8xf32>
    %245 = arith.mulf %240, %244 : vector<2x8x8xf32>
    %246 = arith.truncf %245 : vector<2x8x8xf32> to vector<2x8x8xbf16>
    "tpu.trace_start"() <{level = 10 : i32, message = "bqk,bkd->bqd"}> : () -> ()
    %cst_113 = arith.constant dense<0.000000e+00> : vector<2x8x16xf32>
    %247 = tpu.matmul %246, %230, %cst_113 {dimension_numbers = #tpu.dot_dimension_numbers<[2], [1], [1], [2], [0, 0, 0, 1, 1, 2], [0], [0]>} : vector<2x8x8xbf16>, vector<2x8x16xbf16>, vector<2x8x16xf32> -> vector<2x8x16xf32>
    "tpu.trace_stop"() : () -> ()
    %248 = tpu.concatenate %224, %247 in 2 : vector<2x8x16xf32>, vector<2x8x16xf32> -> vector<2x8x32xf32>
    %249 = vector.shape_cast %248 : vector<2x8x32xf32> to vector<16x32xf32>
    %c1_114 = arith.constant 1 : index
    %c0_115 = arith.constant 0 : index
    %c0_116 = arith.constant 0 : index
    %250 = vector.load %arg9[%c1_114, %c0_115, %c0_116] : memref<2x32x32xf32, #tpu.memory_space<vmem>>, vector<1x32x32xf32>
    %251 = vector.shape_cast %250 : vector<1x32x32xf32> to vector<32x32xf32>
    %c1_117 = arith.constant 1 : index
    %c0_118 = arith.constant 0 : index
    %c0_119 = arith.constant 0 : index
    %252 = vector.load %arg10[%c1_117, %c0_118, %c0_119] : memref<2x1x32xf32, #tpu.memory_space<vmem>>, vector<1x1x32xf32>
    %253 = vector.shape_cast %252 : vector<1x1x32xf32> to vector<1x32xf32>
    %254 = arith.truncf %249 : vector<16x32xf32> to vector<16x32xbf16>
    %255 = arith.truncf %251 : vector<32x32xf32> to vector<32x32xbf16>
    %cst_120 = arith.constant dense<0.000000e+00> : vector<16x32xf32>
    %256 = tpu.matmul %254, %255, %cst_120 {dimension_numbers = #tpu.dot_dimension_numbers<[1], [0], [0], [1], [0, 0, 1, 1], [], []>} : vector<16x32xbf16>, vector<32x32xbf16>, vector<16x32xf32> -> vector<16x32xf32>
    %257 = vector.broadcast %253 : vector<1x32xf32> to vector<16x32xf32>
    %258 = arith.addf %256, %257 : vector<16x32xf32>
    %259 = arith.addf %171, %258 : vector<16x32xf32>
    %c1_121 = arith.constant 1 : index
    %c0_122 = arith.constant 0 : index
    %c0_123 = arith.constant 0 : index
    %260 = vector.load %arg11[%c1_121, %c0_122, %c0_123] : memref<2x1x32xf32, #tpu.memory_space<vmem>>, vector<1x1x32xf32>
    %261 = vector.shape_cast %260 : vector<1x1x32xf32> to vector<1x32xf32>
    %c1_124 = arith.constant 1 : index
    %c0_125 = arith.constant 0 : index
    %c0_126 = arith.constant 0 : index
    %262 = vector.load %arg12[%c1_124, %c0_125, %c0_126] : memref<2x1x32xf32, #tpu.memory_space<vmem>>, vector<1x1x32xf32>
    %263 = vector.shape_cast %262 : vector<1x1x32xf32> to vector<1x32xf32>
    %cst_127 = arith.constant dense<0.000000e+00> : vector<16xf32>
    %264 = vector.multi_reduction <add>, %259, %cst_127 [1] : vector<16x32xf32> to vector<16xf32>
    %265 = vector.shape_cast %264 : vector<16xf32> to vector<16x1xf32>
    %cst_128 = arith.constant 3.200000e+01 : f32
    %266 = vector.broadcast %cst_128 : f32 to vector<16x1xf32>
    %267 = arith.divf %265, %266 : vector<16x1xf32>
    %268 = vector.broadcast %267 : vector<16x1xf32> to vector<16x32xf32>
    %269 = arith.subf %259, %268 : vector<16x32xf32>
    %270 = arith.mulf %269, %269 : vector<16x32xf32>
    %cst_129 = arith.constant dense<0.000000e+00> : vector<16xf32>
    %271 = vector.multi_reduction <add>, %270, %cst_129 [1] : vector<16x32xf32> to vector<16xf32>
    %272 = vector.shape_cast %271 : vector<16xf32> to vector<16x1xf32>
    %cst_130 = arith.constant 3.200000e+01 : f32
    %273 = vector.broadcast %cst_130 : f32 to vector<16x1xf32>
    %274 = arith.divf %272, %273 : vector<16x1xf32>
    %cst_131 = arith.constant 9.99999974E-6 : f32
    %275 = vector.broadcast %cst_131 : f32 to vector<16x1xf32>
    %276 = arith.addf %274, %275 : vector<16x1xf32>
    %277 = math.rsqrt %276 : vector<16x1xf32>
    %278 = vector.broadcast %277 : vector<16x1xf32> to vector<16x32xf32>
    %279 = arith.mulf %269, %278 : vector<16x32xf32>
    %280 = vector.broadcast %261 : vector<1x32xf32> to vector<16x32xf32>
    %281 = arith.mulf %279, %280 : vector<16x32xf32>
    %282 = vector.broadcast %263 : vector<1x32xf32> to vector<16x32xf32>
    %283 = arith.addf %281, %282 : vector<16x32xf32>
    %c1_132 = arith.constant 1 : index
    %c0_133 = arith.constant 0 : index
    %c0_134 = arith.constant 0 : index
    %284 = vector.load %arg13[%c1_132, %c0_133, %c0_134] : memref<2x32x2048xf32, #tpu.memory_space<vmem>>, vector<1x32x2048xf32>
    %285 = vector.shape_cast %284 : vector<1x32x2048xf32> to vector<32x2048xf32>
    %c1_135 = arith.constant 1 : index
    %c0_136 = arith.constant 0 : index
    %c0_137 = arith.constant 0 : index
    %286 = vector.load %arg14[%c1_135, %c0_136, %c0_137] : memref<2x1x2048xf32, #tpu.memory_space<vmem>>, vector<1x1x2048xf32>
    %287 = vector.shape_cast %286 : vector<1x1x2048xf32> to vector<1x2048xf32>
    %288 = arith.truncf %283 : vector<16x32xf32> to vector<16x32xbf16>
    %289 = arith.truncf %285 : vector<32x2048xf32> to vector<32x2048xbf16>
    %cst_138 = arith.constant dense<0.000000e+00> : vector<16x2048xf32>
    %290 = tpu.matmul %288, %289, %cst_138 {dimension_numbers = #tpu.dot_dimension_numbers<[1], [0], [0], [1], [0, 0, 1, 1], [], []>} : vector<16x32xbf16>, vector<32x2048xbf16>, vector<16x2048xf32> -> vector<16x2048xf32>
    %291 = vector.broadcast %287 : vector<1x2048xf32> to vector<16x2048xf32>
    %292 = arith.addf %290, %291 : vector<16x2048xf32>
    %cst_139 = arith.constant 0.000000e+00 : f32
    %293 = vector.broadcast %cst_139 : f32 to vector<16x2048xf32>
    %294 = arith.maximumf %292, %293 : vector<16x2048xf32>
    %c1_140 = arith.constant 1 : index
    %c0_141 = arith.constant 0 : index
    %c0_142 = arith.constant 0 : index
    %295 = vector.load %arg15[%c1_140, %c0_141, %c0_142] : memref<2x2048x32xf32, #tpu.memory_space<vmem>>, vector<1x2048x32xf32>
    %296 = vector.shape_cast %295 : vector<1x2048x32xf32> to vector<2048x32xf32>
    %c1_143 = arith.constant 1 : index
    %c0_144 = arith.constant 0 : index
    %c0_145 = arith.constant 0 : index
    %297 = vector.load %arg16[%c1_143, %c0_144, %c0_145] : memref<2x1x32xf32, #tpu.memory_space<vmem>>, vector<1x1x32xf32>
    %298 = vector.shape_cast %297 : vector<1x1x32xf32> to vector<1x32xf32>
    %299 = arith.truncf %294 : vector<16x2048xf32> to vector<16x2048xbf16>
    %300 = arith.truncf %296 : vector<2048x32xf32> to vector<2048x32xbf16>
    %cst_146 = arith.constant dense<0.000000e+00> : vector<16x32xf32>
    %301 = tpu.matmul %299, %300, %cst_146 {dimension_numbers = #tpu.dot_dimension_numbers<[1], [0], [0], [1], [0, 0, 1, 1], [], []>} : vector<16x2048xbf16>, vector<2048x32xbf16>, vector<16x32xf32> -> vector<16x32xf32>
    %302 = vector.broadcast %298 : vector<1x32xf32> to vector<16x32xf32>
    %303 = arith.addf %301, %302 : vector<16x32xf32>
    %304 = arith.addf %283, %303 : vector<16x32xf32>
    %c1_147 = arith.constant 1 : index
    %c0_148 = arith.constant 0 : index
    %c0_149 = arith.constant 0 : index
    %305 = vector.load %arg17[%c1_147, %c0_148, %c0_149] : memref<2x1x32xf32, #tpu.memory_space<vmem>>, vector<1x1x32xf32>
    %306 = vector.shape_cast %305 : vector<1x1x32xf32> to vector<1x32xf32>
    %c1_150 = arith.constant 1 : index
    %c0_151 = arith.constant 0 : index
    %c0_152 = arith.constant 0 : index
    %307 = vector.load %arg18[%c1_150, %c0_151, %c0_152] : memref<2x1x32xf32, #tpu.memory_space<vmem>>, vector<1x1x32xf32>
    %308 = vector.shape_cast %307 : vector<1x1x32xf32> to vector<1x32xf32>
    %cst_153 = arith.constant dense<0.000000e+00> : vector<16xf32>
    %309 = vector.multi_reduction <add>, %304, %cst_153 [1] : vector<16x32xf32> to vector<16xf32>
    %310 = vector.shape_cast %309 : vector<16xf32> to vector<16x1xf32>
    %cst_154 = arith.constant 3.200000e+01 : f32
    %311 = vector.broadcast %cst_154 : f32 to vector<16x1xf32>
    %312 = arith.divf %310, %311 : vector<16x1xf32>
    %313 = vector.broadcast %312 : vector<16x1xf32> to vector<16x32xf32>
    %314 = arith.subf %304, %313 : vector<16x32xf32>
    %315 = arith.mulf %314, %314 : vector<16x32xf32>
    %cst_155 = arith.constant dense<0.000000e+00> : vector<16xf32>
    %316 = vector.multi_reduction <add>, %315, %cst_155 [1] : vector<16x32xf32> to vector<16xf32>
    %317 = vector.shape_cast %316 : vector<16xf32> to vector<16x1xf32>
    %cst_156 = arith.constant 3.200000e+01 : f32
    %318 = vector.broadcast %cst_156 : f32 to vector<16x1xf32>
    %319 = arith.divf %317, %318 : vector<16x1xf32>
    %cst_157 = arith.constant 9.99999974E-6 : f32
    %320 = vector.broadcast %cst_157 : f32 to vector<16x1xf32>
    %321 = arith.addf %319, %320 : vector<16x1xf32>
    %322 = math.rsqrt %321 : vector<16x1xf32>
    %323 = vector.broadcast %322 : vector<16x1xf32> to vector<16x32xf32>
    %324 = arith.mulf %314, %323 : vector<16x32xf32>
    %325 = vector.broadcast %306 : vector<1x32xf32> to vector<16x32xf32>
    %326 = arith.mulf %324, %325 : vector<16x32xf32>
    %327 = vector.broadcast %308 : vector<1x32xf32> to vector<16x32xf32>
    %328 = arith.addf %326, %327 : vector<16x32xf32>
    %c0_158 = arith.constant 0 : index
    %c0_159 = arith.constant 0 : index
    %329 = vector.load %arg19[%c0_158, %c0_159] : memref<1x32xf32, #tpu.memory_space<vmem>>, vector<1x32xf32>
    %c0_160 = arith.constant 0 : index
    %c0_161 = arith.constant 0 : index
    %330 = vector.load %arg20[%c0_160, %c0_161] : memref<1x32xf32, #tpu.memory_space<vmem>>, vector<1x32xf32>
    %cst_162 = arith.constant dense<0.000000e+00> : vector<16xf32>
    %331 = vector.multi_reduction <add>, %328, %cst_162 [1] : vector<16x32xf32> to vector<16xf32>
    %332 = vector.shape_cast %331 : vector<16xf32> to vector<16x1xf32>
    %cst_163 = arith.constant 3.200000e+01 : f32
    %333 = vector.broadcast %cst_163 : f32 to vector<16x1xf32>
    %334 = arith.divf %332, %333 : vector<16x1xf32>
    %335 = vector.broadcast %334 : vector<16x1xf32> to vector<16x32xf32>
    %336 = arith.subf %328, %335 : vector<16x32xf32>
    %337 = arith.mulf %336, %336 : vector<16x32xf32>
    %cst_164 = arith.constant dense<0.000000e+00> : vector<16xf32>
    %338 = vector.multi_reduction <add>, %337, %cst_164 [1] : vector<16x32xf32> to vector<16xf32>
    %339 = vector.shape_cast %338 : vector<16xf32> to vector<16x1xf32>
    %cst_165 = arith.constant 3.200000e+01 : f32
    %340 = vector.broadcast %cst_165 : f32 to vector<16x1xf32>
    %341 = arith.divf %339, %340 : vector<16x1xf32>
    %cst_166 = arith.constant 9.99999974E-6 : f32
    %342 = vector.broadcast %cst_166 : f32 to vector<16x1xf32>
    %343 = arith.addf %341, %342 : vector<16x1xf32>
    %344 = math.rsqrt %343 : vector<16x1xf32>
    %345 = vector.broadcast %344 : vector<16x1xf32> to vector<16x32xf32>
    %346 = arith.mulf %336, %345 : vector<16x32xf32>
    %347 = vector.broadcast %329 : vector<1x32xf32> to vector<16x32xf32>
    %348 = arith.mulf %346, %347 : vector<16x32xf32>
    %349 = vector.broadcast %330 : vector<1x32xf32> to vector<16x32xf32>
    %350 = arith.addf %348, %349 : vector<16x32xf32>
    %c0_167 = arith.constant 0 : index
    %c0_168 = arith.constant 0 : index
    %351 = vector.load %arg21[%c0_167, %c0_168] : memref<32x128xf32, #tpu.memory_space<vmem>>, vector<32x128xf32>
    %c0_169 = arith.constant 0 : index
    %c0_170 = arith.constant 0 : index
    %352 = vector.load %arg22[%c0_169, %c0_170] : memref<1x128xf32, #tpu.memory_space<vmem>>, vector<1x128xf32>
    %353 = arith.truncf %350 : vector<16x32xf32> to vector<16x32xbf16>
    %354 = arith.truncf %351 : vector<32x128xf32> to vector<32x128xbf16>
    %cst_171 = arith.constant dense<0.000000e+00> : vector<16x128xf32>
    %355 = tpu.matmul %353, %354, %cst_171 {dimension_numbers = #tpu.dot_dimension_numbers<[1], [0], [0], [1], [0, 0, 1, 1], [], []>} : vector<16x32xbf16>, vector<32x128xbf16>, vector<16x128xf32> -> vector<16x128xf32>
    %356 = vector.broadcast %352 : vector<1x128xf32> to vector<16x128xf32>
    %357 = arith.addf %355, %356 : vector<16x128xf32>
    %358 = vector.shape_cast %357 : vector<16x128xf32> to vector<2x8x128xf32>
    %c0_172 = arith.constant 0 : index
    %c0_173 = arith.constant 0 : index
    %c0_174 = arith.constant 0 : index
    %359 = vector.load %arg23[%c0_172, %c0_173, %c0_174] : memref<2x8x128xf32, #tpu.memory_space<vmem>>, vector<2x8x128xf32>
    tpu.vector_store %arg23[%c0_172, %c0_173, %c0_174], %358 {strides = array<i32>} : memref<2x8x128xf32, #tpu.memory_space<vmem>>, vector<2x8x128xf32>,
    return
  }
}

</mosaic_0001>

<bundles_post_ra>
// kernel: transformer4rec_forward.1
= control target key start
LH: loop header
LB: loop body
LE: loop exit
PB: predicated region body
PF: predicated region fallthrough
CT: control target
= control target key end

     0   :  { %v5441_v0 = vmov 0.0   ;;  %vm5442_vm0 = vmmov 0   ;;  %vm122_vm1 = vcmask 261120   ;;  %vm281_vm2 = vcmask 130048   ;;  %s8243_s30 = smov 112   ;;  %s8211_s5 = inlined_call_operand.vmem [shape: f32[2,32,32], index: 5, kind: input, shape index: {}]   ;;  %s8212_s3 = inlined_call_operand.vmem [shape: f32[2,32,32], index: 3, kind: input, shape index: {}]   ;;  %s8213_s0 = inlined_call_operand.vmem [shape: f32[2,8,32], index: 0, kind: input, shape index: {}]   ;;  %s8214_s1 = inlined_call_operand.vmem [shape: f32[8,32], index: 1, kind: input, shape index: {}]   ;;  %s8215_s7 = inlined_call_operand.vmem [shape: f32[2,32,32], index: 7, kind: input, shape index: {}]   ;;  %s8216_s6 = inlined_call_operand.vmem [shape: f32[2,1,32], index: 6, kind: input, shape index: {}]   ;;  %s8217_s4 = inlined_call_operand.vmem [shape: f32[2,1,32], index: 4, kind: input, shape index: {}]   ;;  %s8218_s8 = inlined_call_operand.vmem [shape: f32[2,1,32], index: 8, kind: input, shape index: {}]   ;;  %s8219_s2 = inlined_call_operand.vmem [shape: f32[2,8], index: 2, kind: input, shape index: {}]   ;;  %s8220_s9 = inlined_call_operand.vmem [shape: f32[2,32,32], index: 9, kind: input, shape index: {}]   ;;  %s8221_s10 = inlined_call_operand.vmem [shape: f32[2,1,32], index: 10, kind: input, shape index: {}]   ;;  %s8222_s13 = inlined_call_operand.vmem [shape: f32[2,32,2048], index: 13, kind: input, shape index: {}]   ;;  %s8223_s11 = inlined_call_operand.vmem [shape: f32[2,1,32], index: 11, kind: input, shape index: {}]   ;;  %s8224_s12 = inlined_call_operand.vmem [shape: f32[2,1,32], index: 12, kind: input, shape index: {}]   ;;  %s8225_s15 = inlined_call_operand.vmem [shape: f32[2,2048,32], index: 15, kind: input, shape index: {}]   ;;  %s8226_s14 = inlined_call_operand.vmem [shape: f32[2,1,2048], index: 14, kind: input, shape index: {}]   ;;  %s8227_s16 = inlined_call_operand.vmem [shape: f32[2,1,32], index: 16, kind: input, shape index: {}]   ;;  %s8228_s17 = inlined_call_operand.vmem [shape: f32[2,1,32], index: 17, kind: input, shape index: {}]   ;;  %s8229_s18 = inlined_call_operand.vmem [shape: f32[2,1,32], index: 18, kind: input, shape index: {}]   ;;  %s8230_s21 = inlined_call_operand.vmem [shape: f32[32,128], index: 21, kind: input, shape index: {}]   ;;  %s8231_s19 = inlined_call_operand.vmem [shape: f32[1,32], index: 19, kind: input, shape index: {}]   ;;  %s8232_s20 = inlined_call_operand.vmem [shape: f32[1,32], index: 20, kind: input, shape index: {}]   ;;  %s8233_s22 = inlined_call_operand.vmem [shape: f32[1,128], index: 22, kind: input, shape index: {}]   ;;  %s8234_s23 = inlined_call_operand.vmem [shape: f32[2,8,128], index: 23, kind: output, shape index: {}]  }
   0x1   :  { %8246 = sst [smem:[#allocation2_spill]] %s8211_s5  ;;  %5213 = vmatprep.subr.bf16.mxu1 %v5441_v0  ;;  %5205 = vmatprep.subr.bf16.mxu0 %v5441_v0  ;;  %vm416_vm3 = vcmask 1043456   ;;  %v5444_v58 = vmov 1966171168   ;;  %v89_v60 = vlaneseq  ;;  %v82_v61 = vld [vmem:[%s8219_s2] sm:$0x3] }
   0x2   :  { %8247 = sst [smem:[#allocation3_spill]] %s8212_s3  ;;  %5217 = vmatprep.mubr.msk.bf16.mxu1 %vm5442_vm0, %v5441_v0  ;;  %5209 = vmatprep.mubr.msk.bf16.mxu0 %vm5442_vm0, %v5441_v0  ;;  %v87_v59 = vunpack.c.l.s4 %v5444_v58  ;;  %vm83_vm4 = vcmp.gt.f32.partialorder %v82_v61, 0.5  ;;  %vm388_vm5 = vcmask 64512  }
   0x3   :  { %8248 = sst [smem:[#allocation4_spill]] %s8213_s0  ;;  %v5681_v63 = vshrl.u32 %v89_v60, 7 }
   0x4   :  { %8249 = sst [smem:[#allocation5_spill]] %s8214_s1  ;;  %v88_v62 = vunpack.c.0.s8 %v87_v59 }
   0x5   :  { %8250 = sst [smem:[#allocation6_spill]] %s8215_s7 }
   0x6   :  { %8251 = sst [smem:[#allocation7_spill]] %s8216_s6 }
   0x7   :  { %8252 = sst [smem:[#allocation8_spill]] %s8217_s4  ;;  %s8242_s4 = smov 16  }
   0x8   :  { %8253 = sst [smem:[#allocation9_spill]] %s8218_s8 }
   0x9   :  { %8254 = sst [smem:[#allocation10_spill]] %s8233_s22 }
   0xa   :  { %8255 = sst [smem:[#allocation11_spill]] %s8234_s23 }
   0xb   :  { %s8256_s24 = sld [smem:[#allocation2_spill]] }
   0xc   :  { %s8257_s0 = sld [smem:[#allocation3_spill]] }
   0xd   :  { %s8258_s26 = sld [smem:[#allocation4_spill]] }
   0xe   :  { %s8259_s29 = sld [smem:[#allocation5_spill]] }
   0xf   :  { %s8260_s7 = sld [smem:[#allocation6_spill]] }
  0x10   :  { %s8261_s28 = sld [smem:[#allocation7_spill]] }
  0x11   :  { %v169_v1 = vld [vmem:[%s8256_s24 + $0x10] sm:$0xff]  ;;  %v170_v2 = vld [vmem:[%s8256_s24 + $0x18] sm:$0xff]  ;;  %v167_v6 = vld [vmem:[%s8256_s24] sm:$0xff]  ;;  %s8262_s5 = sld [smem:[#allocation8_spill]] }
  0x12   :  { %v110_v3 = vld [vmem:[%s8257_s0 + $0x10] sm:$0xff]  ;;  %v173_v4 = vpack.c.bf16 %v170_v2, %v169_v1  ;;  %v111_v5 = vld [vmem:[%s8257_s0 + $0x18] sm:$0xff]  ;;  %v168_v7 = vld [vmem:[%s8256_s24 + $0x8] sm:$0xff]  ;;  %s8263_s3 = sld [smem:[#allocation9_spill]]  ;;  %v91_v1 = vsub.s32 %v88_v62, %v5681_v63  ;;  %v84_v2 = vsel %vm83_vm4, -1e+30, %v5441_v0 }
  0x13   :  { %v115_v8 = vpack.c.bf16 %v111_v5, %v110_v3  ;;  %v108_v9 = vld [vmem:[%s8257_s0] sm:$0xff]  ;;  %v109_v10 = vld [vmem:[%s8257_s0 + $0x8] sm:$0xff]  ;;  %v172_v12 = vpack.c.bf16 %v168_v7, %v167_v6  ;;  %v5686_v5 = vsub.s32 0, %v5681_v63  ;;  %s8266_s1 = sld [smem:[#allocation10_spill]] }
  0x14   :  { %v75_v11 = vld [vmem:[%s8258_s26] sm:$0xff]  ;;  %5214 = vmatpush3.bf16.msra.mxu1 %v173_v4  ;;  %v76_v13 = vld [vmem:[%s8258_s26 + $0x8] sm:$0xff]  ;;  %v114_v16 = vpack.c.bf16 %v109_v10, %v108_v9  ;;  %v92_v3 = vrot.slane %v84_v2, %v91_v1  ;;  %s8267_s6 = sld [smem:[#allocation11_spill]] }
  0x15   :  { %v77_v14 = vmul.f32 5.656854, %v75_v11  ;;  %v79_v15 = vld [vmem:[%s8259_s29] sm:$0xff]  ;;  %5206 = vmatpush3.bf16.msra.mxu0 %v115_v8  ;;  %5215 = vmatprep.subr.bf16.mxu1 %v5441_v0  ;;  %v78_v17 = vmul.f32 5.656854, %v76_v13  ;;  %v223_v19 = vld [vmem:[%s8260_s7 + $0x10] sm:$0xff] }
  0x16   :  { %5207 = vmatprep.subr.bf16.mxu0 %v5441_v0  ;;  %v224_v20 = vld [vmem:[%s8260_s7 + $0x18] sm:$0xff]  ;;  %v221_v24 = vld [vmem:[%s8260_s7] sm:$0xff]  ;;  %v222_v25 = vld [vmem:[%s8260_s7 + $0x8] sm:$0xff]  ;;  %v100_v4 = vrot.slane %v92_v3, %v91_v1  ;;  %v93_v6 = vcombine.high %v92_v3, %v92_v3 }
  0x17   :  { %v5608_v18 = vadd.f32 %v79_v15, %v77_v14  ;;  %v5616_v21 = vadd.f32 %v79_v15, %v78_v17  ;;  %v227_v23 = vpack.c.bf16 %v224_v20, %v223_v19  ;;  %v226_v26 = vpack.c.bf16 %v222_v25, %v221_v24  ;;  %v4387_v27 = vld [vmem:[%s8261_s28] ss:$0 sm:$0xff] }
  0x18   :  { %5216 = vmatpush3.bf16.msra.mxu1 %v172_v12  ;;  %v4385_v31 = vld [vmem:[%s8262_s5] ss:$0 sm:$0xff]  ;;  %v5689_v7 = vrot.slane %v100_v4, %v5686_v5  ;;  %v107_v8 = vrot.slane %v93_v6, %v91_v1 }
  0x19   :  { %5208 = vmatpush3.bf16.msra.mxu0 %v114_v16  ;;  %v113_v22 = vpack.c.bf16 %v5616_v21, %v5608_v18  ;;  %5229 = vmatprep.subr.bf16.mxu1 %v5441_v0  ;;  %v4389_v47 = vld [vmem:[%s8263_s3] ss:$0 sm:$0xff] }
  0x1a   :  { %5221 = vmatprep.subr.bf16.mxu0 %v5441_v0  ;;  %v5693_v13 = vrot.slane %v107_v8, %v5686_v5 }
  0x1b   :  { %5218 = vmatmul.mubr.msk.bf16.vlgmr.msra.gmra.mxu1 %vm122_vm1, %v113_v22 }
  0x1c   :  { %5210 = vmatmul.mubr.msk.bf16.vlgmr.msra.gmra.mxu0 %vm122_vm1, %v113_v22  ;;  %5231 = vmatprep.mubr.msk.bf16.mxu1 %vm5442_vm0, %v5441_v0 }
  0x1d   :  { %5222 = vmatpush3.bf16.msra.mxu0 %v227_v23  ;;  %5225 = vmatprep.mubr.msk.bf16.mxu0 %vm5442_vm0, %v5441_v0 }
  0x1e   :  { %5223 = vmatprep.subr.bf16.mxu0 %v5441_v0 }
  0x21   :  { %5224 = vmatpush3.bf16.msra.mxu0 %v226_v26 }
  0x22   :  { %5235 = vmatprep.subr.bf16.mxu0 %v5441_v0 }
  0x24   :  { %5226 = vmatmul.mubr.msk.bf16.vlgmr.msra.gmra.mxu0 %vm122_vm1, %v113_v22 }
  0x25   :  { %5237 = vmatprep.mubr.msk.bf16.mxu0 %vm5442_vm0, %v5441_v0 }
  0xdb   :  { %v214_v28 = vpop.f32.mrf.mxu1 }
  0xdc   :  { %v215_v29 = vadd.f32 %v4387_v27, %v214_v28  ;;  %v160_v30 = vpop.f32.mrf.mxu0 }
  0xdd   :  { %v5219_v32 = vpop.f32.mrf.mxu1  ;;  %v161_v37 = vadd.f32 %v4385_v31, %v160_v30 }
  0xde   :  { %v5645_v33 = vpack.c.bf16 %v215_v29, %v215_v29  ;;  %v5211_v34 = vpop.f32.mrf.mxu0 }
  0xdf   :  { %v217_v35 = vpop.f32.mrf.mxu1  ;;  %v5650_v43 = vpack.c.bf16 %v161_v37, %v161_v37 }
  0xe0   :  { %v286_v36 = vsel %vm281_vm2, %v5645_v33, 0  ;;  %v218_v38 = vadd.f32 %v4387_v27, %v217_v35  ;;  %v163_v39 = vpop.f32.mrf.mxu0 }
  0xe1   :  { %v5220_v40 = vpop.f32.mrf.mxu1  ;;  %5230 = vmatpush3.bf16.xpose.msra.mxu1 %v286_v36  ;;  %v164_v45 = vadd.f32 %v4385_v31, %v163_v39 }
  0xe2   :  { %v278_v41 = vpack.c.bf16 %v218_v38, %v218_v38  ;;  %v5212_v42 = vpop.f32.mrf.mxu0  ;;  %5241 = vmatprep.subr.bf16.mxu1 %v5441_v0 }
  0xe3   :  { %v5659_v46 = vpack.c.bf16 %v164_v45, %v164_v45 }
  0xe4   :  { %v332_v44 = vsel %vm281_vm2, %v278_v41, 0  ;;  %562 = vrot.lane.b32.xlu1 %v278_v41, %s8243_s30  ;;  %v268_v48 = vpop.f32.mrf.mxu0 }
  0xe5   :  { %5236 = vmatpush3.bf16.xpose.msra.mxu0 %v332_v44  ;;  %v269_v49 = vadd.f32 %v4389_v47, %v268_v48 }
  0xe6   :  { %5247 = vmatprep.subr.bf16.mxu0 %v5441_v0  ;;  %v5227_v50 = vpop.f32.mrf.mxu0 }
  0xe7   :  { %v5668_v51 = vpack.c.bf16 %v269_v49, %v269_v49 }
  0xe8   :  { %5232 = vmatmul.mubr.msk.bf16.vlgmr.msra.gmra.mxu1 %vm281_vm2, %v5650_v43  ;;  %v271_v52 = vpop.f32.mrf.mxu0 }
  0xe9   :  { %5243 = vmatprep.mubr.msk.bf16.mxu1 %vm5442_vm0, %v5441_v0  ;;  %v418_v53 = vsel %vm416_vm3, %v5668_v51, 0  ;;  %v272_v54 = vadd.f32 %v4389_v47, %v271_v52 }
  0xea   :  { %v5228_v55 = vpop.f32.mrf.mxu0  ;;  %5242 = vmatpush3.bf16.msra.mxu1 %v418_v53 }
  0xeb   :  { %v5672_v56 = vpack.c.bf16 %v272_v54, %v272_v54  ;;  %5253 = vmatprep.subr.bf16.mxu1 %v5441_v0 }
  0xec   :  { %5238 = vmatmul.mubr.msk.bf16.vlgmr.msra.gmra.mxu0 %vm281_vm2, %v5659_v46 }
  0xed   :  { %5249 = vmatprep.mubr.msk.bf16.mxu0 %vm5442_vm0, %v5441_v0  ;;  %v464_v57 = vsel %vm416_vm3, %v5672_v56, 0 }
  0xee   :  { %5248 = vmatpush3.bf16.msra.mxu0 %v464_v57 }
  0xef   :  { %5259 = vmatprep.subr.bf16.mxu0 %v5441_v0 }
 0x1a8   :  { %v322_v9 = vpop.f32.mrf.mxu1 }
 0x1a9   :  { %v374_v10 = vmul.f32 0.25, %v322_v9 }
 0x1aa   :  { %v5233_v11 = vpop.f32.mrf.mxu1 }
 0x1ab   :  { %v386_v12 = vadd.f32 %v5689_v7, %v374_v10 }
 0x1ac   :  { %v325_v14 = vpop.f32.mrf.mxu1  ;;  %v368_v15 = vpop.f32.mrf.mxu0 }
 0x1ad   :  { %v375_v16 = vmul.f32 0.25, %v368_v15  ;;  %v389_v17 = vsel %vm388_vm5, %v386_v12, -inf }
 0x1ae   :  { %390 = vmax.xlane.f32.xlu0 %v389_v17  ;;  %v5234_v19 = vpop.f32.mrf.mxu1  ;;  %v5239_v20 = vpop.f32.mrf.mxu0 }
 0x1af   :  { %v387_v22 = vadd.f32 %v5693_v13, %v375_v16 }
 0x1b0   :  { %v371_v23 = vpop.f32.mrf.mxu0 }
 0x1b1   :  { %v392_v24 = vsel %vm388_vm5, %v387_v22, -inf }
 0x1b2   :  { %393 = vmax.xlane.f32.xlu0 %v392_v24  ;;  %v5240_v25 = vpop.f32.mrf.mxu0 }
 0x1c8   :  { %510 = vrot.lane.b32.xlu0 %v5645_v33, %s8243_s30  ;;  %v563_v33 = vpop.permute.xlu1 %562 }
 0x237   :  { %v391_v26 = vpop.xlane.xlu0 %390 }
 0x238   :  { %v395_v27 = vsub.f32 %v386_v12, %v391_v26 }
 0x23a   :  { %v397_v28 = vmul.f32 1.442695, %v395_v27 }
 0x23b   :  { %v394_v29 = vpop.xlane.xlu0 %393 }
 0x23c   :  { %5389 = vpow2.f32 %v397_v28  ;;  %v396_v30 = vsub.f32 %v387_v22, %v394_v29 }
 0x23e   :  { %v399_v31 = vmul.f32 1.442695, %v396_v30 }
 0x23f   :  { %v511_v41 = vpop.permute.xlu0 %510 }
 0x240   :  { %5391 = vpow2.f32 %v399_v31  ;;  %v516_v45 = vsel %vm281_vm2, %v511_v41, 0  ;;  %v747_v41 = vld [vmem:[%s8220_s9 + $0x8] sm:$0xff] }
 0x249   :  { %v5390_v32 = vpop.eup %5389 }
 0x24a   :  { %v401_v34 = vsel %vm388_vm5, %v5390_v32, 0.0 }
 0x24b   :  { %402 = vadd.xlane.f32.xlu1 %v401_v34 }
 0x24d   :  { %v5392_v35 = vpop.eup %5391 }
 0x24e   :  { %v404_v36 = vsel %vm388_vm5, %v5392_v35, 0.0 }
 0x24f   :  { %405 = vadd.xlane.f32.xlu1 %v404_v36 }
 0x260   :  { %507 = vrot.lane.b32.xlu1 %v5650_v43, %s8243_s30 }
 0x264   :  { %559 = vrot.lane.b32.xlu1 %v5659_v46, %s8243_s30  ;;  %v568_v46 = vsel %vm281_vm2, %v563_v33, 0 }
 0x2d4   :  { %v403_v37 = vpop.xlane.xlu1 %402 }
 0x2d5   :  { %5393 = vrcp.f32 %v403_v37  ;;  %v748_v37 = vld [vmem:[%s8220_s9 + $0x10] sm:$0xff] }
 0x2d8   :  { %v406_v38 = vpop.xlane.xlu1 %405 }
 0x2d9   :  { %5395 = vrcp.f32 %v406_v38  ;;  %v749_v38 = vld [vmem:[%s8220_s9 + $0x18] sm:$0xff] }
 0x2dc   :  { %v508_v48 = vpop.permute.xlu1 %507 }
 0x2e0   :  { %v560_v49 = vpop.permute.xlu1 %559 }
 0x2e2   :  { %v5394_v39 = vpop.eup %5393 }
 0x2e3   :  { %v409_v40 = vmul.f32 %v5394_v39, %v5390_v32  ;;  %v753_v39 = vpack.c.bf16 %v749_v38, %v748_v37  ;;  %v851_v37 = vld [vmem:[%s8222_s13] sm:$0xff] }
 0x2e4   :  { %v867_v38 = vld [vmem:[%s8222_s13 + $0x80] sm:$0xff] }
 0x2e5   :  { %v411_v42 = vpack.c.bf16 %v409_v40, %v409_v40  ;;  %v746_v40 = vld [vmem:[%s8220_s9] sm:$0xff] }
 0x2e6   :  { %v5396_v44 = vpop.eup %5395 }
 0x2e7   :  { %5244 = vmatmul.mubr.msk.bf16.vlgmr.msra.gmra.mxu1 %vm388_vm5, %v411_v42  ;;  %v410_v47 = vmul.f32 %v5396_v44, %v5392_v35  ;;  %v752_v42 = vpack.c.bf16 %v747_v41, %v746_v40  ;;  %v918_v40 = vpack.c.bf16 %v867_v38, %v851_v37  ;;  %v853_v41 = vld [vmem:[%s8222_s13 + $0x10] sm:$0xff]  ;;  %v860_v37 = vld [vmem:[%s8222_s13 + $0x48] sm:$0xff] }
 0x2e8   :  { %5254 = vmatpush3.bf16.xpose.msra.mxu1 %v516_v45  ;;  %5255 = vmatprep.mubr.msk.bf16.mxu1 %vm5442_vm0, %v5441_v0  ;;  %v876_v38 = vld [vmem:[%s8222_s13 + $0xc8] sm:$0xff] }
 0x2e9   :  { %v412_v43 = vpack.c.bf16 %v410_v47, %v410_v47  ;;  %5265 = vmatprep.subr.bf16.mxu1 %v5441_v0 }
 0x2eb   :  { %5250 = vmatmul.mubr.msk.bf16.vlgmr.msra.gmra.mxu0 %vm388_vm5, %v412_v43 }
 0x2ec   :  { %5260 = vmatpush3.bf16.xpose.msra.mxu0 %v568_v46  ;;  %5261 = vmatprep.mubr.msk.bf16.mxu0 %vm5442_vm0, %v5441_v0 }
 0x2ed   :  { %5271 = vmatprep.subr.bf16.mxu0 %v5441_v0 }
 0x2ef   :  { %5256 = vmatmul.mubr.msk.bf16.vlgmr.msra.gmra.mxu1 %vm281_vm2, %v508_v48 }
 0x2f0   :  { %5267 = vmatprep.mubr.msk.bf16.mxu1 %vm5442_vm0, %v5441_v0 }
 0x2f3   :  { %5262 = vmatmul.mubr.msk.bf16.vlgmr.msra.gmra.mxu0 %vm281_vm2, %v560_v49 }
 0x2f4   :  { %5273 = vmatprep.mubr.msk.bf16.mxu0 %vm5442_vm0, %v5441_v0 }
 0x3a7   :  { %v5722_v50 = vpop.f32.mrf.mxu1 }
 0x3a9   :  { %v5245_v52 = vpop.f32.mrf.mxu1 }
 0x3ab   :  { %v457_v53 = vpop.f32.mrf.mxu1  ;;  %v5724_v54 = vpop.f32.mrf.mxu0 }
 0x3ad   :  { %v5246_v55 = vpop.f32.mrf.mxu1  ;;  %v5251_v57 = vpop.f32.mrf.mxu0 }
 0x3af   :  { %v503_v58 = vpop.f32.mrf.mxu0  ;;  %v552_v59 = vpop.f32.mrf.mxu1 }
 0x3b0   :  { %v610_v60 = vmul.f32 0.25, %v552_v59 }
 0x3b1   :  { %v5252_v61 = vpop.f32.mrf.mxu0  ;;  %v5257_v62 = vpop.f32.mrf.mxu1 }
 0x3b2   :  { %v612_v1 = vadd.f32 %v610_v60, %v5689_v7  ;;  %v4399_v62 = vld [vmem:[%s8221_s10] ss:$0 sm:$0xff] }
 0x3b3   :  { %v555_v2 = vpop.f32.mrf.mxu1  ;;  %v604_v3 = vpop.f32.mrf.mxu0 }
 0x3b4   :  { %v611_v4 = vmul.f32 0.25, %v604_v3  ;;  %v614_v6 = vsel %vm388_vm5, %v612_v1, -inf }
 0x3b5   :  { %615 = vmax.xlane.f32.xlu0 %v614_v6  ;;  %v5258_v8 = vpop.f32.mrf.mxu1  ;;  %v5263_v9 = vpop.f32.mrf.mxu0 }
 0x3b6   :  { %v613_v10 = vadd.f32 %v611_v4, %v5693_v13 }
 0x3b7   :  { %v607_v11 = vpop.f32.mrf.mxu0 }
 0x3b8   :  { %v617_v12 = vsel %vm388_vm5, %v613_v10, -inf }
 0x3b9   :  { %618 = vmax.xlane.f32.xlu1 %v617_v12  ;;  %v5264_v14 = vpop.f32.mrf.mxu0 }
 0x3ca   :  { %688 = vrot.lane.b32.xlu1 %v5672_v56, %s8243_s30 }
 0x43e   :  { %v616_v15 = vpop.xlane.xlu0 %615 }
 0x43f   :  { %v620_v16 = vsub.f32 %v612_v1, %v616_v15 }
 0x441   :  { %v622_v17 = vmul.f32 1.442695, %v620_v16 }
 0x442   :  { %v619_v19 = vpop.xlane.xlu1 %618 }
 0x443   :  { %5397 = vpow2.f32 %v622_v17  ;;  %v621_v20 = vsub.f32 %v613_v10, %v619_v19 }
 0x445   :  { %v624_v22 = vmul.f32 1.442695, %v621_v20 }
 0x446   :  { %v689_v23 = vpop.permute.xlu1 %688 }
 0x447   :  { %5399 = vpow2.f32 %v624_v22  ;;  %v694_v24 = vsel %vm416_vm3, %v689_v23, 0  ;;  %v884_v22 = vld [vmem:[%s8222_s13 + $0x108] sm:$0xff] }
 0x448   :  { %5272 = vmatpush3.bf16.msra.mxu0 %v694_v24  ;;  %v900_v23 = vld [vmem:[%s8222_s13 + $0x188] sm:$0xff]  ;;  %v886_v24 = vld [vmem:[%s8222_s13 + $0x118] sm:$0xff] }
 0x450   :  { %v5398_v25 = vpop.eup %5397 }
 0x451   :  { %v626_v26 = vsel %vm388_vm5, %v5398_v25, 0.0 }
 0x452   :  { %627 = vadd.xlane.f32.xlu0 %v626_v26  ;;  %v902_v26 = vld [vmem:[%s8222_s13 + $0x198] sm:$0xff] }
 0x454   :  { %v5400_v27 = vpop.eup %5399 }
 0x455   :  { %v629_v28 = vsel %vm388_vm5, %v5400_v27, 0.0 }
 0x456   :  { %630 = vadd.xlane.f32.xlu0 %v629_v28  ;;  %v899_v28 = vld [vmem:[%s8222_s13 + $0x180] sm:$0xff] }
 0x46c   :  { %639 = vrot.lane.b32.xlu0 %v5668_v51, %s8243_s30  ;;  %s8265_s30 = smov 16  }
 0x4db   :  { %v628_v56 = vpop.xlane.xlu0 %627 }
 0x4dc   :  { %5401 = vrcp.f32 %v628_v56  ;;  %v937_v56 = vpack.c.bf16 %v902_v26, %v886_v24  ;;  %v873_v26 = vld [vmem:[%s8222_s13 + $0xb0] sm:$0xff] }
 0x4df   :  { %v631_v29 = vpop.xlane.xlu0 %630 }
 0x4e0   :  { %5403 = vrcp.f32 %v631_v29 }
 0x4e3   :  { %v640_v30 = vpop.permute.xlu0 %639 }
 0x4e4   :  { %v645_v31 = vsel %vm416_vm3, %v640_v30, 0  ;;  %v885_v30 = vld [vmem:[%s8222_s13 + $0x110] sm:$0xff] }
 0x4e5   :  { %5266 = vmatpush3.bf16.msra.mxu1 %v645_v31  ;;  %v901_v31 = vld [vmem:[%s8222_s13 + $0x190] sm:$0xff] }
 0x4e6   :  { %5277 = vmatprep.subr.bf16.mxu1 %v5441_v0 }
 0x4e9   :  { %v5402_v32 = vpop.eup %5401 }
 0x4ea   :  { %v634_v34 = vmul.f32 %v5402_v32, %v5398_v25  ;;  %v935_v25 = vpack.c.bf16 %v900_v23, %v884_v22  ;;  %v936_v32 = vpack.c.bf16 %v901_v31, %v885_v30 }
 0x4ec   :  { %v636_v35 = vpack.c.bf16 %v634_v34, %v634_v34  ;;  %1047 = vmatprep.subr.bf16.mxu0 %v935_v25  ;;  %v852_v34 = vld [vmem:[%s8222_s13 + $0x8] sm:$0xff]  ;;  %v857_v25 = vld [vmem:[%s8222_s13 + $0x30] sm:$0xff] }
 0x4ed   :  { %v5404_v36 = vpop.eup %5403  ;;  %v924_v31 = vpack.c.bf16 %v873_v26, %v857_v25  ;;  %v1425_v26 = vld [vmem:[%s8225_s15 + $0x70] sm:$0xff] }
 0x4ee   :  { %5268 = vmatmul.mubr.msk.bf16.vlgmr.msra.gmra.mxu1 %vm388_vm5, %v636_v35  ;;  %v635_v33 = vmul.f32 %v5404_v36, %v5400_v27  ;;  %v883_v27 = vld [vmem:[%s8222_s13 + $0x100] sm:$0xff]  ;;  %v868_v35 = vld [vmem:[%s8222_s13 + $0x88] sm:$0xff]  ;;  %v854_v36 = vld [vmem:[%s8222_s13 + $0x18] sm:$0xff] }
 0x4ef   :  { %5281 = vmatprep.mubr.msk.bf16.mxu1 %vm5442_vm0, %v5441_v0  ;;  %5278 = vmatpush3.bf16.msra.mxu1 %v753_v39  ;;  %v934_v29 = vpack.c.bf16 %v899_v28, %v883_v27  ;;  %v892_v27 = vld [vmem:[%s8222_s13 + $0x148] sm:$0xff] }
 0x4f0   :  { %v637_v51 = vpack.c.bf16 %v635_v33, %v635_v33  ;;  %5279 = vmatprep.subr.bf16.mxu1 %v5441_v0  ;;  %v919_v33 = vpack.c.bf16 %v868_v35, %v852_v34  ;;  %v908_v28 = vld [vmem:[%s8222_s13 + $0x1c8] sm:$0xff]  ;;  %v907_v34 = vld [vmem:[%s8222_s13 + $0x1c0] sm:$0xff] }
 0x4f1   :  { %v943_v35 = vpack.c.bf16 %v908_v28, %v892_v27  ;;  %v1426_v27 = vld [vmem:[%s8225_s15 + $0x78] sm:$0xff] }
 0x4f2   :  { %5274 = vmatmul.mubr.msk.bf16.vlgmr.msra.gmra.mxu0 %vm388_vm5, %v637_v51  ;;  %v870_v51 = vld [vmem:[%s8222_s13 + $0x98] sm:$0xff] }
 0x4f3   :  { %5280 = vmatpush3.bf16.msra.mxu1 %v752_v42  ;;  %1048 = vmatpush1.bf16.msra.mxu0 %v934_v29  ;;  %v921_v39 = vpack.c.bf16 %v870_v51, %v854_v36  ;;  %v869_v42 = vld [vmem:[%s8222_s13 + $0x90] sm:$0xff]  ;;  %v910_v29 = vld [vmem:[%s8222_s13 + $0x1d8] sm:$0xff] }
 0x4f4   :  { %1090 = vmatprep.subr.bf16.mxu1 %v937_v56  ;;  %1049 = vmatprep.subr.bf16.mxu0 %v919_v33  ;;  %v894_v56 = vld [vmem:[%s8222_s13 + $0x158] sm:$0xff]  ;;  %v893_v33 = vld [vmem:[%s8222_s13 + $0x150] sm:$0xff] }
 0x4f5   :  { %v945_v36 = vpack.c.bf16 %v910_v29, %v894_v56  ;;  %v909_v51 = vld [vmem:[%s8222_s13 + $0x1d0] sm:$0xff] }
 0x4f6   :  { %v1457_v29 = vld [vmem:[%s8225_s15 + $0x170] sm:$0xff] }
 0x4f7   :  { %1050 = vmatpush1.bf16.msra.mxu0 %v918_v40  ;;  %v878_v40 = vld [vmem:[%s8222_s13 + $0xd8] sm:$0xff] }
 0x5ae   :  { %v681_v44 = vpop.f32.mrf.mxu1 }
 0x5b0   :  { %v5269_v45 = vpop.f32.mrf.mxu1 }
 0x5b1   :  { %v888_v45 = vld [vmem:[%s8222_s13 + $0x128] sm:$0xff] }
 0x5b2   :  { %v684_v47 = vpop.f32.mrf.mxu1  ;;  %v730_v43 = vpop.f32.mrf.mxu0 }
 0x5b3   :  { %v5379_v46 = vpack.i.bf16 %v730_v43, %v681_v44  ;;  %v920_v44 = vpack.c.bf16 %v869_v42, %v853_v41  ;;  %v904_v47 = vld [vmem:[%s8222_s13 + $0x1a8] sm:$0xff]  ;;  %v890_v43 = vld [vmem:[%s8222_s13 + $0x138] sm:$0xff]  ;;  %v944_v42 = vpack.c.bf16 %v909_v51, %v893_v33  ;;  %v1423_v51 = vld [vmem:[%s8225_s15 + $0x60] sm:$0xff] }
 0x5b4   :  { %v5270_v48 = vpop.f32.mrf.mxu1  ;;  %v5275_v49 = vpop.f32.mrf.mxu0 }
 0x5b5   :  { %5380 = vrot.lane.b32.xlu1 %v5379_v46, %s8242_s4  ;;  %v5446_v46 = vmov 0   ;;  %v939_v48 = vpack.c.bf16 %v904_v47, %v888_v45  ;;  %v906_v49 = vld [vmem:[%s8222_s13 + $0x1b8] sm:$0xff]  ;;  %v875_v45 = vld [vmem:[%s8222_s13 + $0xc0] sm:$0xff]  ;;  %v927_v47 = vpack.c.bf16 %v876_v38, %v860_v37  ;;  %v1424_v37 = vld [vmem:[%s8225_s15 + $0x68] sm:$0xff] }
 0x5b6   :  { %v733_v52 = vpop.f32.mrf.mxu0  ;;  %1067 = vmatprep.mubr.bf16.mxu0 %v5446_v46 }
 0x5b7   :  { %v941_v52 = vpack.c.bf16 %v906_v49, %v890_v43  ;;  %1133 = vmatprep.subr.bf16.mxu0 %v939_v48  ;;  %v861_v48 = vld [vmem:[%s8222_s13 + $0x50] sm:$0xff] }
 0x5b8   :  { %v5276_v53 = vpop.f32.mrf.mxu0  ;;  %v877_v49 = vld [vmem:[%s8222_s13 + $0xd0] sm:$0xff] }
 0x627   :  { %v5381_v55 = vpop.permute.xlu1 %5380 }
 0x628   :  { %v5383_v57 = vunpack.i.h.bf16 %v5381_v55  ;;  %v5382_v58 = vunpack.i.l.bf16 %v5381_v55 }
 0x62a   :  { %v745_v59 = vsel %vm281_vm2, %v5724_v54, %v5383_v57  ;;  %v744_v60 = vsel %vm281_vm2, %v5722_v50, %v5382_v58 }
 0x62b   :  { %v751_v61 = vpack.c.bf16 %v745_v59, %v744_v60 }
 0x62d   :  { %5282 = vmatmul.mubr.msk.bf16.vlgmr.msra.gmra.mxu1 %vm122_vm1, %v751_v61 }
 0x62e   :  { %1091 = vmatpush1.bf16.msra.mxu1 %v936_v32  ;;  %1110 = vmatprep.mubr.bf16.mxu1 %v5446_v46  ;;  %v891_v32 = vld [vmem:[%s8222_s13 + $0x140] sm:$0xff] }
 0x62f   :  { %1092 = vmatprep.subr.bf16.mxu1 %v921_v39  ;;  %v862_v39 = vld [vmem:[%s8222_s13 + $0x58] sm:$0xff]  ;;  %v942_v41 = vpack.c.bf16 %v907_v34, %v891_v32  ;;  %v1440_v32 = vld [vmem:[%s8225_s15 + $0xe8] sm:$0xff]  ;;  %v1471_v34 = vld [vmem:[%s8225_s15 + $0x1e0] sm:$0xff] }
 0x630   :  { %v929_v43 = vpack.c.bf16 %v878_v40, %v862_v39  ;;  %v1455_v40 = vld [vmem:[%s8225_s15 + $0x160] sm:$0xff] }
 0x632   :  { %1093 = vmatpush1.bf16.msra.mxu1 %v920_v44  ;;  %v859_v44 = vld [vmem:[%s8222_s13 + $0x40] sm:$0xff] }
 0x633   :  { %1176 = vmatprep.subr.bf16.mxu1 %v941_v52  ;;  %v896_v52 = vld [vmem:[%s8222_s13 + $0x168] sm:$0xff] }
 0x6ed   :  { %v797_v1 = vpop.f32.mrf.mxu1 }
 0x6ee   :  { %v798_v2 = vadd.f32 %v4399_v62, %v797_v1  ;;  %v4401_v1 = vld [vmem:[%s8223_s11] ss:$0 sm:$0xff] }
 0x6ef   :  { %v5283_v3 = vpop.f32.mrf.mxu1 }
 0x6f0   :  { %v804_v4 = vadd.f32 %v798_v2, %v5608_v18 }
 0x6f1   :  { %v800_v6 = vpop.f32.mrf.mxu1 }
 0x6f2   :  { %v801_v8 = vadd.f32 %v4399_v62, %v800_v6  ;;  %v808_v9 = vsel %vm122_vm1, %v804_v4, 0.0  ;;  %v4402_v6 = vld [vmem:[%s8224_s12] ss:$0 sm:$0xff] }
 0x6f3   :  { %809 = vadd.xlane.f32.xlu1 %v808_v9  ;;  %v5284_v54 = vpop.f32.mrf.mxu1  ;;  %v903_v9 = vld [vmem:[%s8222_s13 + $0x1a0] sm:$0xff] }
 0x6f4   :  { %v805_v50 = vadd.f32 %v801_v8, %v5616_v21  ;;  %v887_v8 = vld [vmem:[%s8222_s13 + $0x120] sm:$0xff] }
 0x6f6   :  { %v811_v10 = vsel %vm122_vm1, %v805_v50, 0.0 }
 0x6f7   :  { %812 = vadd.xlane.f32.xlu0 %v811_v10  ;;  %v905_v10 = vld [vmem:[%s8222_s13 + $0x1b0] sm:$0xff] }
 0x77c   :  { %v810_v11 = vpop.xlane.xlu1 %809 }
 0x77d   :  { %v815_v12 = vmul.f32 0.03125, %v810_v11  ;;  %v856_v11 = vld [vmem:[%s8222_s13 + $0x28] sm:$0xff] }
 0x77f   :  { %v5769_v14 = vsub.f32 %v804_v4, %v815_v12  ;;  %v872_v12 = vld [vmem:[%s8222_s13 + $0xa8] sm:$0xff] }
 0x780   :  { %v813_v15 = vpop.xlane.xlu0 %812  ;;  %v923_v23 = vpack.c.bf16 %v872_v12, %v856_v11  ;;  %v879_v11 = vld [vmem:[%s8222_s13 + $0xe0] sm:$0xff] }
 0x781   :  { %v816_v16 = vmul.f32 0.03125, %v813_v15  ;;  %v819_v18 = vmul.f32 %v5769_v14, %v5769_v14  ;;  %v874_v15 = vld [vmem:[%s8222_s13 + $0xb8] sm:$0xff] }
 0x783   :  { %v5773_v17 = vsub.f32 %v805_v50, %v816_v16  ;;  %v821_v19 = vsel %vm122_vm1, %v819_v18, 0.0  ;;  %v889_v50 = vld [vmem:[%s8222_s13 + $0x130] sm:$0xff] }
 0x784   :  { %822 = vadd.xlane.f32.xlu0 %v821_v19  ;;  %v940_v19 = vpack.c.bf16 %v905_v10, %v889_v50  ;;  %v863_v10 = vld [vmem:[%s8222_s13 + $0x60] sm:$0xff] }
 0x785   :  { %v820_v21 = vmul.f32 %v5773_v17, %v5773_v17 }
 0x787   :  { %v824_v20 = vsel %vm122_vm1, %v820_v21, 0.0  ;;  %v855_v21 = vld [vmem:[%s8222_s13 + $0x20] sm:$0xff] }
 0x788   :  { %825 = vadd.xlane.f32.xlu0 %v824_v20  ;;  %v871_v20 = vld [vmem:[%s8222_s13 + $0xa0] sm:$0xff] }
 0x789   :  { %v922_v30 = vpack.c.bf16 %v871_v20, %v855_v21  ;;  %v1442_v21 = vld [vmem:[%s8225_s15 + $0xf8] sm:$0xff]  ;;  %v1473_v20 = vld [vmem:[%s8225_s15 + $0x1f0] sm:$0xff] }
 0x80d   :  { %v823_v53 = vpop.xlane.xlu0 %822 }
 0x80e   :  { %v827_v55 = vmul.f32 0.03125, %v823_v53  ;;  %v912_v53 = vld [vmem:[%s8222_s13 + $0x1e8] sm:$0xff] }
 0x810   :  { %v829_v57 = vadd.f32 1e-05, %v827_v55  ;;  %v898_v55 = vld [vmem:[%s8222_s13 + $0x178] sm:$0xff] }
 0x811   :  { %v826_v58 = vpop.xlane.xlu0 %825 }
 0x812   :  { %5405 = vrsqrt.f32 %v829_v57  ;;  %v828_v59 = vmul.f32 0.03125, %v826_v58  ;;  %v914_v57 = vld [vmem:[%s8222_s13 + $0x1f8] sm:$0xff]  ;;  %v926_v58 = vpack.c.bf16 %v875_v45, %v859_v44  ;;  %v1469_v45 = vld [vmem:[%s8225_s15 + $0x1d0] sm:$0xff] }
 0x813   :  { %v1438_v44 = vld [vmem:[%s8225_s15 + $0xd8] sm:$0xff] }
 0x814   :  { %v830_v60 = vadd.f32 1e-05, %v828_v59  ;;  %v928_v59 = vpack.c.bf16 %v877_v49, %v861_v48  ;;  %v1421_v49 = vld [vmem:[%s8225_s15 + $0x50] sm:$0xff] }
 0x816   :  { %5407 = vrsqrt.f32 %v830_v60  ;;  %v895_v60 = vld [vmem:[%s8222_s13 + $0x160] sm:$0xff] }
 0x81f   :  { %v5406_v61 = vpop.eup %5405 }
 0x820   :  { %v833_v62 = vmul.f32 %v5406_v61, %v5769_v14  ;;  %v858_v14 = vld [vmem:[%s8222_s13 + $0x38] sm:$0xff]  ;;  %v911_v61 = vld [vmem:[%s8222_s13 + $0x1e0] sm:$0xff] }
 0x821   :  { %v925_v24 = vpack.c.bf16 %v874_v15, %v858_v14  ;;  %v865_v15 = vld [vmem:[%s8222_s13 + $0x70] sm:$0xff] }
 0x822   :  { %v841_v3 = vmul.f32 %v4401_v1, %v833_v62  ;;  %v947_v62 = vpack.c.bf16 %v912_v53, %v896_v52  ;;  %v1422_v52 = vld [vmem:[%s8225_s15 + $0x58] sm:$0xff] }
 0x823   :  { %v5408_v2 = vpop.eup %5407 }
 0x824   :  { %v834_v4 = vmul.f32 %v5408_v2, %v5773_v17  ;;  %v5873_v16 = vadd.f32 %v4402_v6, %v841_v3  ;;  %v938_v17 = vpack.c.bf16 %v903_v9, %v887_v8  ;;  %v897_v2 = vld [vmem:[%s8222_s13 + $0x170] sm:$0xff]  ;;  %v866_v8 = vld [vmem:[%s8222_s13 + $0x78] sm:$0xff] }
 0x825   :  { %v913_v3 = vld [vmem:[%s8222_s13 + $0x1f0] sm:$0xff]  ;;  %v882_v9 = vld [vmem:[%s8222_s13 + $0xf8] sm:$0xff] }
 0x826   :  { %v842_v54 = vmul.f32 %v4401_v1, %v834_v4  ;;  %v949_v1 = vpack.c.bf16 %v914_v57, %v898_v55  ;;  %v864_v4 = vld [vmem:[%s8222_s13 + $0x68] sm:$0xff]  ;;  %v948_v50 = vpack.c.bf16 %v913_v3, %v897_v2  ;;  %v933_v14 = vpack.c.bf16 %v882_v9, %v866_v8  ;;  %v1454_v57 = vld [vmem:[%s8225_s15 + $0x158] sm:$0xff]  ;;  %v1419_v2 = vld [vmem:[%s8225_s15 + $0x40] sm:$0xff] }
 0x827   :  { %v1420_v3 = vld [vmem:[%s8225_s15 + $0x48] sm:$0xff]  ;;  %v1451_v8 = vld [vmem:[%s8225_s15 + $0x140] sm:$0xff] }
 0x828   :  { %v5875_v18 = vadd.f32 %v4402_v6, %v842_v54  ;;  %v880_v6 = vld [vmem:[%s8222_s13 + $0xe8] sm:$0xff]  ;;  %v946_v54 = vpack.c.bf16 %v911_v61, %v895_v60  ;;  %v1467_v60 = vld [vmem:[%s8225_s15 + $0x1c0] sm:$0xff] }
 0x829   :  { %v931_v12 = vpack.c.bf16 %v880_v6, %v864_v4  ;;  %v1468_v61 = vld [vmem:[%s8225_s15 + $0x1c8] sm:$0xff] }
 0x82a   :  { %v5885_v22 = vpack.c.bf16 %v5875_v18, %v5873_v16  ;;  %v1712_v6 = vpack.c.bf16 %v1468_v61, %v1467_v60  ;;  %v1452_v9 = vld [vmem:[%s8225_s15 + $0x148] sm:$0xff]  ;;  %v1443_v61 = vld [vmem:[%s8225_s15 + $0x100] sm:$0xff] }
 0x82c   :  { %4403 = vmatmul.mubr.msk.bf16.vlgmr.msra.gmra.mxu0 %vm122_vm1, %v5885_v22  ;;  %4404 = vmatmul.mubr.msk.bf16.vlgmr.msra.gmra.mxu1 %vm122_vm1, %v5885_v22 }
 0x82d   :  { %1134 = vmatpush1.bf16.msra.mxu0 %v938_v17  ;;  %1177 = vmatpush1.bf16.msra.mxu1 %v940_v19  ;;  %v881_v17 = vld [vmem:[%s8222_s13 + $0xf0] sm:$0xff] }
 0x82e   :  { %1135 = vmatprep.subr.bf16.mxu0 %v923_v23  ;;  %1178 = vmatprep.subr.bf16.mxu1 %v925_v24  ;;  %v1441_v19 = vld [vmem:[%s8225_s15 + $0xf0] sm:$0xff]  ;;  %v1474_v23 = vld [vmem:[%s8225_s15 + $0x1f8] sm:$0xff]  ;;  %v930_v24 = vpack.c.bf16 %v879_v11, %v863_v10  ;;  %v932_v25 = vpack.c.bf16 %v881_v17, %v865_v15 }
 0x82f   :  { %1153 = vmatprep.mubr.bf16.mxu0 %v5446_v46  ;;  %1196 = vmatprep.mubr.bf16.mxu1 %v5446_v46  ;;  %v1699_v28 = vpack.c.bf16 %v1442_v21, %v1441_v19  ;;  %v1715_v56 = vpack.c.bf16 %v1474_v23, %v1473_v20  ;;  %v1465_v10 = vld [vmem:[%s8225_s15 + $0x1b0] sm:$0xff]  ;;  %v1466_v11 = vld [vmem:[%s8225_s15 + $0x1b8] sm:$0xff] }
 0x830   :  { %v1417_v15 = vld [vmem:[%s8225_s15 + $0x30] sm:$0xff]  ;;  %v1711_v19 = vpack.c.bf16 %v1466_v11, %v1465_v10  ;;  %v1418_v21 = vld [vmem:[%s8225_s15 + $0x38] sm:$0xff]  ;;  %v6222_v10 = vsub.s32 2, %v5681_v63  ;;  %v6227_v11 = vld [vmem:[%s8226_s14] sm:$0xff] }
 0x831   :  { %1136 = vmatpush1.bf16.msra.mxu0 %v922_v30  ;;  %1179 = vmatpush1.bf16.msra.mxu1 %v924_v31  ;;  %v1458_v30 = vld [vmem:[%s8225_s15 + $0x178] sm:$0xff]  ;;  %v1439_v31 = vld [vmem:[%s8225_s15 + $0xe0] sm:$0xff]  ;;  %v1449_v20 = vld [vmem:[%s8225_s15 + $0x130] sm:$0xff] }
 0x832   :  { %1219 = vmatprep.subr.bf16.mxu0 %v943_v35  ;;  %1262 = vmatprep.subr.bf16.mxu1 %v945_v36  ;;  %v1472_v35 = vld [vmem:[%s8225_s15 + $0x1e8] sm:$0xff]  ;;  %v1691_v36 = vpack.c.bf16 %v1426_v27, %v1425_v26  ;;  %v1707_v33 = vpack.c.bf16 %v1458_v30, %v1457_v29  ;;  %v1698_v38 = vpack.c.bf16 %v1440_v32, %v1439_v31  ;;  %v1450_v23 = vld [vmem:[%s8225_s15 + $0x138] sm:$0xff]  ;;  %v1431_v26 = vld [vmem:[%s8225_s15 + $0xa0] sm:$0xff] }
 0x833   :  { %v1714_v39 = vpack.c.bf16 %v1472_v35, %v1471_v34  ;;  %v1432_v27 = vld [vmem:[%s8225_s15 + $0xa8] sm:$0xff]  ;;  %v1415_v30 = vld [vmem:[%s8225_s15 + $0x20] sm:$0xff] }
 0x834   :  { %4405 = vmatmul.mubr.msk.bf16.vlgmr.msra.gmra.mxu0 %vm122_vm1, %v5885_v22  ;;  %4406 = vmatmul.mubr.msk.bf16.vlgmr.msra.gmra.mxu1 %vm122_vm1, %v5885_v22  ;;  %v1464_v29 = vld [vmem:[%s8225_s15 + $0x1a8] sm:$0xff]  ;;  %v1447_v35 = vld [vmem:[%s8225_s15 + $0x120] sm:$0xff] }
 0x835   :  { %1220 = vmatpush1.bf16.msra.mxu0 %v942_v41  ;;  %1263 = vmatpush1.bf16.msra.mxu1 %v944_v42  ;;  %v1456_v41 = vld [vmem:[%s8225_s15 + $0x168] sm:$0xff]  ;;  %v1437_v42 = vld [vmem:[%s8225_s15 + $0xd0] sm:$0xff] }
 0x836   :  { %1221 = vmatprep.subr.bf16.mxu0 %v927_v47  ;;  %1264 = vmatprep.subr.bf16.mxu1 %v929_v43  ;;  %v1470_v47 = vld [vmem:[%s8225_s15 + $0x1d8] sm:$0xff]  ;;  %v1690_v43 = vpack.c.bf16 %v1424_v37, %v1423_v51  ;;  %v1706_v48 = vpack.c.bf16 %v1456_v41, %v1455_v40  ;;  %v1697_v53 = vpack.c.bf16 %v1438_v44, %v1437_v42  ;;  %v1416_v31 = vld [vmem:[%s8225_s15 + $0x28] sm:$0xff]  ;;  %v1429_v51 = vld [vmem:[%s8225_s15 + $0x90] sm:$0xff] }
 0x837   :  { %1239 = vmatprep.mubr.bf16.mxu0 %v5446_v46  ;;  %1282 = vmatprep.mubr.bf16.mxu1 %v5446_v46  ;;  %v1713_v55 = vpack.c.bf16 %v1470_v47, %v1469_v45  ;;  %v1686_v34 = vpack.c.bf16 %v1416_v31, %v1415_v30  ;;  %v1430_v37 = vld [vmem:[%s8225_s15 + $0x98] sm:$0xff]  ;;  %v1413_v41 = vld [vmem:[%s8225_s15 + $0x10] sm:$0xff] }
 0x838   :  { %v1462_v40 = vld [vmem:[%s8225_s15 + $0x198] sm:$0xff]  ;;  %v1445_v47 = vld [vmem:[%s8225_s15 + $0x110] sm:$0xff] }
 0x839   :  { %1222 = vmatpush1.bf16.msra.mxu0 %v926_v58  ;;  %1265 = vmatpush1.bf16.msra.mxu1 %v928_v59  ;;  %v1435_v58 = vld [vmem:[%s8225_s15 + $0xc0] sm:$0xff]  ;;  %v1436_v59 = vld [vmem:[%s8225_s15 + $0xc8] sm:$0xff]  ;;  %v1414_v42 = vld [vmem:[%s8225_s15 + $0x18] sm:$0xff] }
 0x83a   :  { %1305 = vmatprep.subr.bf16.mxu0 %v947_v62  ;;  %1348 = vmatprep.subr.bf16.mxu1 %v949_v1  ;;  %v1689_v62 = vpack.c.bf16 %v1422_v52, %v1421_v49  ;;  %v1696_v4 = vpack.c.bf16 %v1436_v59, %v1435_v58  ;;  %v1685_v45 = vpack.c.bf16 %v1414_v42, %v1413_v41  ;;  %v1427_v49 = vld [vmem:[%s8225_s15 + $0x80] sm:$0xff]  ;;  %v1428_v52 = vld [vmem:[%s8225_s15 + $0x88] sm:$0xff] }
 0x83b   :  { %v1412_v58 = vld [vmem:[%s8225_s15 + $0x8] sm:$0xff] }
 0x83c   :  { %4407 = vmatmul.mubr.msk.bf16.vlgmr.msra.gmra.mxu0 %vm122_vm1, %v5885_v22  ;;  %4408 = vmatmul.mubr.msk.bf16.vlgmr.msra.gmra.mxu1 %vm122_vm1, %v5885_v22 }
 0x83d   :  { %1306 = vmatpush1.bf16.msra.mxu0 %v946_v54  ;;  %1349 = vmatpush1.bf16.msra.mxu1 %v948_v50  ;;  %v1433_v54 = vld [vmem:[%s8225_s15 + $0xb0] sm:$0xff]  ;;  %v1434_v50 = vld [vmem:[%s8225_s15 + $0xb8] sm:$0xff] }
 0x83e   :  { %1307 = vmatprep.subr.bf16.mxu0 %v931_v12  ;;  %1350 = vmatprep.subr.bf16.mxu1 %v933_v14  ;;  %v1688_v12 = vpack.c.bf16 %v1420_v3, %v1419_v2  ;;  %v1704_v14 = vpack.c.bf16 %v1452_v9, %v1451_v8  ;;  %v1695_v17 = vpack.c.bf16 %v1434_v50, %v1433_v54  ;;  %v1505_v2 = vld [vmem:[%s8225_s15 + $0x2f0] sm:$0xff]  ;;  %v1506_v3 = vld [vmem:[%s8225_s15 + $0x2f8] sm:$0xff]  ;;  %v6216_v54 = vsub.s32 1, %v5681_v63 }
 0x83f   :  { %1325 = vmatprep.mubr.bf16.mxu0 %v5446_v46  ;;  %1368 = vmatprep.mubr.bf16.mxu1 %v5446_v46  ;;  %v1538_v8 = vld [vmem:[%s8225_s15 + $0x3f8] sm:$0xff]  ;;  %v6219_v50 = vsub.s32 3, %v5681_v63 }
 0x841   :  { %1308 = vmatpush1.bf16.msra.mxu0 %v930_v24  ;;  %1351 = vmatpush1.bf16.msra.mxu1 %v932_v25  ;;  %v1687_v24 = vpack.c.bf16 %v1418_v21, %v1417_v15  ;;  %v1703_v25 = vpack.c.bf16 %v1450_v23, %v1449_v20  ;;  %v959_v15 = vrot.slane %v6227_v11, %v6216_v54 }
 0x842   :  { %4822 = vmatprep.subr.bf16.mxu0 %v1699_v28  ;;  %4844 = vmatprep.subr.bf16.mxu1 %v1715_v56  ;;  %v1463_v28 = vld [vmem:[%s8225_s15 + $0x1a0] sm:$0xff]  ;;  %v1694_v56 = vpack.c.bf16 %v1432_v27, %v1431_v26  ;;  %v963_v21 = vrot.slane %v6227_v11, %v6222_v10  ;;  %v6238_v26 = vsub.s32 5, %v5681_v63  ;;  %v6241_v27 = vsub.s32 7, %v5681_v63 }
 0x843   :  { %v1710_v32 = vpack.c.bf16 %v1464_v29, %v1463_v28 }
 0x844   :  { %4409 = vmatmul.mubr.msk.bf16.vlgmr.msra.gmra.mxu0 %vm122_vm1, %v5885_v22  ;;  %4410 = vmatmul.mubr.msk.bf16.vlgmr.msra.gmra.mxu1 %vm122_vm1, %v5885_v22  ;;  %v1453_v22 = vld [vmem:[%s8225_s15 + $0x150] sm:$0xff] }
 0x845   :  { %4823 = vmatpush3.bf16.msra.mxu0 %v1691_v36  ;;  %4845 = vmatpush3.bf16.msra.mxu1 %v1707_v33  ;;  %v1705_v1 = vpack.c.bf16 %v1454_v57, %v1453_v22  ;;  %v1448_v36 = vld [vmem:[%s8225_s15 + $0x128] sm:$0xff]  ;;  %v1411_v57 = vld [vmem:[%s8225_s15] sm:$0xff] }
 0x846   :  { %4824 = vmatprep.subr.bf16.mxu0 %v1698_v38  ;;  %4846 = vmatprep.subr.bf16.mxu1 %v1714_v39  ;;  %v1702_v33 = vpack.c.bf16 %v1448_v36, %v1447_v35  ;;  %v1461_v38 = vld [vmem:[%s8225_s15 + $0x190] sm:$0xff]  ;;  %v1693_v39 = vpack.c.bf16 %v1430_v37, %v1429_v51  ;;  %v1460_v22 = vld [vmem:[%s8225_s15 + $0x188] sm:$0xff]  ;;  %v1684_v60 = vpack.c.bf16 %v1412_v58, %v1411_v57  ;;  %v1490_v37 = vld [vmem:[%s8225_s15 + $0x278] sm:$0xff] }
 0x847   :  { %v1709_v44 = vpack.c.bf16 %v1462_v40, %v1461_v38  ;;  %v1489_v51 = vld [vmem:[%s8225_s15 + $0x270] sm:$0xff]  ;;  %v1536_v57 = vld [vmem:[%s8225_s15 + $0x3e8] sm:$0xff] }
 0x848   :  { %v1521_v38 = vld [vmem:[%s8225_s15 + $0x370] sm:$0xff] }
 0x849   :  { %4825 = vmatpush3.bf16.msra.mxu0 %v1690_v43  ;;  %4847 = vmatpush3.bf16.msra.mxu1 %v1706_v48  ;;  %v1446_v43 = vld [vmem:[%s8225_s15 + $0x118] sm:$0xff] }
 0x84a   :  { %4826 = vmatprep.subr.bf16.mxu0 %v1697_v53  ;;  %4848 = vmatprep.subr.bf16.mxu1 %v1713_v55  ;;  %v1701_v48 = vpack.c.bf16 %v1446_v43, %v1445_v47  ;;  %v1459_v53 = vld [vmem:[%s8225_s15 + $0x180] sm:$0xff]  ;;  %v1692_v55 = vpack.c.bf16 %v1428_v52, %v1427_v49  ;;  %v1522_v47 = vld [vmem:[%s8225_s15 + $0x378] sm:$0xff] }
 0x84b   :  { %v1708_v59 = vpack.c.bf16 %v1460_v22, %v1459_v53  ;;  %v1503_v43 = vld [vmem:[%s8225_s15 + $0x2e0] sm:$0xff] }
 0x84c   :  { %v1535_v22 = vld [vmem:[%s8225_s15 + $0x3e0] sm:$0xff] }
 0x84d   :  { %4827 = vmatpush3.bf16.msra.mxu0 %v1689_v62  ;;  %4849 = vmatpush3.bf16.msra.mxu1 %v1705_v1  ;;  %v1444_v62 = vld [vmem:[%s8225_s15 + $0x108] sm:$0xff] }
 0x84e   :  { %4828 = vmatprep.subr.bf16.mxu0 %v1696_v4  ;;  %4850 = vmatprep.subr.bf16.mxu1 %v1712_v6  ;;  %v1700_v1 = vpack.c.bf16 %v1444_v62, %v1443_v61  ;;  %v1537_v4 = vld [vmem:[%s8225_s15 + $0x3f0] sm:$0xff]  ;;  %v1731_v6 = vpack.c.bf16 %v1506_v3, %v1505_v2  ;;  %v1723_v2 = vpack.c.bf16 %v1490_v37, %v1489_v51  ;;  %v1486_v37 = vld [vmem:[%s8225_s15 + $0x258] sm:$0xff] }
 0x84f   :  { %v1747_v9 = vpack.c.bf16 %v1538_v8, %v1537_v4  ;;  %v1739_v3 = vpack.c.bf16 %v1522_v47, %v1521_v38  ;;  %v1487_v4 = vld [vmem:[%s8225_s15 + $0x260] sm:$0xff]  ;;  %v1517_v38 = vld [vmem:[%s8225_s15 + $0x350] sm:$0xff] }
 0x851   :  { %4829 = vmatpush3.bf16.msra.mxu0 %v1688_v12  ;;  %4851 = vmatpush3.bf16.msra.mxu1 %v1704_v14 }
 0x852   :  { %4830 = vmatprep.subr.bf16.mxu0 %v1695_v17  ;;  %4852 = vmatprep.subr.bf16.mxu1 %v1711_v19  ;;  %v967_v17 = vrot.slane %v6227_v11, %v6219_v50  ;;  %v955_v19 = vrot.slane %v6227_v11, %v5686_v5 }
 0x855   :  { %4831 = vmatpush3.bf16.msra.mxu0 %v1687_v24  ;;  %4853 = vmatpush3.bf16.msra.mxu1 %v1703_v25 }
 0x856   :  { %4832 = vmatprep.subr.bf16.mxu0 %v1694_v56  ;;  %4854 = vmatprep.subr.bf16.mxu1 %v1710_v32 }
 0x859   :  { %4833 = vmatpush3.bf16.msra.mxu0 %v1686_v34  ;;  %4855 = vmatpush3.bf16.msra.mxu1 %v1702_v33 }
 0x85a   :  { %4834 = vmatprep.subr.bf16.mxu0 %v1693_v39  ;;  %4856 = vmatprep.subr.bf16.mxu1 %v1709_v44  ;;  %v975_v44 = vrot.slane %v6227_v11, %v6238_v26 }
 0x85d   :  { %4835 = vmatpush3.bf16.msra.mxu0 %v1685_v45  ;;  %4857 = vmatpush3.bf16.msra.mxu1 %v1701_v48  ;;  %v983_v45 = vrot.slane %v6227_v11, %v6241_v27  ;;  %v1504_v48 = vld [vmem:[%s8225_s15 + $0x2e8] sm:$0xff] }
 0x85e   :  { %4836 = vmatprep.subr.bf16.mxu0 %v1692_v55  ;;  %4858 = vmatprep.subr.bf16.mxu1 %v1708_v59 }
 0x861   :  { %4837 = vmatpush3.bf16.msra.mxu0 %v1684_v60  ;;  %4859 = vmatpush3.bf16.msra.mxu1 %v1700_v1 }
 0x862   :  { %4866 = vmatprep.subr.bf16.mxu0 %v1731_v6  ;;  %4888 = vmatprep.subr.bf16.mxu1 %v1747_v9  ;;  %v1488_v6 = vld [vmem:[%s8225_s15 + $0x268] sm:$0xff] }
 0x8ec   :  { %v1069_v12 = vpop.f32.mrf.mxu0  ;;  %v1112_v14 = vpop.f32.mrf.mxu1 }
 0x8ed   :  { %v1070_v31 = vadd.f32 %v1069_v12, %v955_v19  ;;  %v1113_v32 = vadd.f32 %v1112_v14, %v963_v21 }
 0x8ee   :  { %v1071_v20 = vpop.f32.mrf.mxu0  ;;  %v1114_v23 = vpop.f32.mrf.mxu1 }
 0x8ef   :  { %v1072_v28 = vadd.f32 %v1071_v20, %v959_v15  ;;  %v1115_v56 = vadd.f32 %v1114_v23, %v967_v17  ;;  %v1379_v58 = vmax.f32 %v1070_v31, 0.0  ;;  %v1381_v59 = vmax.f32 %v1113_v32, 0.0  ;;  %v1501_v20 = vld [vmem:[%s8225_s15 + $0x2d0] sm:$0xff] }
 0x8f0   :  { %v1073_v24 = vpop.f32.mrf.mxu0  ;;  %v1116_v25 = vpop.f32.mrf.mxu1 }
 0x8f1   :  { %v1074_v29 = vadd.f32 %v1073_v24, %v955_v19  ;;  %v1117_v30 = vadd.f32 %v1116_v25, %v963_v21  ;;  %v1380_v49 = vmax.f32 %v1072_v28, 0.0  ;;  %v1382_v52 = vmax.f32 %v1115_v56, 0.0  ;;  %v1519_v19 = vld [vmem:[%s8225_s15 + $0x360] sm:$0xff]  ;;  %v1520_v21 = vld [vmem:[%s8225_s15 + $0x368] sm:$0xff]  ;;  %v1502_v25 = vld [vmem:[%s8225_s15 + $0x2d8] sm:$0xff] }
 0x8f2   :  { %v1075_v34 = vpop.f32.mrf.mxu0  ;;  %v1118_v35 = vpop.f32.mrf.mxu1  ;;  %v1533_v28 = vld [vmem:[%s8225_s15 + $0x3d0] sm:$0xff]  ;;  %v1534_v56 = vld [vmem:[%s8225_s15 + $0x3d8] sm:$0xff] }
 0x8f3   :  { %v1076_v36 = vadd.f32 %v1075_v34, %v959_v15  ;;  %v1119_v33 = vadd.f32 %v1118_v35, %v967_v17  ;;  %v1395_v39 = vmax.f32 %v1074_v29, 0.0  ;;  %v1397_v40 = vmax.f32 %v1117_v30, 0.0  ;;  %v1485_v35 = vld [vmem:[%s8225_s15 + $0x250] sm:$0xff] }
 0x8f4   :  { %v6252_v41 = vpop.f32.mrf.mxu0  ;;  %v6254_v42 = vpop.f32.mrf.mxu1  ;;  %v1730_v15 = vpack.c.bf16 %v1504_v48, %v1503_v43  ;;  %v1746_v17 = vpack.c.bf16 %v1536_v57, %v1535_v22  ;;  %v1722_v34 = vpack.c.bf16 %v1488_v6, %v1487_v4  ;;  %v1745_v51 = vpack.c.bf16 %v1534_v56, %v1533_v28  ;;  %v1499_v43 = vld [vmem:[%s8225_s15 + $0x2c0] sm:$0xff]  ;;  %v1500_v48 = vld [vmem:[%s8225_s15 + $0x2c8] sm:$0xff]  ;;  %v1529_v4 = vld [vmem:[%s8225_s15 + $0x3b0] sm:$0xff] }
 0x8f5   :  { %v1396_v53 = vmax.f32 %v1076_v36, 0.0  ;;  %v1398_v55 = vmax.f32 %v1119_v33, 0.0  ;;  %v1668_v8 = vpack.c.bf16 %v1395_v39, %v1379_v58  ;;  %v1670_v9 = vpack.c.bf16 %v1397_v40, %v1381_v59  ;;  %v1518_v39 = vld [vmem:[%s8225_s15 + $0x358] sm:$0xff]  ;;  %v1483_v59 = vld [vmem:[%s8225_s15 + $0x240] sm:$0xff]  ;;  %v1496_v56 = vld [vmem:[%s8225_s15 + $0x2a8] sm:$0xff] }
 0x8f6   :  { %v1157_v60 = vpop.f32.mrf.mxu0  ;;  %v1200_v61 = vpop.f32.mrf.mxu1  ;;  %v1738_v36 = vpack.c.bf16 %v1520_v21, %v1519_v19  ;;  %v1729_v33 = vpack.c.bf16 %v1502_v25, %v1501_v20  ;;  %v1721_v22 = vpack.c.bf16 %v1486_v37, %v1485_v35  ;;  %v1737_v57 = vpack.c.bf16 %v1518_v39, %v1517_v38  ;;  %v1530_v6 = vld [vmem:[%s8225_s15 + $0x3b8] sm:$0xff]  ;;  %v1481_v21 = vld [vmem:[%s8225_s15 + $0x230] sm:$0xff]  ;;  %v1495_v28 = vld [vmem:[%s8225_s15 + $0x2a0] sm:$0xff] }
 0x8f7   :  { %v1669_v62 = vpack.c.bf16 %v1396_v53, %v1380_v49  ;;  %v1671_v1 = vpack.c.bf16 %v1398_v55, %v1382_v52  ;;  %v1158_v23 = vadd.f32 %v1157_v60, %v975_v44  ;;  %v1201_v24 = vadd.f32 %v1200_v61, %v983_v45  ;;  %v1531_v49 = vld [vmem:[%s8225_s15 + $0x3c0] sm:$0xff]  ;;  %v1532_v52 = vld [vmem:[%s8225_s15 + $0x3c8] sm:$0xff]  ;;  %v1482_v20 = vld [vmem:[%s8225_s15 + $0x238] sm:$0xff] }
 0x8f8   :  { %v6281_v12 = vpop.f32.mrf.mxu0  ;;  %v6283_v14 = vpop.f32.mrf.mxu1  ;;  %v1728_v58 = vpack.c.bf16 %v1500_v48, %v1499_v43  ;;  %v1484_v60 = vld [vmem:[%s8225_s15 + $0x248] sm:$0xff]  ;;  %v1515_v61 = vld [vmem:[%s8225_s15 + $0x340] sm:$0xff]  ;;  %v1514_v25 = vld [vmem:[%s8225_s15 + $0x338] sm:$0xff]  ;;  %v6411_v48 = vsub.s32 6, %v5681_v63 }
 0x8f9   :  { %1850 = vmatprep.mubr.bf16.mxu0 %v1669_v62  ;;  %1891 = vmatprep.mubr.bf16.mxu1 %v1671_v1  ;;  %v1384_v40 = vmax.f32 %v1158_v23, 0.0  ;;  %v1744_v62 = vpack.c.bf16 %v1532_v52, %v1531_v49  ;;  %v1516_v1 = vld [vmem:[%s8225_s15 + $0x348] sm:$0xff]  ;;  %v1513_v23 = vld [vmem:[%s8225_s15 + $0x330] sm:$0xff]  ;;  %v1511_v37 = vld [vmem:[%s8225_s15 + $0x320] sm:$0xff] }
 0x8fa   :  { %v1161_v29 = vpop.f32.mrf.mxu0  ;;  %v1204_v30 = vpop.f32.mrf.mxu1  ;;  %1851 = vmatmul.mubr.bf16.vlgmr.msra.gmra.mxu0 %v1668_v8  ;;  %1892 = vmatmul.mubr.bf16.vlgmr.msra.gmra.mxu1 %v1670_v9  ;;  %v1720_v9 = vpack.c.bf16 %v1484_v60, %v1483_v59  ;;  %v1735_v35 = vpack.c.bf16 %v1514_v25, %v1513_v23  ;;  %v1512_v39 = vld [vmem:[%s8225_s15 + $0x328] sm:$0xff]  ;;  %v1526_v43 = vld [vmem:[%s8225_s15 + $0x398] sm:$0xff]  ;;  %v1475_v25 = vld [vmem:[%s8225_s15 + $0x200] sm:$0xff] }
 0x8fb   :  { %v1162_v31 = vadd.f32 %v1161_v29, %v975_v44  ;;  %v1205_v32 = vadd.f32 %v1204_v30, %v983_v45  ;;  %4867 = vmatpush3.bf16.msra.mxu0 %v1723_v2  ;;  %4889 = vmatpush3.bf16.msra.mxu1 %v1739_v3  ;;  %v1386_v44 = vmax.f32 %v1201_v24, 0.0  ;;  %v1497_v2 = vld [vmem:[%s8225_s15 + $0x2b0] sm:$0xff]  ;;  %v1498_v3 = vld [vmem:[%s8225_s15 + $0x2b8] sm:$0xff]  ;;  %v1743_v24 = vpack.c.bf16 %v1530_v6, %v1529_v4  ;;  %v1527_v29 = vld [vmem:[%s8225_s15 + $0x3a0] sm:$0xff] }
 0x8fc   :  { %4868 = vmatprep.subr.bf16.mxu0 %v1730_v15  ;;  %4890 = vmatprep.subr.bf16.mxu1 %v1746_v17  ;;  %v6351_v8 = vpop.f32.mrf.mxu0  ;;  %v6353_v15 = vpop.f32.mrf.mxu1  ;;  %v1736_v17 = vpack.c.bf16 %v1516_v1, %v1515_v61  ;;  %v1727_v19 = vpack.c.bf16 %v1498_v3, %v1497_v2  ;;  %v1528_v30 = vld [vmem:[%s8225_s15 + $0x3a8] sm:$0xff]  ;;  %v1510_v60 = vld [vmem:[%s8225_s15 + $0x318] sm:$0xff]  ;;  %v1491_v61 = vld [vmem:[%s8225_s15 + $0x280] sm:$0xff]  ;;  %v979_v6 = vrot.slane %v6227_v11, %v6411_v48 }
 0x8fd   :  { %v1400_v45 = vmax.f32 %v1162_v31, 0.0  ;;  %v1402_v47 = vmax.f32 %v1205_v32, 0.0  ;;  %v1719_v32 = vpack.c.bf16 %v1482_v20, %v1481_v21  ;;  %v1742_v38 = vpack.c.bf16 %v1528_v30, %v1527_v29  ;;  %v6440_v2 = vld [vmem:[%s8226_s14 + $0x8] sm:$0xff]  ;;  %v1523_v3 = vld [vmem:[%s8225_s15 + $0x380] sm:$0xff] }
 0x8fe   :  { %v6379_v31 = vpop.f32.mrf.mxu0  ;;  %v1524_v4 = vld [vmem:[%s8225_s15 + $0x388] sm:$0xff] }
 0x8ff   :  { %v1673_v53 = vpack.c.bf16 %v1400_v45, %v1384_v40  ;;  %v1675_v55 = vpack.c.bf16 %v1402_v47, %v1386_v44  ;;  %4869 = vmatpush3.bf16.msra.mxu0 %v1722_v34  ;;  %4891 = vmatpush3.bf16.msra.mxu1 %v1738_v36  ;;  %v6381_v34 = vpop.f32.mrf.mxu1  ;;  %v1726_v36 = vpack.c.bf16 %v1496_v56, %v1495_v28  ;;  %v1493_v40 = vld [vmem:[%s8225_s15 + $0x290] sm:$0xff]  ;;  %v1494_v44 = vld [vmem:[%s8225_s15 + $0x298] sm:$0xff]  ;;  %v6402_v45 = vsub.s32 4, %v5681_v63  ;;  %v1507_v28 = vld [vmem:[%s8225_s15 + $0x300] sm:$0xff] }
 0x900   :  { %4870 = vmatprep.subr.bf16.mxu0 %v1729_v33  ;;  %4892 = vmatprep.subr.bf16.mxu1 %v1745_v51  ;;  %v1479_v33 = vld [vmem:[%s8225_s15 + $0x220] sm:$0xff]  ;;  %v1480_v51 = vld [vmem:[%s8225_s15 + $0x228] sm:$0xff]  ;;  %v1525_v47 = vld [vmem:[%s8225_s15 + $0x390] sm:$0xff]  ;;  %v6413_v49 = vpop.f32.mrf.mxu0  ;;  %v1203_v56 = vadd.f32 %v6283_v14, %v979_v6  ;;  %v1740_v29 = vpack.c.bf16 %v1524_v4, %v1523_v3 }
 0x901   :  { %1932 = vmatprep.mubr.bf16.mxu0 %v1673_v53  ;;  %1973 = vmatprep.mubr.bf16.mxu1 %v1675_v55  ;;  %v1718_v52 = vpack.c.bf16 %v1480_v51, %v1479_v33  ;;  %v6415_v53 = vpop.f32.mrf.mxu1  ;;  %v1734_v55 = vpack.c.bf16 %v1512_v39, %v1511_v37  ;;  %v1509_v63 = vld [vmem:[%s8225_s15 + $0x310] sm:$0xff]  ;;  %v1741_v59 = vpack.c.bf16 %v1526_v43, %v1525_v47  ;;  %v1508_v30 = vld [vmem:[%s8225_s15 + $0x308] sm:$0xff]  ;;  %v1602_v51 = vld [vmem:[%s8225_s15 + $0x5f8] sm:$0xff] }
 0x902   :  { %v971_v1 = vrot.slane %v6227_v11, %v6402_v45  ;;  %v1733_v23 = vpack.c.bf16 %v1510_v60, %v1509_v63  ;;  %v1476_v11 = vld [vmem:[%s8225_s15 + $0x208] sm:$0xff]  ;;  %v1601_v33 = vld [vmem:[%s8225_s15 + $0x5f0] sm:$0xff]  ;;  %v1199_v37 = vadd.f32 %v6254_v42, %v979_v6 }
 0x903   :  { %4871 = vmatpush3.bf16.msra.mxu0 %v1721_v22  ;;  %4893 = vmatpush3.bf16.msra.mxu1 %v1737_v57  ;;  %v1725_v22 = vpack.c.bf16 %v1494_v44, %v1493_v40  ;;  %v1477_v57 = vld [vmem:[%s8225_s15 + $0x210] sm:$0xff]  ;;  %v1290_v20 = vpop.f32.mrf.mxu1  ;;  %v1716_v39 = vpack.c.bf16 %v1476_v11, %v1475_v25  ;;  %v1600_v3 = vld [vmem:[%s8225_s15 + $0x5e8] sm:$0xff] }
 0x904   :  { %4872 = vmatprep.subr.bf16.mxu0 %v1728_v58  ;;  %4894 = vmatprep.subr.bf16.mxu1 %v1744_v62  ;;  %v1478_v58 = vld [vmem:[%s8225_s15 + $0x218] sm:$0xff]  ;;  %v1492_v62 = vld [vmem:[%s8225_s15 + $0x288] sm:$0xff]  ;;  %v1160_v21 = vadd.f32 %v6281_v12, %v971_v1  ;;  %v999_v12 = vrot.slane %v6440_v2, %v6219_v50  ;;  %v1553_v43 = vld [vmem:[%s8225_s15 + $0x470] sm:$0xff]  ;;  %v1385_v60 = vmax.f32 %v1199_v37, 0.0 }
 0x905   :  { %v1584_v25 = vld [vmem:[%s8225_s15 + $0x568] sm:$0xff]  ;;  %v1565_v11 = vld [vmem:[%s8225_s15 + $0x4d0] sm:$0xff] }
 0x906   :  { %v1399_v40 = vmax.f32 %v1160_v21, 0.0  ;;  %v1287_v42 = vadd.f32 %v6381_v34, %v999_v12  ;;  %v1568_v34 = vld [vmem:[%s8225_s15 + $0x4e8] sm:$0xff]  ;;  %v1583_v21 = vld [vmem:[%s8225_s15 + $0x560] sm:$0xff]  ;;  %v1581_v37 = vld [vmem:[%s8225_s15 + $0x550] sm:$0xff] }
 0x907   :  { %4873 = vmatpush3.bf16.msra.mxu0 %v1720_v9  ;;  %4895 = vmatpush3.bf16.msra.mxu1 %v1736_v17  ;;  %v991_v9 = vrot.slane %v6440_v2, %v6216_v54  ;;  %v1247_v17 = vpop.f32.mrf.mxu0 }
 0x908   :  { %4874 = vmatprep.subr.bf16.mxu0 %v1727_v19  ;;  %4896 = vmatprep.subr.bf16.mxu1 %v1743_v24  ;;  %v1717_v19 = vpack.c.bf16 %v1478_v58, %v1477_v57  ;;  %v1724_v24 = vpack.c.bf16 %v1492_v62, %v1491_v61  ;;  %v1586_v57 = vld [vmem:[%s8225_s15 + $0x578] sm:$0xff] }
 0x909   :  { %v1248_v14 = vadd.f32 %v1247_v17, %v991_v9  ;;  %v1244_v44 = vadd.f32 %v6379_v31, %v991_v9  ;;  %v1585_v31 = vld [vmem:[%s8225_s15 + $0x570] sm:$0xff]  ;;  %v1551_v17 = vld [vmem:[%s8225_s15 + $0x460] sm:$0xff] }
 0x90a   :  { %v1771_v9 = vpack.c.bf16 %v1586_v57, %v1585_v31  ;;  %v1579_v31 = vld [vmem:[%s8225_s15 + $0x540] sm:$0xff] }
 0x90b   :  { %4875 = vmatpush3.bf16.msra.mxu0 %v1719_v32  ;;  %4897 = vmatpush3.bf16.msra.mxu1 %v1735_v35  ;;  %v1569_v32 = vld [vmem:[%s8225_s15 + $0x4f0] sm:$0xff]  ;;  %v1570_v35 = vld [vmem:[%s8225_s15 + $0x4f8] sm:$0xff]  ;;  %v1404_v63 = vmax.f32 %v1248_v14, 0.0  ;;  %v1388_v6 = vmax.f32 %v1244_v44, 0.0  ;;  %v1564_v44 = vld [vmem:[%s8225_s15 + $0x4c8] sm:$0xff] }
 0x90c   :  { %4876 = vmatprep.subr.bf16.mxu0 %v1726_v36  ;;  %4898 = vmatprep.subr.bf16.mxu1 %v1742_v38  ;;  %v1156_v36 = vadd.f32 %v6252_v41, %v971_v1  ;;  %v1291_v38 = vadd.f32 %v1290_v20, %v999_v12  ;;  %v1732_v41 = vpack.c.bf16 %v1508_v30, %v1507_v28  ;;  %v1599_v1 = vld [vmem:[%s8225_s15 + $0x5e0] sm:$0xff]  ;;  %v1566_v28 = vld [vmem:[%s8225_s15 + $0x4d8] sm:$0xff] }
 0x90d   :  { %v1763_v47 = vpack.c.bf16 %v1570_v35, %v1569_v32  ;;  %v1778_v12 = vpack.c.bf16 %v1600_v3, %v1599_v1  ;;  %v1598_v30 = vld [vmem:[%s8225_s15 + $0x5d8] sm:$0xff]  ;;  %v1761_v14 = vpack.c.bf16 %v1566_v28, %v1565_v11  ;;  %v6582_v1 = vpop.f32.mrf.mxu1 }
 0x90e   :  { %v1383_v58 = vmax.f32 %v1156_v36, 0.0  ;;  %v1406_v61 = vmax.f32 %v1291_v38, 0.0  ;;  %v1770_v36 = vpack.c.bf16 %v1584_v25, %v1583_v21  ;;  %v1578_v21 = vld [vmem:[%s8225_s15 + $0x538] sm:$0xff]  ;;  %v1592_v25 = vld [vmem:[%s8225_s15 + $0x5a8] sm:$0xff] }
 0x90f   :  { %4877 = vmatpush3.bf16.msra.mxu0 %v1718_v52  ;;  %4899 = vmatpush3.bf16.msra.mxu1 %v1734_v55  ;;  %v1554_v52 = vld [vmem:[%s8225_s15 + $0x478] sm:$0xff]  ;;  %v1401_v55 = vmax.f32 %v1203_v56, 0.0  ;;  %v1677_v56 = vpack.c.bf16 %v1404_v63, %v1388_v6  ;;  %v1561_v63 = vld [vmem:[%s8225_s15 + $0x4b0] sm:$0xff] }
 0x910   :  { %4878 = vmatprep.subr.bf16.mxu0 %v1725_v22  ;;  %4900 = vmatprep.subr.bf16.mxu1 %v1741_v59  ;;  %v1779_v22 = vpack.c.bf16 %v1602_v51, %v1601_v33  ;;  %v1567_v59 = vld [vmem:[%s8225_s15 + $0x4e0] sm:$0xff]  ;;  %v1755_v62 = vpack.c.bf16 %v1554_v52, %v1553_v43  ;;  %v1672_v4 = vpack.c.bf16 %v1399_v40, %v1383_v58  ;;  %v1549_v33 = vld [vmem:[%s8225_s15 + $0x450] sm:$0xff]  ;;  %v1550_v51 = vld [vmem:[%s8225_s15 + $0x458] sm:$0xff] }
 0x911   :  { %v1674_v20 = vpack.c.bf16 %v1401_v55, %v1385_v60  ;;  %v1563_v40 = vld [vmem:[%s8225_s15 + $0x4c0] sm:$0xff]  ;;  %v1753_v43 = vpack.c.bf16 %v1550_v51, %v1549_v33  ;;  %v1580_v58 = vld [vmem:[%s8225_s15 + $0x548] sm:$0xff]  ;;  %v1594_v60 = vld [vmem:[%s8225_s15 + $0x5b8] sm:$0xff] }
 0x912   :  { %v1760_v55 = vpack.c.bf16 %v1564_v44, %v1563_v40  ;;  %v1768_v3 = vpack.c.bf16 %v1580_v58, %v1579_v31  ;;  %v1545_v6 = vld [vmem:[%s8225_s15 + $0x430] sm:$0xff]  ;;  %v1558_v51 = vld [vmem:[%s8225_s15 + $0x498] sm:$0xff]  ;;  %v1555_v31 = vld [vmem:[%s8225_s15 + $0x480] sm:$0xff]  ;;  %v987_v58 = vrot.slane %v6440_v2, %v5686_v5 }
 0x913   :  { %4879 = vmatpush3.bf16.msra.mxu0 %v1717_v19  ;;  %4901 = vmatpush3.bf16.msra.mxu1 %v1733_v23  ;;  %v1552_v19 = vld [vmem:[%s8225_s15 + $0x468] sm:$0xff]  ;;  %v1390_v23 = vmax.f32 %v1287_v42, 0.0  ;;  %v1547_v42 = vld [vmem:[%s8225_s15 + $0x440] sm:$0xff]  ;;  %v1557_v33 = vld [vmem:[%s8225_s15 + $0x490] sm:$0xff] }
 0x914   :  { %4880 = vmatprep.subr.bf16.mxu0 %v1724_v24  ;;  %4902 = vmatprep.subr.bf16.mxu1 %v1740_v29  ;;  %v1762_v24 = vpack.c.bf16 %v1568_v34, %v1567_v59  ;;  %v1597_v29 = vld [vmem:[%s8225_s15 + $0x5d0] sm:$0xff]  ;;  %v1754_v35 = vpack.c.bf16 %v1552_v19, %v1551_v17  ;;  %v1562_v59 = vld [vmem:[%s8225_s15 + $0x4b8] sm:$0xff] }
 0x915   :  { %v1679_v32 = vpack.c.bf16 %v1406_v61, %v1390_v23  ;;  %v1777_v38 = vpack.c.bf16 %v1598_v30, %v1597_v29  ;;  %v1593_v34 = vld [vmem:[%s8225_s15 + $0x5b0] sm:$0xff]  ;;  %v6580_v61 = vpop.f32.mrf.mxu0  ;;  %v1560_v23 = vld [vmem:[%s8225_s15 + $0x4a8] sm:$0xff]  ;;  %v1543_v30 = vld [vmem:[%s8225_s15 + $0x420] sm:$0xff] }
 0x916   :  { %v1577_v17 = vld [vmem:[%s8225_s15 + $0x530] sm:$0xff]  ;;  %v1775_v19 = vpack.c.bf16 %v1594_v60, %v1593_v34  ;;  %v995_v34 = vrot.slane %v6440_v2, %v6222_v10  ;;  %v1007_v60 = vrot.slane %v6440_v2, %v6238_v26 }
 0x917   :  { %4881 = vmatpush3.bf16.msra.mxu0 %v1716_v39  ;;  %4903 = vmatpush3.bf16.msra.mxu1 %v1732_v41  ;;  %v1582_v39 = vld [vmem:[%s8225_s15 + $0x558] sm:$0xff]  ;;  %v1595_v41 = vld [vmem:[%s8225_s15 + $0x5c0] sm:$0xff]  ;;  %v6608_v11 = vpop.f32.mrf.mxu0 }
 0x918   :  { %4910 = vmatprep.subr.bf16.mxu0 %v1763_v47  ;;  %4932 = vmatprep.subr.bf16.mxu1 %v1779_v22  ;;  %v1596_v47 = vld [vmem:[%s8225_s15 + $0x5c8] sm:$0xff]  ;;  %v1769_v52 = vpack.c.bf16 %v1582_v39, %v1581_v37  ;;  %v1589_v37 = vld [vmem:[%s8225_s15 + $0x590] sm:$0xff] }
 0x919   :  { %v1548_v22 = vld [vmem:[%s8225_s15 + $0x448] sm:$0xff]  ;;  %v1776_v57 = vpack.c.bf16 %v1596_v47, %v1595_v41  ;;  %v6636_v39 = vpop.f32.mrf.mxu0  ;;  %v1757_v47 = vpack.c.bf16 %v1558_v51, %v1557_v33  ;;  %v1330_v51 = vadd.f32 %v6608_v11, %v1007_v60  ;;  %v1649_v11 = vld [vmem:[%s8225_s15 + $0x770] sm:$0xff] }
 0x91a   :  { %1933 = vmatmul.mubr.bf16.vlgmr.msra.gmra.mxu0 %v1672_v4  ;;  %1974 = vmatmul.mubr.bf16.vlgmr.msra.gmra.mxu1 %v1674_v20  ;;  %v1759_v4 = vpack.c.bf16 %v1562_v59, %v1561_v63  ;;  %v1559_v20 = vld [vmem:[%s8225_s15 + $0x4a0] sm:$0xff]  ;;  %v1588_v59 = vld [vmem:[%s8225_s15 + $0x588] sm:$0xff] }
 0x91b   :  { %4911 = vmatpush3.bf16.msra.mxu0 %v1755_v62  ;;  %2014 = vmatprep.mubr.bf16.mxu0 %v1677_v56  ;;  %v1752_v62 = vpack.c.bf16 %v1548_v22, %v1547_v42  ;;  %v6610_v56 = vpop.f32.mrf.mxu1  ;;  %v1758_v29 = vpack.c.bf16 %v1560_v23, %v1559_v20  ;;  %v1574_v22 = vld [vmem:[%s8225_s15 + $0x518] sm:$0xff]  ;;  %v1587_v63 = vld [vmem:[%s8225_s15 + $0x580] sm:$0xff]  ;;  %v1289_v23 = vadd.f32 %v6415_v53, %v995_v34 }
 0x91c   :  { %4933 = vmatpush3.bf16.msra.mxu1 %v1771_v9  ;;  %2055 = vmatprep.mubr.bf16.mxu1 %v1679_v32  ;;  %v1546_v9 = vld [vmem:[%s8225_s15 + $0x438] sm:$0xff]  ;;  %v1544_v32 = vld [vmem:[%s8225_s15 + $0x428] sm:$0xff]  ;;  %v1571_v20 = vld [vmem:[%s8225_s15 + $0x500] sm:$0xff] }
 0x91d   :  { %4912 = vmatprep.subr.bf16.mxu0 %v1762_v24  ;;  %4934 = vmatprep.subr.bf16.mxu1 %v1778_v12  ;;  %v1591_v24 = vld [vmem:[%s8225_s15 + $0x5a0] sm:$0xff]  ;;  %v1751_v28 = vpack.c.bf16 %v1546_v9, %v1545_v6  ;;  %v1767_v12 = vpack.c.bf16 %v1578_v21, %v1577_v17  ;;  %v1750_v40 = vpack.c.bf16 %v1544_v32, %v1543_v30  ;;  %v6638_v44 = vpop.f32.mrf.mxu1  ;;  %v1540_v21 = vld [vmem:[%s8225_s15 + $0x408] sm:$0xff]  ;;  %v1665_v30 = vld [vmem:[%s8225_s15 + $0x7f0] sm:$0xff] }
 0x91e   :  { %v1666_v32 = vld [vmem:[%s8225_s15 + $0x7f8] sm:$0xff] }
 0x91f   :  { %4913 = vmatpush3.bf16.msra.mxu0 %v1754_v35  ;;  %v1575_v35 = vld [vmem:[%s8225_s15 + $0x520] sm:$0xff]  ;;  %v1376_v6 = vpop.f32.mrf.mxu1 }
 0x920   :  { %4935 = vmatpush3.bf16.msra.mxu1 %v1770_v36  ;;  %4914 = vmatprep.subr.bf16.mxu0 %v1761_v14  ;;  %v1774_v36 = vpack.c.bf16 %v1592_v25, %v1591_v24  ;;  %v1576_v14 = vld [vmem:[%s8225_s15 + $0x528] sm:$0xff]  ;;  %v1772_v24 = vpack.c.bf16 %v1588_v59, %v1587_v63 }
 0x921   :  { %4936 = vmatprep.subr.bf16.mxu1 %v1777_v38  ;;  %v1590_v38 = vld [vmem:[%s8225_s15 + $0x598] sm:$0xff]  ;;  %v1766_v41 = vpack.c.bf16 %v1576_v14, %v1575_v35  ;;  %v1572_v25 = vld [vmem:[%s8225_s15 + $0x508] sm:$0xff]  ;;  %v1285_v35 = vadd.f32 %v6353_v15, %v995_v34  ;;  %v1392_v34 = vmax.f32 %v1330_v51, 0.0 }
 0x922   :  { %v1773_v42 = vpack.c.bf16 %v1590_v38, %v1589_v37  ;;  %v1617_v38 = vld [vmem:[%s8225_s15 + $0x670] sm:$0xff]  ;;  %v1664_v63 = vld [vmem:[%s8225_s15 + $0x7e8] sm:$0xff] }
 0x923   :  { %4915 = vmatpush3.bf16.msra.mxu0 %v1753_v43  ;;  %v1541_v43 = vld [vmem:[%s8225_s15 + $0x410] sm:$0xff]  ;;  %v1628_v51 = vld [vmem:[%s8225_s15 + $0x6c8] sm:$0xff] }
 0x924   :  { %4937 = vmatpush3.bf16.msra.mxu1 %v1769_v52  ;;  %4916 = vmatprep.subr.bf16.mxu0 %v1760_v55  ;;  %v1542_v52 = vld [vmem:[%s8225_s15 + $0x418] sm:$0xff]  ;;  %v1573_v55 = vld [vmem:[%s8225_s15 + $0x510] sm:$0xff] }
 0x925   :  { %4938 = vmatprep.subr.bf16.mxu1 %v1776_v57  ;;  %v1556_v57 = vld [vmem:[%s8225_s15 + $0x488] sm:$0xff]  ;;  %v1765_v9 = vpack.c.bf16 %v1574_v22, %v1573_v55  ;;  %v1389_v22 = vmax.f32 %v1285_v35, 0.0  ;;  %v1645_v35 = vld [vmem:[%s8225_s15 + $0x750] sm:$0xff] }
 0x926   :  { %v1756_v17 = vpack.c.bf16 %v1556_v57, %v1555_v31 }
 0x927   :  { %4917 = vmatpush3.bf16.msra.mxu0 %v1752_v62  ;;  %v1333_v62 = vpop.f32.mrf.mxu0 }
 0x928   :  { %4939 = vmatpush3.bf16.msra.mxu1 %v1768_v3  ;;  %4918 = vmatprep.subr.bf16.mxu0 %v1759_v4  ;;  %v1749_v3 = vpack.c.bf16 %v1542_v52, %v1541_v43  ;;  %v1246_v4 = vadd.f32 %v6413_v49, %v987_v58  ;;  %v1015_v49 = vrot.slane %v6440_v2, %v6241_v27  ;;  %v1650_v43 = vld [vmem:[%s8225_s15 + $0x778] sm:$0xff] }
 0x929   :  { %4940 = vmatprep.subr.bf16.mxu1 %v1775_v19  ;;  %v1539_v19 = vld [vmem:[%s8225_s15 + $0x400] sm:$0xff]  ;;  %v1334_v53 = vadd.f32 %v1333_v62, %v1007_v60  ;;  %v1803_v60 = vpack.c.bf16 %v1650_v43, %v1649_v11 }
 0x92a   :  { %v1748_v14 = vpack.c.bf16 %v1540_v21, %v1539_v19  ;;  %v1403_v33 = vmax.f32 %v1246_v4, 0.0  ;;  %v1373_v15 = vadd.f32 %v6610_v56, %v1015_v49  ;;  %v1632_v56 = vld [vmem:[%s8225_s15 + $0x6e8] sm:$0xff]  ;;  %v1615_v62 = vld [vmem:[%s8225_s15 + $0x660] sm:$0xff]  ;;  %v1629_v21 = vld [vmem:[%s8225_s15 + $0x6d0] sm:$0xff] }
 0x92b   :  { %4919 = vmatpush3.bf16.msra.mxu0 %v1751_v28  ;;  %v1633_v28 = vld [vmem:[%s8225_s15 + $0x6f0] sm:$0xff]  ;;  %v1408_v55 = vmax.f32 %v1334_v53, 0.0  ;;  %v1647_v4 = vld [vmem:[%s8225_s15 + $0x760] sm:$0xff]  ;;  %v1648_v19 = vld [vmem:[%s8225_s15 + $0x768] sm:$0xff] }
 0x92c   :  { %4941 = vmatpush3.bf16.msra.mxu1 %v1767_v12  ;;  %4920 = vmatprep.subr.bf16.mxu0 %v1758_v29  ;;  %v1634_v12 = vld [vmem:[%s8225_s15 + $0x6f8] sm:$0xff]  ;;  %v1242_v29 = vadd.f32 %v6351_v8, %v987_v58  ;;  %v1764_v8 = vpack.c.bf16 %v1572_v25, %v1571_v20  ;;  %v1663_v58 = vld [vmem:[%s8225_s15 + $0x7e0] sm:$0xff] }
 0x92d   :  { %4942 = vmatprep.subr.bf16.mxu1 %v1774_v36  ;;  %v1377_v36 = vadd.f32 %v1376_v6, %v1015_v49  ;;  %v1795_v37 = vpack.c.bf16 %v1634_v12, %v1633_v28  ;;  %v1630_v20 = vld [vmem:[%s8225_s15 + $0x6d8] sm:$0xff]  ;;  %v1810_v49 = vpack.c.bf16 %v1664_v63, %v1663_v58  ;;  %v1643_v11 = vld [vmem:[%s8225_s15 + $0x740] sm:$0xff]  ;;  %v1609_v63 = vld [vmem:[%s8225_s15 + $0x630] sm:$0xff] }
 0x92e   :  { %v1387_v52 = vmax.f32 %v1242_v29, 0.0  ;;  %v1662_v25 = vld [vmem:[%s8225_s15 + $0x7d8] sm:$0xff]  ;;  %v1802_v29 = vpack.c.bf16 %v1648_v19, %v1647_v4  ;;  %v1793_v53 = vpack.c.bf16 %v1630_v20, %v1629_v21  ;;  %v1624_v4 = vld [vmem:[%s8225_s15 + $0x6a8] sm:$0xff]  ;;  %v1607_v20 = vld [vmem:[%s8225_s15 + $0x620] sm:$0xff] }
 0x92f   :  { %4921 = vmatpush3.bf16.msra.mxu0 %v1750_v40  ;;  %v1618_v40 = vld [vmem:[%s8225_s15 + $0x678] sm:$0xff]  ;;  %v1410_v31 = vmax.f32 %v1377_v36, 0.0 }
 0x930   :  { %4943 = vmatpush3.bf16.msra.mxu1 %v1766_v41  ;;  %4922 = vmatprep.subr.bf16.mxu0 %v1757_v47  ;;  %v1405_v41 = vmax.f32 %v1289_v23, 0.0  ;;  %v1811_v47 = vpack.c.bf16 %v1666_v32, %v1665_v30  ;;  %v1787_v57 = vpack.c.bf16 %v1618_v40, %v1617_v38  ;;  %v1676_v59 = vpack.c.bf16 %v1403_v33, %v1387_v52  ;;  %v1613_v30 = vld [vmem:[%s8225_s15 + $0x650] sm:$0xff]  ;;  %v1614_v32 = vld [vmem:[%s8225_s15 + $0x658] sm:$0xff]  ;;  %v1627_v33 = vld [vmem:[%s8225_s15 + $0x6c0] sm:$0xff] }
 0x931   :  { %4944 = vmatprep.subr.bf16.mxu1 %v1773_v42  ;;  %v1631_v42 = vld [vmem:[%s8225_s15 + $0x6e0] sm:$0xff]  ;;  %v1681_v23 = vpack.c.bf16 %v1408_v55, %v1392_v34  ;;  %v1785_v38 = vpack.c.bf16 %v1614_v32, %v1613_v30  ;;  %v1644_v52 = vld [vmem:[%s8225_s15 + $0x748] sm:$0xff]  ;;  %v1625_v55 = vld [vmem:[%s8225_s15 + $0x6b0] sm:$0xff] }
 0x932   :  { %v1678_v6 = vpack.c.bf16 %v1405_v41, %v1389_v22  ;;  %v1792_v41 = vpack.c.bf16 %v1628_v51, %v1627_v33  ;;  %v1658_v22 = vld [vmem:[%s8225_s15 + $0x7b8] sm:$0xff]  ;;  %v1641_v34 = vld [vmem:[%s8225_s15 + $0x730] sm:$0xff] }
 0x933   :  { %4923 = vmatpush3.bf16.msra.mxu0 %v1749_v3  ;;  %v1616_v3 = vld [vmem:[%s8225_s15 + $0x668] sm:$0xff]  ;;  %v1637_v33 = vld [vmem:[%s8225_s15 + $0x710] sm:$0xff] }
 0x934   :  { %4945 = vmatpush3.bf16.msra.mxu1 %v1765_v9  ;;  %4924 = vmatprep.subr.bf16.mxu0 %v1756_v17  ;;  %v1394_v9 = vmax.f32 %v1373_v15, 0.0  ;;  %v1794_v17 = vpack.c.bf16 %v1632_v56, %v1631_v42  ;;  %v1786_v12 = vpack.c.bf16 %v1616_v3, %v1615_v62  ;;  %v1611_v15 = vld [vmem:[%s8225_s15 + $0x640] sm:$0xff]  ;;  %v1626_v42 = vld [vmem:[%s8225_s15 + $0x6b8] sm:$0xff]  ;;  %v1657_v56 = vld [vmem:[%s8225_s15 + $0x7b0] sm:$0xff] }
 0x935   :  { %4946 = vmatprep.subr.bf16.mxu1 %v1772_v24  ;;  %v1661_v24 = vld [vmem:[%s8225_s15 + $0x7d0] sm:$0xff]  ;;  %v1791_v58 = vpack.c.bf16 %v1626_v42, %v1625_v55  ;;  %v1642_v62 = vld [vmem:[%s8225_s15 + $0x738] sm:$0xff]  ;;  %v1623_v3 = vld [vmem:[%s8225_s15 + $0x6a0] sm:$0xff] }
 0x936   :  { %v1683_v28 = vpack.c.bf16 %v1410_v31, %v1394_v9  ;;  %v1809_v36 = vpack.c.bf16 %v1662_v25, %v1661_v24  ;;  %v1656_v9 = vld [vmem:[%s8225_s15 + $0x7a8] sm:$0xff]  ;;  %v1799_v19 = vpack.c.bf16 %v1642_v62, %v1641_v34  ;;  %v1790_v21 = vpack.c.bf16 %v1624_v4, %v1623_v3  ;;  %v1603_v42 = vld [vmem:[%s8225_s15 + $0x600] sm:$0xff] }
 0x937   :  { %4925 = vmatpush3.bf16.msra.mxu0 %v1748_v14  ;;  %v1646_v14 = vld [vmem:[%s8225_s15 + $0x758] sm:$0xff]  ;;  %v1640_v25 = vld [vmem:[%s8225_s15 + $0x728] sm:$0xff] }
 0x938   :  { %4947 = vmatpush3.bf16.msra.mxu1 %v1764_v8  ;;  %4954 = vmatprep.subr.bf16.mxu0 %v1795_v37  ;;  %v1659_v8 = vld [vmem:[%s8225_s15 + $0x7c0] sm:$0xff]  ;;  %v1660_v37 = vld [vmem:[%s8225_s15 + $0x7c8] sm:$0xff]  ;;  %v1801_v40 = vpack.c.bf16 %v1646_v14, %v1645_v35  ;;  %v1606_v14 = vld [vmem:[%s8225_s15 + $0x618] sm:$0xff] }
 0x939   :  { %4976 = vmatprep.subr.bf16.mxu1 %v1811_v47  ;;  %v1612_v47 = vld [vmem:[%s8225_s15 + $0x648] sm:$0xff]  ;;  %v1808_v43 = vpack.c.bf16 %v1660_v37, %v1659_v8  ;;  %v1638_v8 = vld [vmem:[%s8225_s15 + $0x718] sm:$0xff]  ;;  %v1619_v37 = vld [vmem:[%s8225_s15 + $0x680] sm:$0xff] }
 0x93a   :  { %2015 = vmatmul.mubr.bf16.vlgmr.msra.gmra.mxu0 %v1676_v59  ;;  %v1784_v31 = vpack.c.bf16 %v1612_v47, %v1611_v15  ;;  %v1610_v59 = vld [vmem:[%s8225_s15 + $0x638] sm:$0xff]  ;;  %v1652_v15 = vld [vmem:[%s8225_s15 + $0x788] sm:$0xff]  ;;  %v1011_v47 = vrot.slane %v6440_v2, %v6411_v48 }
 0x93b   :  { %2056 = vmatmul.mubr.bf16.vlgmr.msra.gmra.mxu1 %v1678_v6  ;;  %4955 = vmatpush3.bf16.msra.mxu0 %v1787_v57  ;;  %v1800_v57 = vpack.c.bf16 %v1644_v52, %v1643_v11  ;;  %v1655_v6 = vld [vmem:[%s8225_s15 + $0x7a0] sm:$0xff]  ;;  %v1797_v52 = vpack.c.bf16 %v1638_v8, %v1637_v33 }
 0x93c   :  { %2096 = vmatprep.mubr.bf16.mxu0 %v1681_v23  ;;  %4977 = vmatpush3.bf16.msra.mxu1 %v1803_v60  ;;  %v1807_v60 = vpack.c.bf16 %v1658_v22, %v1657_v56  ;;  %v1608_v23 = vld [vmem:[%s8225_s15 + $0x628] sm:$0xff]  ;;  %v1806_v24 = vpack.c.bf16 %v1656_v9, %v1655_v6  ;;  %v1375_v22 = vadd.f32 %v6638_v44, %v1011_v47 }
 0x93d   :  { %2137 = vmatprep.mubr.bf16.mxu1 %v1683_v28  ;;  %4956 = vmatprep.subr.bf16.mxu0 %v1794_v17  ;;  %v1783_v17 = vpack.c.bf16 %v1610_v59, %v1609_v63  ;;  %v1621_v28 = vld [vmem:[%s8225_s15 + $0x690] sm:$0xff]  ;;  %v1782_v30 = vpack.c.bf16 %v1608_v23, %v1607_v20  ;;  %v1604_v56 = vld [vmem:[%s8225_s15 + $0x608] sm:$0xff] }
 0x93e   :  { %4978 = vmatprep.subr.bf16.mxu1 %v1810_v49  ;;  %v1639_v49 = vld [vmem:[%s8225_s15 + $0x720] sm:$0xff]  ;;  %v1780_v63 = vpack.c.bf16 %v1604_v56, %v1603_v42  ;;  %v1409_v34 = vmax.f32 %v1375_v22, 0.0 }
 0x93f   :  { %4957 = vmatpush3.bf16.msra.mxu0 %v1786_v12  ;;  %v1622_v12 = vld [vmem:[%s8225_s15 + $0x698] sm:$0xff]  ;;  %v1798_v32 = vpack.c.bf16 %v1640_v25, %v1639_v49 }
 0x940   :  { %4979 = vmatpush3.bf16.msra.mxu1 %v1802_v29  ;;  %4958 = vmatprep.subr.bf16.mxu0 %v1793_v53  ;;  %v1653_v29 = vld [vmem:[%s8225_s15 + $0x790] sm:$0xff]  ;;  %v1654_v53 = vld [vmem:[%s8225_s15 + $0x798] sm:$0xff]  ;;  %v1789_v35 = vpack.c.bf16 %v1622_v12, %v1621_v28 }
 0x941   :  { %4980 = vmatprep.subr.bf16.mxu1 %v1809_v36  ;;  %v1605_v36 = vld [vmem:[%s8225_s15 + $0x610] sm:$0xff]  ;;  %v1805_v51 = vpack.c.bf16 %v1654_v53, %v1653_v29 }
 0x942   :  { %v1781_v11 = vpack.c.bf16 %v1606_v14, %v1605_v36 }
 0x943   :  { %4959 = vmatpush3.bf16.msra.mxu0 %v1785_v38  ;;  %v1620_v38 = vld [vmem:[%s8225_s15 + $0x688] sm:$0xff] }
 0x944   :  { %4981 = vmatpush3.bf16.msra.mxu1 %v1801_v40  ;;  %4960 = vmatprep.subr.bf16.mxu0 %v1792_v41  ;;  %v1003_v40 = vrot.slane %v6440_v2, %v6402_v45  ;;  %v1651_v41 = vld [vmem:[%s8225_s15 + $0x780] sm:$0xff]  ;;  %v1788_v55 = vpack.c.bf16 %v1620_v38, %v1619_v37 }
 0x945   :  { %4982 = vmatprep.subr.bf16.mxu1 %v1808_v43  ;;  %v1804_v2 = vpack.c.bf16 %v1652_v15, %v1651_v41 }
 0x946   :  { %v1332_v43 = vadd.f32 %v6636_v39, %v1003_v40  ;;  %v1635_v39 = vld [vmem:[%s8225_s15 + $0x700] sm:$0xff] }
 0x947   :  { %4961 = vmatpush3.bf16.msra.mxu0 %v1784_v31  ;;  %v1636_v31 = vld [vmem:[%s8225_s15 + $0x708] sm:$0xff] }
 0x948   :  { %4983 = vmatpush3.bf16.msra.mxu1 %v1800_v57  ;;  %4962 = vmatprep.subr.bf16.mxu0 %v1791_v58  ;;  %v1328_v57 = vadd.f32 %v6580_v61, %v1003_v40  ;;  %v1371_v58 = vadd.f32 %v6582_v1, %v1011_v47  ;;  %v1407_v59 = vmax.f32 %v1332_v43, 0.0  ;;  %v1796_v44 = vpack.c.bf16 %v1636_v31, %v1635_v39 }
 0x949   :  { %4984 = vmatprep.subr.bf16.mxu1 %v1807_v60 }
 0x94a   :  { %v1391_v60 = vmax.f32 %v1328_v57, 0.0  ;;  %v1393_v62 = vmax.f32 %v1371_v58, 0.0 }
 0x94b   :  { %4963 = vmatpush3.bf16.msra.mxu0 %v1783_v17 }
 0x94c   :  { %4985 = vmatpush3.bf16.msra.mxu1 %v1799_v19  ;;  %4964 = vmatprep.subr.bf16.mxu0 %v1790_v21  ;;  %v1680_v3 = vpack.c.bf16 %v1407_v59, %v1391_v60  ;;  %v1682_v4 = vpack.c.bf16 %v1409_v34, %v1393_v62 }
 0x94d   :  { %4986 = vmatprep.subr.bf16.mxu1 %v1806_v24 }
 0x94f   :  { %4965 = vmatpush3.bf16.msra.mxu0 %v1782_v30  ;;  %v4411_v30 = vld [vmem:[%s8227_s16] ss:$0 sm:$0xff] }
 0x950   :  { %4987 = vmatpush3.bf16.msra.mxu1 %v1798_v32  ;;  %4966 = vmatprep.subr.bf16.mxu0 %v1789_v35 }
 0x951   :  { %4988 = vmatprep.subr.bf16.mxu1 %v1805_v51 }
 0x953   :  { %4967 = vmatpush3.bf16.msra.mxu0 %v1781_v11 }
 0x954   :  { %4989 = vmatpush3.bf16.msra.mxu1 %v1797_v52  ;;  %4968 = vmatprep.subr.bf16.mxu0 %v1788_v55 }
 0x955   :  { %4990 = vmatprep.subr.bf16.mxu1 %v1804_v2 }
 0x957   :  { %4969 = vmatpush3.bf16.msra.mxu0 %v1780_v63 }
 0x958   :  { %4991 = vmatpush3.bf16.msra.mxu1 %v1796_v44  ;;  %5285 = vmatprep.subr.bf16.mxu0 %v5441_v0 }
 0x959   :  { %5293 = vmatprep.subr.bf16.mxu1 %v5441_v0 }
 0x95a   :  { %2097 = vmatmul.mubr.bf16.vlgmr.msra.gmra.mxu0 %v1680_v3 }
 0x95b   :  { %2138 = vmatmul.mubr.bf16.vlgmr.msra.gmra.mxu1 %v1682_v4  ;;  %5289 = vmatprep.mubr.msk.bf16.mxu0 %vm5442_vm0, %v5441_v0 }
 0x95c   :  { %5297 = vmatprep.mubr.msk.bf16.mxu1 %vm5442_vm0, %v5441_v0 }
 0x9ba   :  { %v4838_v61 = vpop.f32.mrf.mxu0  ;;  %v4860_v1 = vpop.f32.mrf.mxu1 }
 0x9bc   :  { %v4839_v6 = vpop.f32.mrf.mxu0  ;;  %v4861_v9 = vpop.f32.mrf.mxu1 }
 0x9bd   :  { %v4840_v53 = vadd.f32 %v4839_v6, %v4838_v61  ;;  %v4862_v8 = vadd.f32 %v4861_v9, %v4860_v1 }
 0x9be   :  { %v4841_v17 = vpop.f32.mrf.mxu0  ;;  %v4863_v19 = vpop.f32.mrf.mxu1 }
 0x9bf   :  { %v1853_v36 = vadd.f32 %v4840_v53, %v4411_v30 }
 0x9c0   :  { %v4842_v21 = vpop.f32.mrf.mxu0  ;;  %v4864_v23 = vpop.f32.mrf.mxu1 }
 0x9c1   :  { %v4843_v14 = vadd.f32 %v4842_v21, %v4841_v17  ;;  %v1894_v38 = vadd.f32 %v4862_v8, %v1853_v36  ;;  %v4865_v47 = vadd.f32 %v4864_v23, %v4863_v19 }
 0x9c3   :  { %v1856_v40 = vadd.f32 %v4843_v14, %v4411_v30 }
 0x9c5   :  { %v1897_v52 = vadd.f32 %v4865_v47, %v1856_v40  ;;  %v4423_v47 = vld [vmem:[%s8256_s24 + $0x30] sm:$0xff] }
 0x9da   :  { %v4882_v20 = vpop.f32.mrf.mxu0  ;;  %v4904_v49 = vpop.f32.mrf.mxu1 }
 0x9dc   :  { %v4883_v24 = vpop.f32.mrf.mxu0  ;;  %v4905_v25 = vpop.f32.mrf.mxu1 }
 0x9dd   :  { %v4884_v37 = vadd.f32 %v4883_v24, %v4882_v20  ;;  %v4906_v55 = vadd.f32 %v4905_v25, %v4904_v49 }
 0x9de   :  { %v4885_v28 = vpop.f32.mrf.mxu0  ;;  %v4907_v12 = vpop.f32.mrf.mxu1 }
 0x9df   :  { %v1935_v11 = vadd.f32 %v4884_v37, %v1894_v38 }
 0x9e0   :  { %v4886_v29 = vpop.f32.mrf.mxu0  ;;  %v4908_v35 = vpop.f32.mrf.mxu1 }
 0x9e1   :  { %v4887_v43 = vadd.f32 %v4886_v29, %v4885_v28  ;;  %v1976_v2 = vadd.f32 %v4906_v55, %v1935_v11  ;;  %v4909_v31 = vadd.f32 %v4908_v35, %v4907_v12  ;;  %v4415_v55 = vld [vmem:[%s8257_s0 + $0x28] sm:$0xff] }
 0x9e3   :  { %v1938_v39 = vadd.f32 %v4887_v43, %v1897_v52  ;;  %v4424_v43 = vld [vmem:[%s8256_s24 + $0x38] sm:$0xff]  ;;  %v4414_v52 = vld [vmem:[%s8257_s0 + $0x20] sm:$0xff] }
 0x9e5   :  { %v1979_v44 = vadd.f32 %v4909_v31, %v1938_v39 }
 0x9fa   :  { %v4926_v32 = vpop.f32.mrf.mxu0 }
 0x9fb   :  { %v4948_v33 = vpop.f32.mrf.mxu1 }
 0x9fc   :  { %v4927_v51 = vpop.f32.mrf.mxu0 }
 0x9fd   :  { %v4949_v41 = vpop.f32.mrf.mxu1  ;;  %v4928_v42 = vadd.f32 %v4927_v51, %v4926_v32 }
 0x9fe   :  { %v4929_v15 = vpop.f32.mrf.mxu0  ;;  %v4950_v34 = vadd.f32 %v4949_v41, %v4948_v33 }
 0x9ff   :  { %v4951_v56 = vpop.f32.mrf.mxu1  ;;  %v2017_v57 = vadd.f32 %v4928_v42, %v1976_v2  ;;  %v2260_v42 = vpack.c.bf16 %v4424_v43, %v4423_v47  ;;  %v2200_v2 = vpack.c.bf16 %v4415_v55, %v4414_v52 }
 0xa00   :  { %v4930_v22 = vpop.f32.mrf.mxu0 }
 0xa01   :  { %v4931_v58 = vadd.f32 %v4930_v22, %v4929_v15  ;;  %v4952_v63 = vpop.f32.mrf.mxu1  ;;  %v2058_v3 = vadd.f32 %v4950_v34, %v2017_v57  ;;  %v4417_v15 = vld [vmem:[%s8257_s0 + $0x38] sm:$0xff]  ;;  %v4422_v22 = vld [vmem:[%s8256_s24 + $0x28] sm:$0xff]  ;;  %5294 = vmatpush3.bf16.msra.mxu1 %v2260_v42 }
 0xa02   :  { %v4953_v9 = vadd.f32 %v4952_v63, %v4951_v56  ;;  %v4421_v56 = vld [vmem:[%s8256_s24 + $0x20] sm:$0xff]  ;;  %5295 = vmatprep.subr.bf16.mxu1 %v5441_v0 }
 0xa03   :  { %v2020_v4 = vadd.f32 %v4931_v58, %v1979_v44  ;;  %v2259_v39 = vpack.c.bf16 %v4422_v22, %v4421_v56 }
 0xa05   :  { %v2061_v23 = vadd.f32 %v4953_v9, %v2020_v4  ;;  %5296 = vmatpush3.bf16.msra.mxu1 %v2259_v39  ;;  %v4430_v9 = vld [vmem:[%s8260_s7 + $0x30] sm:$0xff] }
 0xa06   :  { %5309 = vmatprep.subr.bf16.mxu1 %v5441_v0 }
 0xa1a   :  { %v4970_v59 = vpop.f32.mrf.mxu0 }
 0xa1b   :  { %v4992_v60 = vpop.f32.mrf.mxu1 }
 0xa1c   :  { %v4971_v62 = vpop.f32.mrf.mxu0 }
 0xa1d   :  { %v4972_v61 = vadd.f32 %v4971_v62, %v4970_v59  ;;  %v4993_v1 = vpop.f32.mrf.mxu1  ;;  %v4412_v62 = vld [vmem:[%s8228_s17] ss:$0 sm:$0xff] }
 0xa1e   :  { %v4973_v6 = vpop.f32.mrf.mxu0  ;;  %v4994_v19 = vadd.f32 %v4993_v1, %v4992_v60  ;;  %v4413_v1 = vld [vmem:[%s8229_s18] ss:$0 sm:$0xff] }
 0xa1f   :  { %v2099_v17 = vadd.f32 %v4972_v61, %v2058_v3  ;;  %v4995_v21 = vpop.f32.mrf.mxu1 }
 0xa20   :  { %v4974_v20 = vpop.f32.mrf.mxu0 }
 0xa21   :  { %v2140_v49 = vadd.f32 %v4994_v19, %v2099_v17  ;;  %v4975_v24 = vadd.f32 %v4974_v20, %v4973_v6  ;;  %v4996_v25 = vpop.f32.mrf.mxu1  ;;  %v4431_v17 = vld [vmem:[%s8260_s7 + $0x38] sm:$0xff] }
 0xa22   :  { %v4997_v12 = vadd.f32 %v4996_v25, %v4995_v21  ;;  %v2316_v20 = vpack.c.bf16 %v4431_v17, %v4430_v9 }
 0xa23   :  { %v2102_v28 = vadd.f32 %v4975_v24, %v2061_v23  ;;  %v2146_v29 = vadd.f32 %v2140_v49, %v5873_v16  ;;  %v4428_v49 = vld [vmem:[%s8260_s7 + $0x20] sm:$0xff]  ;;  %v4429_v24 = vld [vmem:[%s8260_s7 + $0x28] sm:$0xff] }
 0xa24   :  { %v2315_v25 = vpack.c.bf16 %v4429_v24, %v4428_v49 }
 0xa25   :  { %v2143_v53 = vadd.f32 %v4997_v12, %v2102_v28  ;;  %v2150_v30 = vsel %vm122_vm1, %v2146_v29, 0.0  ;;  %v4426_v28 = vld [vmem:[%s8261_s28 + $0x1] ss:$0 sm:$0xff] }
 0xa26   :  { %2151 = vadd.xlane.f32.xlu1 %v2150_v30 }
 0xa27   :  { %v2147_v32 = vadd.f32 %v2143_v53, %v5875_v18  ;;  %v4416_v18 = vld [vmem:[%s8257_s0 + $0x30] sm:$0xff] }
 0xa28   :  { %v2201_v11 = vpack.c.bf16 %v4417_v15, %v4416_v18 }
 0xa29   :  { %v2153_v35 = vsel %vm122_vm1, %v2147_v32, 0.0 }
 0xa2a   :  { %2154 = vadd.xlane.f32.xlu0 %v2153_v35  ;;  %5286 = vmatpush3.bf16.msra.mxu0 %v2201_v11 }
 0xa2b   :  { %5287 = vmatprep.subr.bf16.mxu0 %v5441_v0 }
 0xa2e   :  { %5288 = vmatpush3.bf16.msra.mxu0 %v2200_v2 }
 0xa2f   :  { %5301 = vmatprep.subr.bf16.mxu0 %v5441_v0 }
 0xaaf   :  { %v2152_v36 = vpop.xlane.xlu1 %2151 }
 0xab0   :  { %v2156_v14 = vmul.f32 0.03125, %v2152_v36  ;;  %v4419_v36 = vld [vmem:[%s8262_s5 + $0x1] ss:$0 sm:$0xff]  ;;  %s8264_s5 = smov 112  }
 0xab2   :  { %v2158_v33 = vsub.f32 %v2146_v29, %v2156_v14 }
 0xab3   :  { %v2155_v51 = vpop.xlane.xlu0 %2154 }
 0xab4   :  { %v2157_v8 = vmul.f32 0.03125, %v2155_v51  ;;  %v2160_v37 = vmul.f32 %v2158_v33, %v2158_v33 }
 0xab6   :  { %v2159_v38 = vsub.f32 %v2147_v32, %v2157_v8  ;;  %v2162_v40 = vsel %vm122_vm1, %v2160_v37, 0.0 }
 0xab7   :  { %2163 = vadd.xlane.f32.xlu1 %v2162_v40  ;;  %v4433_v40 = vld [vmem:[%s8263_s3 + $0x1] ss:$0 sm:$0xff] }
 0xab8   :  { %v2161_v16 = vmul.f32 %v2159_v38, %v2159_v38 }
 0xaba   :  { %v2165_v41 = vsel %vm122_vm1, %v2161_v16, 0.0 }
 0xabb   :  { %2166 = vadd.xlane.f32.xlu0 %v2165_v41 }
 0xb40   :  { %v2164_v31 = vpop.xlane.xlu1 %2163 }
 0xb41   :  { %v2168_v57 = vmul.f32 0.03125, %v2164_v31 }
 0xb43   :  { %v2170_v58 = vadd.f32 1e-05, %v2168_v57 }
 0xb44   :  { %v2167_v63 = vpop.xlane.xlu0 %2166 }
 0xb45   :  { %5409 = vrsqrt.f32 %v2170_v58  ;;  %v2169_v59 = vmul.f32 0.03125, %v2167_v63 }
 0xb47   :  { %v2171_v44 = vadd.f32 1e-05, %v2169_v59 }
 0xb49   :  { %5411 = vrsqrt.f32 %v2171_v44 }
 0xb52   :  { %v5410_v34 = vpop.eup %5409 }
 0xb53   :  { %v2174_v60 = vmul.f32 %v5410_v34, %v2158_v33 }
 0xb55   :  { %v2182_v61 = vmul.f32 %v4412_v62, %v2174_v60 }
 0xb56   :  { %v5412_v3 = vpop.eup %5411 }
 0xb57   :  { %v2175_v4 = vmul.f32 %v5412_v3, %v2159_v38  ;;  %v6945_v19 = vadd.f32 %v4413_v1, %v2182_v61 }
 0xb59   :  { %v2183_v6 = vmul.f32 %v4412_v62, %v2175_v4 }
 0xb5b   :  { %v6947_v21 = vadd.f32 %v4413_v1, %v2183_v6 }
 0xb5d   :  { %v2199_v23 = vpack.c.bf16 %v6947_v21, %v6945_v19 }
 0xb5f   :  { %5290 = vmatmul.mubr.msk.bf16.vlgmr.msra.gmra.mxu0 %vm122_vm1, %v2199_v23  ;;  %5298 = vmatmul.mubr.msk.bf16.vlgmr.msra.gmra.mxu1 %vm122_vm1, %v2199_v23 }
 0xb60   :  { %5302 = vmatpush3.bf16.msra.mxu0 %v2316_v20  ;;  %5305 = vmatprep.mubr.msk.bf16.mxu0 %vm5442_vm0, %v5441_v0 }
 0xb61   :  { %5303 = vmatprep.subr.bf16.mxu0 %v5441_v0  ;;  %5311 = vmatprep.mubr.msk.bf16.mxu1 %vm5442_vm0, %v5441_v0 }
 0xb64   :  { %5304 = vmatpush3.bf16.msra.mxu0 %v2315_v25 }
 0xb65   :  { %5315 = vmatprep.subr.bf16.mxu0 %v5441_v0 }
 0xb67   :  { %5306 = vmatmul.mubr.msk.bf16.vlgmr.msra.gmra.mxu0 %vm122_vm1, %v2199_v23 }
 0xb68   :  { %5317 = vmatprep.mubr.msk.bf16.mxu0 %vm5442_vm0, %v5441_v0 }
 0xc1f   :  { %v2245_v12 = vpop.f32.mrf.mxu0  ;;  %v2301_v29 = vpop.f32.mrf.mxu1 }
 0xc20   :  { %v2302_v53 = vadd.f32 %v4426_v28, %v2301_v29  ;;  %v2246_v16 = vadd.f32 %v4419_v36, %v2245_v12 }
 0xc21   :  { %v5291_v30 = vpop.f32.mrf.mxu0  ;;  %v5299_v32 = vpop.f32.mrf.mxu1 }
 0xc22   :  { %v2366_v35 = vpack.c.bf16 %v2302_v53, %v2302_v53  ;;  %v2364_v43 = vpack.c.bf16 %v2246_v16, %v2246_v16 }
 0xc23   :  { %v2248_v14 = vpop.f32.mrf.mxu0  ;;  %v2304_v33 = vpop.f32.mrf.mxu1 }
 0xc24   :  { %v2374_v51 = vsel %vm281_vm2, %v2366_v35, 0  ;;  %v2305_v8 = vadd.f32 %v4426_v28, %v2304_v33  ;;  %v2249_v52 = vadd.f32 %v4419_v36, %v2248_v14 }
 0xc25   :  { %v5292_v37 = vpop.f32.mrf.mxu0  ;;  %v5300_v38 = vpop.f32.mrf.mxu1  ;;  %5310 = vmatpush3.bf16.xpose.msra.mxu1 %v2374_v51 }
 0xc26   :  { %v2367_v41 = vpack.c.bf16 %v2305_v8, %v2305_v8  ;;  %5321 = vmatprep.subr.bf16.mxu1 %v5441_v0  ;;  %v2365_v39 = vpack.c.bf16 %v2249_v52, %v2249_v52 }
 0xc27   :  { %v2357_v18 = vpop.f32.mrf.mxu0 }
 0xc28   :  { %v2420_v15 = vsel %vm281_vm2, %v2367_v41, 0  ;;  %v2358_v47 = vadd.f32 %v4433_v40, %v2357_v18 }
 0xc29   :  { %v5307_v11 = vpop.f32.mrf.mxu0  ;;  %5316 = vmatpush3.bf16.xpose.msra.mxu0 %v2420_v15 }
 0xc2a   :  { %v6980_v55 = vpack.c.bf16 %v2358_v47, %v2358_v47  ;;  %5327 = vmatprep.subr.bf16.mxu0 %v5441_v0 }
 0xc2b   :  { %v2360_v42 = vpop.f32.mrf.mxu0 }
 0xc2c   :  { %v2494_v56 = vsel %vm416_vm3, %v6980_v55, 0  ;;  %v2361_v22 = vadd.f32 %v4433_v40, %v2360_v42  ;;  %5312 = vmatmul.mubr.msk.bf16.vlgmr.msra.gmra.mxu1 %vm281_vm2, %v2364_v43 }
 0xc2d   :  { %v5308_v2 = vpop.f32.mrf.mxu0  ;;  %5322 = vmatpush3.bf16.msra.mxu1 %v2494_v56  ;;  %5323 = vmatprep.mubr.msk.bf16.mxu1 %vm5442_vm0, %v5441_v0 }
 0xc2e   :  { %v6988_v31 = vpack.c.bf16 %v2361_v22, %v2361_v22  ;;  %5333 = vmatprep.subr.bf16.mxu1 %v5441_v0 }
 0xc30   :  { %v2540_v57 = vsel %vm416_vm3, %v6988_v31, 0  ;;  %5318 = vmatmul.mubr.msk.bf16.vlgmr.msra.gmra.mxu0 %vm281_vm2, %v2365_v39 }
 0xc31   :  { %5328 = vmatpush3.bf16.msra.mxu0 %v2540_v57  ;;  %5329 = vmatprep.mubr.msk.bf16.mxu0 %vm5442_vm0, %v5441_v0 }
 0xc32   :  { %5339 = vmatprep.subr.bf16.mxu0 %v5441_v0 }
 0xcec   :  { %v2410_v58 = vpop.f32.mrf.mxu1 }
 0xced   :  { %v2462_v63 = vmul.f32 0.25, %v2410_v58 }
 0xcee   :  { %v5313_v59 = vpop.f32.mrf.mxu1 }
 0xcef   :  { %v2464_v44 = vadd.f32 %v2462_v63, %v5689_v7 }
 0xcf0   :  { %v2413_v34 = vpop.f32.mrf.mxu1  ;;  %v2456_v60 = vpop.f32.mrf.mxu0 }
 0xcf1   :  { %v2463_v62 = vmul.f32 0.25, %v2456_v60  ;;  %v2466_v3 = vsel %vm388_vm5, %v2464_v44, -inf }
 0xcf2   :  { %2467 = vmax.xlane.f32.xlu1 %v2466_v3  ;;  %v5314_v4 = vpop.f32.mrf.mxu1  ;;  %v5319_v61 = vpop.f32.mrf.mxu0 }
 0xcf3   :  { %v2465_v1 = vadd.f32 %v2463_v62, %v5693_v13 }
 0xcf4   :  { %v2459_v6 = vpop.f32.mrf.mxu0 }
 0xcf5   :  { %v2469_v9 = vsel %vm388_vm5, %v2465_v1, -inf }
 0xcf6   :  { %2470 = vmax.xlane.f32.xlu0 %v2469_v9  ;;  %v5320_v17 = vpop.f32.mrf.mxu0 }
 0xd03   :  { %2586 = vrot.lane.b32.xlu1 %v2366_v35, %s8264_s5 }
 0xd7b   :  { %v2468_v20 = vpop.xlane.xlu1 %2467 }
 0xd7c   :  { %v2472_v23 = vsub.f32 %v2464_v44, %v2468_v20 }
 0xd7e   :  { %v2474_v49 = vmul.f32 1.442695, %v2472_v23 }
 0xd7f   :  { %v2471_v24 = vpop.xlane.xlu0 %2470  ;;  %v2587_v32 = vpop.permute.xlu1 %2586 }
 0xd80   :  { %5413 = vpow2.f32 %v2474_v49  ;;  %v2473_v25 = vsub.f32 %v2465_v1, %v2471_v24  ;;  %v2592_v37 = vsel %vm281_vm2, %v2587_v32, 0 }
 0xd82   :  { %v2476_v28 = vmul.f32 1.442695, %v2473_v25 }
 0xd84   :  { %5415 = vpow2.f32 %v2476_v28 }
 0xd8d   :  { %v5414_v12 = vpop.eup %5413 }
 0xd8e   :  { %v2478_v29 = vsel %vm388_vm5, %v5414_v12, 0.0 }
 0xd8f   :  { %2479 = vadd.xlane.f32.xlu1 %v2478_v29 }
 0xd91   :  { %v5416_v53 = vpop.eup %5415 }
 0xd92   :  { %v2481_v30 = vsel %vm388_vm5, %v5416_v53, 0.0 }
 0xd93   :  { %2482 = vadd.xlane.f32.xlu0 %v2481_v30 }
 0xda0   :  { %2583 = vrot.lane.b32.xlu1 %v2364_v43, %s8264_s5 }
 0xda4   :  { %2635 = vrot.lane.b32.xlu1 %v2365_v39, %s8264_s5 }
 0xda9   :  { %2638 = vrot.lane.b32.xlu0 %v2367_v41, %s8264_s5 }
 0xe18   :  { %v2480_v35 = vpop.xlane.xlu1 %2479 }
 0xe19   :  { %5417 = vrcp.f32 %v2480_v35 }
 0xe1c   :  { %v2483_v36 = vpop.xlane.xlu0 %2482  ;;  %v2584_v18 = vpop.permute.xlu1 %2583 }
 0xe1d   :  { %5419 = vrcp.f32 %v2483_v36 }
 0xe20   :  { %v2639_v40 = vpop.permute.xlu0 %2638  ;;  %v2636_v15 = vpop.permute.xlu1 %2635 }
 0xe21   :  { %v2644_v41 = vsel %vm281_vm2, %v2639_v40, 0  ;;  %v4443_v40 = vld [vmem:[%s8220_s9 + $0x20] sm:$0xff] }
 0xe26   :  { %v5418_v14 = vpop.eup %5417 }
 0xe27   :  { %v2486_v33 = vmul.f32 %v5418_v14, %v5414_v12 }
 0xe29   :  { %v2488_v51 = vpack.c.bf16 %v2486_v33, %v2486_v33 }
 0xe2a   :  { %v5420_v8 = vpop.eup %5419 }
 0xe2b   :  { %5324 = vmatmul.mubr.msk.bf16.vlgmr.msra.gmra.mxu1 %vm388_vm5, %v2488_v51  ;;  %v2487_v38 = vmul.f32 %v5420_v8, %v5416_v53 }
 0xe2c   :  { %5334 = vmatpush3.bf16.xpose.msra.mxu1 %v2592_v37  ;;  %5335 = vmatprep.mubr.msk.bf16.mxu1 %vm5442_vm0, %v5441_v0  ;;  %v4446_v37 = vld [vmem:[%s8220_s9 + $0x38] sm:$0xff] }
 0xe2d   :  { %v2489_v16 = vpack.c.bf16 %v2487_v38, %v2487_v38  ;;  %5345 = vmatprep.subr.bf16.mxu1 %v5441_v0 }
 0xe2f   :  { %5330 = vmatmul.mubr.msk.bf16.vlgmr.msra.gmra.mxu0 %vm388_vm5, %v2489_v16  ;;  %v4444_v16 = vld [vmem:[%s8220_s9 + $0x28] sm:$0xff] }
 0xe30   :  { %5340 = vmatpush3.bf16.xpose.msra.mxu0 %v2644_v41  ;;  %5341 = vmatprep.mubr.msk.bf16.mxu0 %vm5442_vm0, %v5441_v0  ;;  %v2830_v41 = vpack.c.bf16 %v4444_v16, %v4443_v40  ;;  %v4473_v16 = vld [vmem:[%s8222_s13 + $0x298] sm:$0xff] }
 0xe31   :  { %5351 = vmatprep.subr.bf16.mxu0 %v5441_v0 }
 0xe33   :  { %5336 = vmatmul.mubr.msk.bf16.vlgmr.msra.gmra.mxu1 %vm281_vm2, %v2584_v18 }
 0xe34   :  { %5347 = vmatprep.mubr.msk.bf16.mxu1 %vm5442_vm0, %v5441_v0 }
 0xe37   :  { %5342 = vmatmul.mubr.msk.bf16.vlgmr.msra.gmra.mxu0 %vm281_vm2, %v2636_v15 }
 0xe38   :  { %5353 = vmatprep.mubr.msk.bf16.mxu0 %vm5442_vm0, %v5441_v0 }
 0xeeb   :  { %v7023_v47 = vpop.f32.mrf.mxu1 }
 0xeed   :  { %v5325_v11 = vpop.f32.mrf.mxu1 }
 0xeef   :  { %v2533_v43 = vpop.f32.mrf.mxu1  ;;  %v7025_v52 = vpop.f32.mrf.mxu0 }
 0xef1   :  { %v5326_v42 = vpop.f32.mrf.mxu1  ;;  %v5331_v56 = vpop.f32.mrf.mxu0 }
 0xef3   :  { %v2579_v22 = vpop.f32.mrf.mxu0  ;;  %v2628_v2 = vpop.f32.mrf.mxu1 }
 0xef4   :  { %v2686_v39 = vmul.f32 0.25, %v2628_v2 }
 0xef5   :  { %v5332_v57 = vpop.f32.mrf.mxu0  ;;  %v5337_v58 = vpop.f32.mrf.mxu1 }
 0xef6   :  { %v2688_v63 = vadd.f32 %v2686_v39, %v5689_v7 }
 0xef7   :  { %v2631_v59 = vpop.f32.mrf.mxu1  ;;  %v2680_v44 = vpop.f32.mrf.mxu0 }
 0xef8   :  { %v2687_v34 = vmul.f32 0.25, %v2680_v44  ;;  %v2690_v60 = vsel %vm388_vm5, %v2688_v63, -inf }
 0xef9   :  { %2691 = vmax.xlane.f32.xlu1 %v2690_v60  ;;  %v5338_v62 = vpop.f32.mrf.mxu1  ;;  %v5343_v3 = vpop.f32.mrf.mxu0  ;;  %v4448_v60 = vld [vmem:[%s8221_s10 + $0x1] ss:$0 sm:$0xff] }
 0xefa   :  { %v2689_v4 = vadd.f32 %v2687_v34, %v5693_v13 }
 0xefb   :  { %v2683_v61 = vpop.f32.mrf.mxu0 }
 0xefc   :  { %v2693_v1 = vsel %vm388_vm5, %v2689_v4, -inf }
 0xefd   :  { %2694 = vmax.xlane.f32.xlu0 %v2693_v1  ;;  %v5344_v6 = vpop.f32.mrf.mxu0 }
 0xf0a   :  { %2715 = vrot.lane.b32.xlu1 %v6980_v55, %s8264_s5 }
 0xf82   :  { %v2692_v9 = vpop.xlane.xlu1 %2691 }
 0xf83   :  { %v2696_v7 = vsub.f32 %v2688_v63, %v2692_v9 }
 0xf85   :  { %v2698_v17 = vmul.f32 1.442695, %v2696_v7 }
 0xf86   :  { %v2716_v20 = vpop.permute.xlu1 %2715  ;;  %v2695_v23 = vpop.xlane.xlu0 %2694 }
 0xf87   :  { %5421 = vpow2.f32 %v2698_v17  ;;  %v2721_v49 = vsel %vm416_vm3, %v2716_v20, 0  ;;  %v2697_v24 = vsub.f32 %v2689_v4, %v2695_v23 }
 0xf88   :  { %5346 = vmatpush3.bf16.msra.mxu1 %v2721_v49 }
 0xf89   :  { %v2700_v25 = vmul.f32 1.442695, %v2697_v24  ;;  %5357 = vmatprep.subr.bf16.mxu1 %v5441_v0 }
 0xf8b   :  { %5423 = vpow2.f32 %v2700_v25 }
 0xf94   :  { %v5422_v13 = vpop.eup %5421 }
 0xf95   :  { %v2702_v28 = vsel %vm388_vm5, %v5422_v13, 0.0 }
 0xf96   :  { %2703 = vadd.xlane.f32.xlu0 %v2702_v28 }
 0xf98   :  { %v5424_v12 = vpop.eup %5423 }
 0xf99   :  { %v2705_v55 = vsel %vm388_vm5, %v5424_v12, 0.0 }
 0xf9a   :  { %2706 = vadd.xlane.f32.xlu0 %v2705_v55  ;;  %v4503_v55 = vld [vmem:[%s8222_s13 + $0x388] sm:$0xff] }
 0xfb0   :  { %2764 = vrot.lane.b32.xlu0 %v6988_v31, %s8264_s5  ;;  %v4445_v31 = vld [vmem:[%s8220_s9 + $0x30] sm:$0xff] }
 0xfb1   :  { %v2831_v38 = vpack.c.bf16 %v4446_v37, %v4445_v31  ;;  %v4455_v31 = vld [vmem:[%s8222_s13 + $0x208] sm:$0xff] }
 0xfb2   :  { %v4471_v37 = vld [vmem:[%s8222_s13 + $0x288] sm:$0xff] }
 0xfb3   :  { %v3000_v40 = vpack.c.bf16 %v4471_v37, %v4455_v31  ;;  %v4513_v31 = vld [vmem:[%s8222_s13 + $0x3d8] sm:$0xff] }
0x101f   :  { %v2704_v29 = vpop.xlane.xlu0 %2703 }
0x1020   :  { %5425 = vrcp.f32 %v2704_v29  ;;  %v4489_v29 = vld [vmem:[%s8222_s13 + $0x318] sm:$0xff] }
0x1023   :  { %v2707_v53 = vpop.xlane.xlu0 %2706 }
0x1024   :  { %5427 = vrcp.f32 %v2707_v53 }
0x1027   :  { %v2765_v30 = vpop.permute.xlu0 %2764 }
0x1028   :  { %v2770_v32 = vsel %vm416_vm3, %v2765_v30, 0  ;;  %v4505_v30 = vld [vmem:[%s8222_s13 + $0x398] sm:$0xff] }
0x1029   :  { %5352 = vmatpush3.bf16.msra.mxu0 %v2770_v32  ;;  %v4486_v32 = vld [vmem:[%s8222_s13 + $0x300] sm:$0xff] }
0x102d   :  { %v5426_v35 = vpop.eup %5425 }
0x102e   :  { %v2710_v36 = vmul.f32 %v5426_v35, %v5422_v13  ;;  %v4502_v35 = vld [vmem:[%s8222_s13 + $0x380] sm:$0xff] }
0x1030   :  { %v2712_v14 = vpack.c.bf16 %v2710_v36, %v2710_v36  ;;  %v3018_v36 = vpack.c.bf16 %v4505_v30, %v4489_v29  ;;  %v4458_v29 = vld [vmem:[%s8222_s13 + $0x220] sm:$0xff] }
0x1031   :  { %v5428_v33 = vpop.eup %5427 }
0x1032   :  { %5348 = vmatmul.mubr.msk.bf16.vlgmr.msra.gmra.mxu1 %vm388_vm5, %v2712_v14  ;;  %v2711_v51 = vmul.f32 %v5428_v33, %v5424_v12  ;;  %v3015_v14 = vpack.c.bf16 %v4502_v35, %v4486_v32  ;;  %v4488_v33 = vld [vmem:[%s8222_s13 + $0x310] sm:$0xff] }
0x1033   :  { %5361 = vmatprep.mubr.msk.bf16.mxu1 %vm5442_vm0, %v5441_v0  ;;  %5358 = vmatpush3.bf16.msra.mxu1 %v2831_v38  ;;  %v4457_v38 = vld [vmem:[%s8222_s13 + $0x218] sm:$0xff] }
0x1034   :  { %v2713_v8 = vpack.c.bf16 %v2711_v51, %v2711_v51  ;;  %5359 = vmatprep.subr.bf16.mxu1 %v5441_v0  ;;  %v4504_v51 = vld [vmem:[%s8222_s13 + $0x390] sm:$0xff] }
0x1036   :  { %5354 = vmatmul.mubr.msk.bf16.vlgmr.msra.gmra.mxu0 %vm388_vm5, %v2713_v8  ;;  %v3017_v8 = vpack.c.bf16 %v4504_v51, %v4488_v33  ;;  %v4495_v33 = vld [vmem:[%s8222_s13 + $0x348] sm:$0xff] }
0x1037   :  { %3148 = vmatprep.mubr.bf16.mxu0 %v5446_v46  ;;  %5360 = vmatpush3.bf16.msra.mxu1 %v2830_v41  ;;  %v4454_v41 = vld [vmem:[%s8222_s13 + $0x200] sm:$0xff]  ;;  %v4511_v51 = vld [vmem:[%s8222_s13 + $0x3c8] sm:$0xff] }
0x1038   :  { %3171 = vmatprep.subr.bf16.mxu1 %v3018_v36  ;;  %v4460_v36 = vld [vmem:[%s8222_s13 + $0x230] sm:$0xff] }
0x10f2   :  { %v2757_v18 = vpop.f32.mrf.mxu1 }
0x10f4   :  { %v5349_v15 = vpop.f32.mrf.mxu1 }
0x10f5   :  { %v3002_v15 = vpack.c.bf16 %v4473_v16, %v4457_v38  ;;  %v4510_v16 = vld [vmem:[%s8222_s13 + $0x3c0] sm:$0xff] }
0x10f6   :  { %v2760_v11 = vpop.f32.mrf.mxu1  ;;  %v2806_v43 = vpop.f32.mrf.mxu0 }
0x10f7   :  { %v5384_v42 = vpack.i.bf16 %v2806_v43, %v2757_v18  ;;  %v4470_v18 = vld [vmem:[%s8222_s13 + $0x280] sm:$0xff]  ;;  %v4456_v43 = vld [vmem:[%s8222_s13 + $0x210] sm:$0xff] }
0x10f8   :  { %v5350_v56 = vpop.f32.mrf.mxu1  ;;  %v5355_v22 = vpop.f32.mrf.mxu0  ;;  %v2999_v11 = vpack.c.bf16 %v4470_v18, %v4454_v41  ;;  %v3024_v41 = vpack.c.bf16 %v4511_v51, %v4495_v33  ;;  %v4591_v33 = vld [vmem:[%s8225_s15 + $0x9f8] sm:$0xff] }
0x10f9   :  { %5385 = vrot.lane.b32.xlu1 %v5384_v42, %s8265_s30  ;;  %v4472_v42 = vld [vmem:[%s8222_s13 + $0x290] sm:$0xff]  ;;  %v4491_v22 = vld [vmem:[%s8222_s13 + $0x328] sm:$0xff] }
0x10fa   :  { %v2809_v2 = vpop.f32.mrf.mxu0  ;;  %v3001_v56 = vpack.c.bf16 %v4472_v42, %v4456_v43  ;;  %v4463_v43 = vld [vmem:[%s8222_s13 + $0x248] sm:$0xff] }
0x10fb   :  { %v4507_v2 = vld [vmem:[%s8222_s13 + $0x3a8] sm:$0xff] }
0x10fc   :  { %v5356_v39 = vpop.f32.mrf.mxu0  ;;  %v4479_v42 = vld [vmem:[%s8222_s13 + $0x2c8] sm:$0xff] }
0x10fd   :  { %v4493_v39 = vld [vmem:[%s8222_s13 + $0x338] sm:$0xff] }
0x116b   :  { %v5386_v57 = vpop.permute.xlu1 %5385 }
0x116c   :  { %v5388_v58 = vunpack.i.h.bf16 %v5386_v57  ;;  %v5387_v63 = vunpack.i.l.bf16 %v5386_v57  ;;  %v3020_v57 = vpack.c.bf16 %v4507_v2, %v4491_v22  ;;  %v4481_v22 = vld [vmem:[%s8222_s13 + $0x2d8] sm:$0xff] }
0x116e   :  { %v2821_v59 = vsel %vm281_vm2, %v7025_v52, %v5388_v58  ;;  %v2820_v44 = vsel %vm281_vm2, %v7023_v47, %v5387_v63  ;;  %v4509_v58 = vld [vmem:[%s8222_s13 + $0x3b8] sm:$0xff] }
0x116f   :  { %v2829_v34 = vpack.c.bf16 %v2821_v59, %v2820_v44  ;;  %v3022_v63 = vpack.c.bf16 %v4509_v58, %v4493_v39  ;;  %v4478_v58 = vld [vmem:[%s8222_s13 + $0x2c0] sm:$0xff] }
0x1171   :  { %5362 = vmatmul.mubr.msk.bf16.vlgmr.msra.gmra.mxu1 %vm122_vm1, %v2829_v34 }
0x1172   :  { %3191 = vmatprep.mubr.bf16.mxu1 %v5446_v46  ;;  %3172 = vmatpush1.bf16.msra.mxu1 %v3017_v8  ;;  %v4497_v8 = vld [vmem:[%s8222_s13 + $0x358] sm:$0xff] }
0x1173   :  { %3173 = vmatprep.subr.bf16.mxu1 %v3002_v15  ;;  %v3026_v18 = vpack.c.bf16 %v4513_v31, %v4497_v8  ;;  %v4496_v15 = vld [vmem:[%s8222_s13 + $0x350] sm:$0xff] }
0x1174   :  { %v4542_v31 = vld [vmem:[%s8225_s15 + $0x870] sm:$0xff] }
0x1176   :  { %3174 = vmatpush1.bf16.msra.mxu1 %v3001_v56  ;;  %v4465_v56 = vld [vmem:[%s8222_s13 + $0x258] sm:$0xff] }
0x1177   :  { %3257 = vmatprep.subr.bf16.mxu1 %v3022_v63  ;;  %v3008_v63 = vpack.c.bf16 %v4479_v42, %v4463_v43  ;;  %v4589_v43 = vld [vmem:[%s8225_s15 + $0x9e8] sm:$0xff] }
0x1231   :  { %v2875_v62 = vpop.f32.mrf.mxu1 }
0x1232   :  { %v2876_v3 = vadd.f32 %v4448_v60, %v2875_v62 }
0x1233   :  { %v5363_v4 = vpop.f32.mrf.mxu1 }
0x1234   :  { %v2882_v61 = vadd.f32 %v2876_v3, %v6945_v19 }
0x1235   :  { %v2878_v1 = vpop.f32.mrf.mxu1 }
0x1236   :  { %v2879_v6 = vadd.f32 %v4448_v60, %v2878_v1  ;;  %v2888_v52 = vsel %vm122_vm1, %v2882_v61, 0.0  ;;  %v4452_v1 = vld [vmem:[%s8223_s11 + $0x1] ss:$0 sm:$0xff] }
0x1237   :  { %2889 = vadd.xlane.f32.xlu1 %v2888_v52  ;;  %v5364_v47 = vpop.f32.mrf.mxu1 }
0x1238   :  { %v2883_v9 = vadd.f32 %v2879_v6, %v6947_v21  ;;  %v4487_v21 = vld [vmem:[%s8222_s13 + $0x308] sm:$0xff] }
0x1239   :  { %v3016_v53 = vpack.c.bf16 %v4503_v55, %v4487_v21 }
0x123a   :  { %v2891_v7 = vsel %vm122_vm1, %v2883_v9, 0.0 }
0x123b   :  { %2892 = vadd.xlane.f32.xlu0 %v2891_v7  ;;  %3128 = vmatprep.subr.bf16.mxu0 %v3016_v53  ;;  %v4490_v7 = vld [vmem:[%s8222_s13 + $0x320] sm:$0xff] }
0x123c   :  { %3129 = vmatpush1.bf16.msra.mxu0 %v3015_v14  ;;  %v4474_v53 = vld [vmem:[%s8222_s13 + $0x2a0] sm:$0xff]  ;;  %v4476_v14 = vld [vmem:[%s8222_s13 + $0x2b0] sm:$0xff] }
0x123d   :  { %3130 = vmatprep.subr.bf16.mxu0 %v3000_v40  ;;  %v3003_v37 = vpack.c.bf16 %v4474_v53, %v4458_v29  ;;  %v3005_v38 = vpack.c.bf16 %v4476_v14, %v4460_v36  ;;  %v4494_v40 = vld [vmem:[%s8222_s13 + $0x340] sm:$0xff]  ;;  %v4468_v53 = vld [vmem:[%s8222_s13 + $0x270] sm:$0xff]  ;;  %v4559_v36 = vld [vmem:[%s8225_s15 + $0x8f8] sm:$0xff] }
0x123e   :  { %v3023_v2 = vpack.c.bf16 %v4510_v16, %v4494_v40  ;;  %v4590_v14 = vld [vmem:[%s8225_s15 + $0x9f0] sm:$0xff] }
0x123f   :  { %v3798_v40 = vpack.c.bf16 %v4591_v33, %v4590_v14  ;;  %v4574_v16 = vld [vmem:[%s8225_s15 + $0x970] sm:$0xff] }
0x1240   :  { %3131 = vmatpush1.bf16.msra.mxu0 %v2999_v11  ;;  %v4512_v11 = vld [vmem:[%s8222_s13 + $0x3d0] sm:$0xff] }
0x1241   :  { %3214 = vmatprep.subr.bf16.mxu0 %v3020_v57  ;;  %v3025_v39 = vpack.c.bf16 %v4512_v11, %v4496_v15  ;;  %v4462_v57 = vld [vmem:[%s8222_s13 + $0x240] sm:$0xff]  ;;  %v4557_v15 = vld [vmem:[%s8225_s15 + $0x8e8] sm:$0xff] }
0x1242   :  { %v4588_v11 = vld [vmem:[%s8225_s15 + $0x9e0] sm:$0xff] }
0x12c0   :  { %v2890_v17 = vpop.xlane.xlu1 %2889 }
0x12c1   :  { %v2894_v20 = vmul.f32 0.03125, %v2890_v17  ;;  %v4506_v17 = vld [vmem:[%s8222_s13 + $0x3a0] sm:$0xff] }
0x12c2   :  { %v3019_v21 = vpack.c.bf16 %v4506_v17, %v4490_v7  ;;  %v4500_v7 = vld [vmem:[%s8222_s13 + $0x370] sm:$0xff] }
0x12c3   :  { %v2896_v23 = vsub.f32 %v2882_v61, %v2894_v20  ;;  %v4516_v17 = vld [vmem:[%s8222_s13 + $0x3f0] sm:$0xff] }
0x12c4   :  { %v2893_v49 = vpop.xlane.xlu0 %2892 }
0x12c5   :  { %v2895_v24 = vmul.f32 0.03125, %v2893_v49  ;;  %v2898_v25 = vmul.f32 %v2896_v23, %v2896_v23  ;;  %v4508_v49 = vld [vmem:[%s8222_s13 + $0x3b0] sm:$0xff] }
0x12c7   :  { %v2897_v13 = vsub.f32 %v2883_v9, %v2895_v24  ;;  %v2900_v19 = vsel %vm122_vm1, %v2898_v25, 0.0  ;;  %v4453_v9 = vld [vmem:[%s8224_s12 + $0x1] ss:$0 sm:$0xff]  ;;  %v4459_v24 = vld [vmem:[%s8222_s13 + $0x228] sm:$0xff] }
0x12c8   :  { %2901 = vadd.xlane.f32.xlu0 %v2900_v19  ;;  %v4475_v25 = vld [vmem:[%s8222_s13 + $0x2a8] sm:$0xff]  ;;  %v4477_v19 = vld [vmem:[%s8222_s13 + $0x2b8] sm:$0xff] }
0x12c9   :  { %v2899_v28 = vmul.f32 %v2897_v13, %v2897_v13  ;;  %v3004_v32 = vpack.c.bf16 %v4475_v25, %v4459_v24  ;;  %v4485_v24 = vld [vmem:[%s8222_s13 + $0x2f8] sm:$0xff] }
0x12cb   :  { %v2903_v12 = vsel %vm122_vm1, %v2899_v28, 0.0 }
0x12cc   :  { %2904 = vadd.xlane.f32.xlu1 %v2903_v12 }
0x1351   :  { %v2902_v59 = vpop.xlane.xlu0 %2901 }
0x1352   :  { %v2906_v44 = vmul.f32 0.03125, %v2902_v59  ;;  %v3010_v59 = vpack.c.bf16 %v4481_v22, %v4465_v56  ;;  %v4541_v22 = vld [vmem:[%s8225_s15 + $0x868] sm:$0xff] }
0x1354   :  { %v2908_v34 = vadd.f32 1e-05, %v2906_v44  ;;  %v4464_v44 = vld [vmem:[%s8222_s13 + $0x250] sm:$0xff] }
0x1355   :  { %v2905_v60 = vpop.xlane.xlu1 %2904 }
0x1356   :  { %5429 = vrsqrt.f32 %v2908_v34  ;;  %v2907_v62 = vmul.f32 0.03125, %v2905_v60  ;;  %v4480_v34 = vld [vmem:[%s8222_s13 + $0x2d0] sm:$0xff]  ;;  %v4499_v60 = vld [vmem:[%s8222_s13 + $0x368] sm:$0xff] }
0x1358   :  { %v2909_v3 = vadd.f32 1e-05, %v2907_v62  ;;  %v4515_v62 = vld [vmem:[%s8222_s13 + $0x3e8] sm:$0xff] }
0x135a   :  { %5431 = vrsqrt.f32 %v2909_v3  ;;  %v4501_v3 = vld [vmem:[%s8222_s13 + $0x378] sm:$0xff] }
0x1363   :  { %v5430_v4 = vpop.eup %5429 }
0x1364   :  { %v2912_v61 = vmul.f32 %v5430_v4, %v2896_v23  ;;  %v4492_v23 = vld [vmem:[%s8222_s13 + $0x330] sm:$0xff]  ;;  %v4517_v4 = vld [vmem:[%s8222_s13 + $0x3f8] sm:$0xff] }
0x1365   :  { %v3021_v55 = vpack.c.bf16 %v4508_v49, %v4492_v23  ;;  %v4483_v23 = vld [vmem:[%s8222_s13 + $0x2e8] sm:$0xff]  ;;  %v4469_v49 = vld [vmem:[%s8222_s13 + $0x278] sm:$0xff] }
0x1366   :  { %v2920_v52 = vmul.f32 %v4452_v1, %v2912_v61  ;;  %v3007_v61 = vpack.c.bf16 %v4478_v58, %v4462_v57  ;;  %v3014_v29 = vpack.c.bf16 %v4485_v24, %v4469_v49  ;;  %v4572_v57 = vld [vmem:[%s8225_s15 + $0x960] sm:$0xff]  ;;  %v4573_v58 = vld [vmem:[%s8225_s15 + $0x968] sm:$0xff] }
0x1367   :  { %v5432_v6 = vpop.eup %5431  ;;  %v4537_v49 = vld [vmem:[%s8225_s15 + $0x848] sm:$0xff] }
0x1368   :  { %v2913_v47 = vmul.f32 %v5432_v6, %v2897_v13  ;;  %v4461_v13 = vld [vmem:[%s8222_s13 + $0x238] sm:$0xff]  ;;  %v7164_v28 = vadd.f32 %v4453_v9, %v2920_v52  ;;  %v4498_v6 = vld [vmem:[%s8222_s13 + $0x360] sm:$0xff] }
0x1369   :  { %v3006_v35 = vpack.c.bf16 %v4477_v19, %v4461_v13  ;;  %v4514_v52 = vld [vmem:[%s8222_s13 + $0x3e0] sm:$0xff]  ;;  %v3029_v13 = vpack.c.bf16 %v4516_v17, %v4500_v7  ;;  %v4585_v7 = vld [vmem:[%s8225_s15 + $0x9c8] sm:$0xff] }
0x136a   :  { %v2921_v20 = vmul.f32 %v4452_v1, %v2913_v47  ;;  %v3009_v1 = vpack.c.bf16 %v4480_v34, %v4464_v44  ;;  %v3028_v47 = vpack.c.bf16 %v4515_v62, %v4499_v60  ;;  %v3027_v25 = vpack.c.bf16 %v4514_v52, %v4498_v6  ;;  %v4466_v19 = vld [vmem:[%s8222_s13 + $0x260] sm:$0xff]  ;;  %v4586_v44 = vld [vmem:[%s8225_s15 + $0x9d0] sm:$0xff]  ;;  %v4587_v34 = vld [vmem:[%s8225_s15 + $0x9d8] sm:$0xff] }
0x136b   :  { %v3789_v62 = vpack.c.bf16 %v4573_v58, %v4572_v57  ;;  %v4571_v6 = vld [vmem:[%s8225_s15 + $0x958] sm:$0xff]  ;;  %v4552_v52 = vld [vmem:[%s8225_s15 + $0x8c0] sm:$0xff]  ;;  %v4578_v58 = vld [vmem:[%s8225_s15 + $0x990] sm:$0xff] }
0x136c   :  { %v7166_v12 = vadd.f32 %v4453_v9, %v2921_v20  ;;  %v3030_v9 = vpack.c.bf16 %v4517_v4, %v4501_v3  ;;  %v4467_v20 = vld [vmem:[%s8222_s13 + $0x268] sm:$0xff]  ;;  %v4538_v3 = vld [vmem:[%s8225_s15 + $0x850] sm:$0xff]  ;;  %v4539_v4 = vld [vmem:[%s8225_s15 + $0x858] sm:$0xff] }
0x136d   :  { %v3772_v17 = vpack.c.bf16 %v4539_v4, %v4538_v3  ;;  %v4547_v57 = vld [vmem:[%s8225_s15 + $0x898] sm:$0xff]  ;;  %v4562_v3 = vld [vmem:[%s8225_s15 + $0x910] sm:$0xff] }
0x136e   :  { %v7176_v30 = vpack.c.bf16 %v7166_v12, %v7164_v28  ;;  %v4563_v4 = vld [vmem:[%s8225_s15 + $0x918] sm:$0xff] }
0x1370   :  { %4520 = vmatmul.mubr.msk.bf16.vlgmr.msra.gmra.mxu0 %vm122_vm1, %v7176_v30  ;;  %4521 = vmatmul.mubr.msk.bf16.vlgmr.msra.gmra.mxu1 %vm122_vm1, %v7176_v30 }
0x1371   :  { %3215 = vmatpush1.bf16.msra.mxu0 %v3019_v21  ;;  %3258 = vmatpush1.bf16.msra.mxu1 %v3021_v55  ;;  %v4482_v21 = vld [vmem:[%s8222_s13 + $0x2e0] sm:$0xff]  ;;  %v3012_v55 = vpack.c.bf16 %v4483_v23, %v4467_v20 }
0x1372   :  { %3216 = vmatprep.subr.bf16.mxu0 %v3004_v32  ;;  %3259 = vmatprep.subr.bf16.mxu1 %v3006_v35  ;;  %v4484_v32 = vld [vmem:[%s8222_s13 + $0x2f0] sm:$0xff]  ;;  %v3011_v51 = vpack.c.bf16 %v4482_v21, %v4466_v19  ;;  %v4536_v23 = vld [vmem:[%s8225_s15 + $0x840] sm:$0xff]  ;;  %v4569_v19 = vld [vmem:[%s8225_s15 + $0x948] sm:$0xff] }
0x1373   :  { %3234 = vmatprep.mubr.bf16.mxu0 %v5446_v46  ;;  %3277 = vmatprep.mubr.bf16.mxu1 %v5446_v46  ;;  %v4558_v35 = vld [vmem:[%s8225_s15 + $0x8f0] sm:$0xff]  ;;  %v3013_v8 = vpack.c.bf16 %v4484_v32, %v4468_v53  ;;  %v4583_v53 = vld [vmem:[%s8225_s15 + $0x9b8] sm:$0xff]  ;;  %v3771_v32 = vpack.c.bf16 %v4537_v49, %v4536_v23  ;;  %v4560_v23 = vld [vmem:[%s8225_s15 + $0x900] sm:$0xff] }
0x1374   :  { %v4550_v21 = vld [vmem:[%s8225_s15 + $0x8b0] sm:$0xff]  ;;  %v4561_v49 = vld [vmem:[%s8225_s15 + $0x908] sm:$0xff] }
0x1375   :  { %3217 = vmatpush1.bf16.msra.mxu0 %v3003_v37  ;;  %3260 = vmatpush1.bf16.msra.mxu1 %v3005_v38  ;;  %v4543_v37 = vld [vmem:[%s8225_s15 + $0x878] sm:$0xff]  ;;  %v3782_v38 = vpack.c.bf16 %v4559_v36, %v4558_v35  ;;  %v4534_v36 = vld [vmem:[%s8225_s15 + $0x830] sm:$0xff] }
0x1376   :  { %3300 = vmatprep.subr.bf16.mxu0 %v3024_v41  ;;  %3343 = vmatprep.subr.bf16.mxu1 %v3026_v18  ;;  %v4575_v41 = vld [vmem:[%s8225_s15 + $0x978] sm:$0xff]  ;;  %v4556_v18 = vld [vmem:[%s8225_s15 + $0x8e0] sm:$0xff]  ;;  %v3774_v42 = vpack.c.bf16 %v4543_v37, %v4542_v31 }
0x1377   :  { %v3790_v56 = vpack.c.bf16 %v4575_v41, %v4574_v16  ;;  %v4567_v31 = vld [vmem:[%s8225_s15 + $0x938] sm:$0xff]  ;;  %v4549_v16 = vld [vmem:[%s8225_s15 + $0x8a8] sm:$0xff]  ;;  %v4580_v41 = vld [vmem:[%s8225_s15 + $0x9a0] sm:$0xff] }
0x1378   :  { %4522 = vmatmul.mubr.msk.bf16.vlgmr.msra.gmra.mxu0 %vm122_vm1, %v7176_v30  ;;  %4523 = vmatmul.mubr.msk.bf16.vlgmr.msra.gmra.mxu1 %vm122_vm1, %v7176_v30 }
0x1379   :  { %3301 = vmatpush1.bf16.msra.mxu0 %v3023_v2  ;;  %3344 = vmatpush1.bf16.msra.mxu1 %v3025_v39  ;;  %v3781_v2 = vpack.c.bf16 %v4557_v15, %v4556_v18  ;;  %v3797_v39 = vpack.c.bf16 %v4589_v43, %v4588_v11  ;;  %v4581_v15 = vld [vmem:[%s8225_s15 + $0x9a8] sm:$0xff]  ;;  %v4532_v11 = vld [vmem:[%s8225_s15 + $0x820] sm:$0xff] }
0x137a   :  { %3302 = vmatprep.subr.bf16.mxu0 %v3008_v63  ;;  %3345 = vmatprep.subr.bf16.mxu1 %v3010_v59  ;;  %v4554_v63 = vld [vmem:[%s8225_s15 + $0x8d0] sm:$0xff]  ;;  %v4555_v59 = vld [vmem:[%s8225_s15 + $0x8d8] sm:$0xff]  ;;  %v4533_v43 = vld [vmem:[%s8225_s15 + $0x828] sm:$0xff] }
0x137b   :  { %3320 = vmatprep.mubr.bf16.mxu0 %v5446_v46  ;;  %3363 = vmatprep.mubr.bf16.mxu1 %v5446_v46 }
0x137d   :  { %3303 = vmatpush1.bf16.msra.mxu0 %v3007_v61  ;;  %3346 = vmatpush1.bf16.msra.mxu1 %v3009_v1  ;;  %v3780_v61 = vpack.c.bf16 %v4555_v59, %v4554_v63  ;;  %v3796_v1 = vpack.c.bf16 %v4587_v34, %v4586_v44  ;;  %v4579_v59 = vld [vmem:[%s8225_s15 + $0x998] sm:$0xff]  ;;  %v4530_v44 = vld [vmem:[%s8225_s15 + $0x810] sm:$0xff] }
0x137e   :  { %3386 = vmatprep.subr.bf16.mxu0 %v3028_v47  ;;  %3429 = vmatprep.subr.bf16.mxu1 %v3030_v9  ;;  %v4553_v47 = vld [vmem:[%s8225_s15 + $0x8c8] sm:$0xff]  ;;  %v4584_v9 = vld [vmem:[%s8225_s15 + $0x9c0] sm:$0xff]  ;;  %v4531_v34 = vld [vmem:[%s8225_s15 + $0x818] sm:$0xff] }
0x137f   :  { %v3779_v24 = vpack.c.bf16 %v4553_v47, %v4552_v52  ;;  %v4577_v47 = vld [vmem:[%s8225_s15 + $0x988] sm:$0xff] }
0x1380   :  { %4524 = vmatmul.mubr.msk.bf16.vlgmr.msra.gmra.mxu0 %vm122_vm1, %v7176_v30  ;;  %4525 = vmatmul.mubr.msk.bf16.vlgmr.msra.gmra.mxu1 %vm122_vm1, %v7176_v30 }
0x1381   :  { %3387 = vmatpush1.bf16.msra.mxu0 %v3027_v25  ;;  %3430 = vmatpush1.bf16.msra.mxu1 %v3029_v13  ;;  %v3795_v25 = vpack.c.bf16 %v4585_v7, %v4584_v9  ;;  %v4568_v13 = vld [vmem:[%s8225_s15 + $0x940] sm:$0xff]  ;;  %v4529_v7 = vld [vmem:[%s8225_s15 + $0x808] sm:$0xff] }
0x1382   :  { %3388 = vmatprep.subr.bf16.mxu0 %v3012_v55  ;;  %3431 = vmatprep.subr.bf16.mxu1 %v3014_v29  ;;  %v4551_v55 = vld [vmem:[%s8225_s15 + $0x8b8] sm:$0xff]  ;;  %v4582_v29 = vld [vmem:[%s8225_s15 + $0x9b0] sm:$0xff]  ;;  %v3787_v35 = vpack.c.bf16 %v4569_v19, %v4568_v13  ;;  %v4528_v9 = vld [vmem:[%s8225_s15 + $0x800] sm:$0xff] }
0x1383   :  { %3406 = vmatprep.mubr.bf16.mxu0 %v5446_v46  ;;  %3449 = vmatprep.mubr.bf16.mxu1 %v5446_v46  ;;  %v4540_v46 = vld [vmem:[%s8225_s15 + $0x860] sm:$0xff]  ;;  %v3778_v14 = vpack.c.bf16 %v4551_v55, %v4550_v21  ;;  %v3794_v33 = vpack.c.bf16 %v4583_v53, %v4582_v29  ;;  %v4623_v13 = vld [vmem:[%s8225_s15 + $0xaf8] sm:$0xff]  ;;  %v4654_v19 = vld [vmem:[%s8225_s15 + $0xbf0] sm:$0xff] }
0x1384   :  { %v3773_v60 = vpack.c.bf16 %v4541_v22, %v4540_v46  ;;  %v4564_v46 = vld [vmem:[%s8225_s15 + $0x920] sm:$0xff]  ;;  %v4565_v22 = vld [vmem:[%s8225_s15 + $0x928] sm:$0xff]  ;;  %v4655_v55 = vld [vmem:[%s8225_s15 + $0xbf8] sm:$0xff] }
0x1385   :  { %3389 = vmatpush1.bf16.msra.mxu0 %v3011_v51  ;;  %3432 = vmatpush1.bf16.msra.mxu1 %v3013_v8  ;;  %v4535_v51 = vld [vmem:[%s8225_s15 + $0x838] sm:$0xff]  ;;  %v4566_v8 = vld [vmem:[%s8225_s15 + $0x930] sm:$0xff]  ;;  %v3830_v29 = vpack.c.bf16 %v4655_v55, %v4654_v19 }
0x1386   :  { %5026 = vmatprep.subr.bf16.mxu0 %v3782_v38  ;;  %5048 = vmatprep.subr.bf16.mxu1 %v3798_v40  ;;  %v3770_v37 = vpack.c.bf16 %v4535_v51, %v4534_v36  ;;  %v3786_v38 = vpack.c.bf16 %v4567_v31, %v4566_v8  ;;  %v4548_v40 = vld [vmem:[%s8225_s15 + $0x8a0] sm:$0xff]  ;;  %v7509_v53 = vld [vmem:[%s8226_s14 + $0x10] sm:$0xff] }
0x1387   :  { %v3777_v18 = vpack.c.bf16 %v4549_v16, %v4548_v40  ;;  %v3040_v36 = vrot.slane %v7509_v53, %v6216_v54  ;;  %v3044_v51 = vrot.slane %v7509_v53, %v6222_v10 }
0x1388   :  { %4526 = vmatmul.mubr.msk.bf16.vlgmr.msra.gmra.mxu0 %vm122_vm1, %v7176_v30  ;;  %4527 = vmatmul.mubr.msk.bf16.vlgmr.msra.gmra.mxu1 %vm122_vm1, %v7176_v30  ;;  %v4570_v30 = vld [vmem:[%s8225_s15 + $0x950] sm:$0xff] }
0x1389   :  { %5027 = vmatpush3.bf16.msra.mxu0 %v3774_v42  ;;  %5049 = vmatpush3.bf16.msra.mxu1 %v3790_v56  ;;  %v3788_v20 = vpack.c.bf16 %v4571_v6, %v4570_v30  ;;  %v3793_v42 = vpack.c.bf16 %v4581_v15, %v4580_v41  ;;  %v3769_v56 = vpack.c.bf16 %v4533_v43, %v4532_v11  ;;  %v4545_v30 = vld [vmem:[%s8225_s15 + $0x888] sm:$0xff]  ;;  %v4576_v6 = vld [vmem:[%s8225_s15 + $0x980] sm:$0xff] }
0x138a   :  { %5028 = vmatprep.subr.bf16.mxu0 %v3781_v2  ;;  %5050 = vmatprep.subr.bf16.mxu1 %v3797_v39  ;;  %v3785_v2 = vpack.c.bf16 %v4565_v22, %v4564_v46  ;;  %v4546_v39 = vld [vmem:[%s8225_s15 + $0x890] sm:$0xff] }
0x138b   :  { %v3776_v63 = vpack.c.bf16 %v4547_v57, %v4546_v39  ;;  %v4606_v22 = vld [vmem:[%s8225_s15 + $0xa70] sm:$0xff] }
0x138c   :  { %v4638_v39 = vld [vmem:[%s8225_s15 + $0xb70] sm:$0xff] }
0x138d   :  { %5029 = vmatpush3.bf16.msra.mxu0 %v3773_v60  ;;  %5051 = vmatpush3.bf16.msra.mxu1 %v3789_v62  ;;  %v3792_v60 = vpack.c.bf16 %v4579_v59, %v4578_v58  ;;  %v3768_v62 = vpack.c.bf16 %v4531_v34, %v4530_v44  ;;  %v3056_v44 = vrot.slane %v7509_v53, %v6238_v26 }
0x138e   :  { %5030 = vmatprep.subr.bf16.mxu0 %v3780_v61  ;;  %5052 = vmatprep.subr.bf16.mxu1 %v3796_v1  ;;  %v3784_v61 = vpack.c.bf16 %v4563_v4, %v4562_v3  ;;  %v4544_v1 = vld [vmem:[%s8225_s15 + $0x880] sm:$0xff]  ;;  %v3064_v34 = vrot.slane %v7509_v53, %v6241_v27  ;;  %v4621_v3 = vld [vmem:[%s8225_s15 + $0xae8] sm:$0xff] }
0x138f   :  { %v3775_v52 = vpack.c.bf16 %v4545_v30, %v4544_v1 }
0x1391   :  { %5031 = vmatpush3.bf16.msra.mxu0 %v3772_v17  ;;  %5053 = vmatpush3.bf16.msra.mxu1 %v3788_v20  ;;  %v3791_v17 = vpack.c.bf16 %v4577_v47, %v4576_v6  ;;  %v3767_v20 = vpack.c.bf16 %v4529_v7, %v4528_v9  ;;  %v4652_v6 = vld [vmem:[%s8225_s15 + $0xbe0] sm:$0xff] }
0x1392   :  { %5032 = vmatprep.subr.bf16.mxu0 %v3779_v24  ;;  %5054 = vmatprep.subr.bf16.mxu1 %v3795_v25  ;;  %v3783_v24 = vpack.c.bf16 %v4561_v49, %v4560_v23  ;;  %v4622_v25 = vld [vmem:[%s8225_s15 + $0xaf0] sm:$0xff] }
0x1393   :  { %v3814_v21 = vpack.c.bf16 %v4623_v13, %v4622_v25  ;;  %v4604_v25 = vld [vmem:[%s8225_s15 + $0xa60] sm:$0xff]  ;;  %v4605_v13 = vld [vmem:[%s8225_s15 + $0xa68] sm:$0xff] }
0x1395   :  { %5033 = vmatpush3.bf16.msra.mxu0 %v3771_v32  ;;  %5055 = vmatpush3.bf16.msra.mxu1 %v3787_v35 }
0x1396   :  { %5034 = vmatprep.subr.bf16.mxu0 %v3778_v14  ;;  %5056 = vmatprep.subr.bf16.mxu1 %v3794_v33  ;;  %v3048_v14 = vrot.slane %v7509_v53, %v6219_v50  ;;  %v3036_v33 = vrot.slane %v7509_v53, %v5686_v5 }
0x1399   :  { %5035 = vmatpush3.bf16.msra.mxu0 %v3770_v37  ;;  %5057 = vmatpush3.bf16.msra.mxu1 %v3786_v38 }
0x139a   :  { %5036 = vmatprep.subr.bf16.mxu0 %v3777_v18  ;;  %5058 = vmatprep.subr.bf16.mxu1 %v3793_v42 }
0x139d   :  { %5037 = vmatpush3.bf16.msra.mxu0 %v3769_v56  ;;  %5059 = vmatpush3.bf16.msra.mxu1 %v3785_v2  ;;  %v4607_v2 = vld [vmem:[%s8225_s15 + $0xa78] sm:$0xff] }
0x139e   :  { %5038 = vmatprep.subr.bf16.mxu0 %v3776_v63  ;;  %5060 = vmatprep.subr.bf16.mxu1 %v3792_v60  ;;  %v4639_v60 = vld [vmem:[%s8225_s15 + $0xb78] sm:$0xff]  ;;  %v3806_v49 = vpack.c.bf16 %v4607_v2, %v4606_v22  ;;  %v4634_v22 = vld [vmem:[%s8225_s15 + $0xb50] sm:$0xff] }
0x139f   :  { %v4635_v2 = vld [vmem:[%s8225_s15 + $0xb58] sm:$0xff] }
0x13a1   :  { %5039 = vmatpush3.bf16.msra.mxu0 %v3768_v62  ;;  %5061 = vmatpush3.bf16.msra.mxu1 %v3784_v61  ;;  %v4620_v62 = vld [vmem:[%s8225_s15 + $0xae0] sm:$0xff] }
0x13a2   :  { %5040 = vmatprep.subr.bf16.mxu0 %v3775_v52  ;;  %5062 = vmatprep.subr.bf16.mxu1 %v3791_v17  ;;  %v4653_v52 = vld [vmem:[%s8225_s15 + $0xbe8] sm:$0xff] }
0x13a5   :  { %5041 = vmatpush3.bf16.msra.mxu0 %v3767_v20  ;;  %5063 = vmatpush3.bf16.msra.mxu1 %v3783_v24  ;;  %v3822_v24 = vpack.c.bf16 %v4639_v60, %v4638_v39  ;;  %v4617_v60 = vld [vmem:[%s8225_s15 + $0xac8] sm:$0xff] }
0x13a6   :  { %5070 = vmatprep.subr.bf16.mxu0 %v3814_v21  ;;  %5092 = vmatprep.subr.bf16.mxu1 %v3830_v29 }
0x1430   :  { %v3150_v32 = vpop.f32.mrf.mxu0  ;;  %v3193_v35 = vpop.f32.mrf.mxu1 }
0x1431   :  { %v3151_v15 = vadd.f32 %v3150_v32, %v3036_v33  ;;  %v3194_v11 = vadd.f32 %v3193_v35, %v3044_v51  ;;  %v3813_v32 = vpack.c.bf16 %v4621_v3, %v4620_v62  ;;  %v3829_v35 = vpack.c.bf16 %v4653_v52, %v4652_v6  ;;  %v4648_v62 = vld [vmem:[%s8225_s15 + $0xbc0] sm:$0xff]  ;;  %v4649_v3 = vld [vmem:[%s8225_s15 + $0xbc8] sm:$0xff] }
0x1432   :  { %v3152_v8 = vpop.f32.mrf.mxu0  ;;  %v3195_v31 = vpop.f32.mrf.mxu1  ;;  %v4600_v52 = vld [vmem:[%s8225_s15 + $0xa40] sm:$0xff] }
0x1433   :  { %v3153_v40 = vadd.f32 %v3152_v8, %v3040_v36  ;;  %v3196_v16 = vadd.f32 %v3195_v31, %v3048_v14  ;;  %v3460_v47 = vmax.f32 %v3151_v15, 0.0  ;;  %v3462_v9 = vmax.f32 %v3194_v11, 0.0  ;;  %v4619_v31 = vld [vmem:[%s8225_s15 + $0xad8] sm:$0xff]  ;;  %v4602_v11 = vld [vmem:[%s8225_s15 + $0xa50] sm:$0xff] }
0x1434   :  { %v3154_v37 = vpop.f32.mrf.mxu0  ;;  %v3197_v38 = vpop.f32.mrf.mxu1  ;;  %v3805_v15 = vpack.c.bf16 %v4605_v13, %v4604_v25 }
0x1435   :  { %v3155_v41 = vadd.f32 %v3154_v37, %v3036_v33  ;;  %v3198_v18 = vadd.f32 %v3197_v38, %v3044_v51  ;;  %v3461_v4 = vmax.f32 %v3153_v40, 0.0  ;;  %v3463_v61 = vmax.f32 %v3196_v16, 0.0  ;;  %v4618_v33 = vld [vmem:[%s8225_s15 + $0xad0] sm:$0xff]  ;;  %v4651_v38 = vld [vmem:[%s8225_s15 + $0xbd8] sm:$0xff] }
0x1436   :  { %v3156_v43 = vpop.f32.mrf.mxu0  ;;  %v3199_v42 = vpop.f32.mrf.mxu1  ;;  %v4650_v37 = vld [vmem:[%s8225_s15 + $0xbd0] sm:$0xff] }
0x1437   :  { %v3157_v56 = vadd.f32 %v3156_v43, %v3040_v36  ;;  %v3200_v46 = vadd.f32 %v3199_v42, %v3048_v14  ;;  %v3476_v57 = vmax.f32 %v3155_v41, 0.0  ;;  %v3478_v58 = vmax.f32 %v3198_v18, 0.0  ;;  %v4636_v36 = vld [vmem:[%s8225_s15 + $0xb60] sm:$0xff]  ;;  %v4637_v14 = vld [vmem:[%s8225_s15 + $0xb68] sm:$0xff] }
0x1438   :  { %v7528_v63 = vpop.f32.mrf.mxu0  ;;  %v7530_v59 = vpop.f32.mrf.mxu1  ;;  %v3821_v43 = vpack.c.bf16 %v4637_v14, %v4636_v36  ;;  %v3812_v42 = vpack.c.bf16 %v4619_v31, %v4618_v33  ;;  %v4599_v36 = vld [vmem:[%s8225_s15 + $0xa38] sm:$0xff]  ;;  %v4630_v14 = vld [vmem:[%s8225_s15 + $0xb30] sm:$0xff]  ;;  %v4613_v31 = vld [vmem:[%s8225_s15 + $0xaa8] sm:$0xff] }
0x1439   :  { %v3477_v1 = vmax.f32 %v3157_v56, 0.0  ;;  %v3479_v30 = vmax.f32 %v3200_v46, 0.0  ;;  %v3751_v19 = vpack.c.bf16 %v3476_v57, %v3460_v47  ;;  %v3753_v21 = vpack.c.bf16 %v3478_v58, %v3462_v9  ;;  %v4603_v46 = vld [vmem:[%s8225_s15 + $0xa58] sm:$0xff]  ;;  %v4601_v47 = vld [vmem:[%s8225_s15 + $0xa48] sm:$0xff]  ;;  %v4632_v9 = vld [vmem:[%s8225_s15 + $0xb40] sm:$0xff] }
0x143a   :  { %v3238_v7 = vpop.f32.mrf.mxu0  ;;  %v3281_v17 = vpop.f32.mrf.mxu1  ;;  %v3828_v56 = vpack.c.bf16 %v4651_v38, %v4650_v37  ;;  %v3803_v13 = vpack.c.bf16 %v4601_v47, %v4600_v52  ;;  %v4644_v37 = vld [vmem:[%s8225_s15 + $0xba0] sm:$0xff]  ;;  %v4645_v38 = vld [vmem:[%s8225_s15 + $0xba8] sm:$0xff]  ;;  %v3052_v47 = vrot.slane %v7509_v53, %v6402_v45 }
0x143b   :  { %v3752_v20 = vpack.c.bf16 %v3477_v1, %v3461_v4  ;;  %v3754_v23 = vpack.c.bf16 %v3479_v30, %v3463_v61  ;;  %v3239_v51 = vadd.f32 %v3238_v7, %v3056_v44  ;;  %v3282_v8 = vadd.f32 %v3281_v17, %v3064_v34  ;;  %v4633_v17 = vld [vmem:[%s8225_s15 + $0xb48] sm:$0xff] }
0x143c   :  { %v7557_v55 = vpop.f32.mrf.mxu0  ;;  %v7559_v29 = vpop.f32.mrf.mxu1  ;;  %v3804_v1 = vpack.c.bf16 %v4603_v46, %v4602_v11  ;;  %v3820_v30 = vpack.c.bf16 %v4635_v2, %v4634_v22  ;;  %v3827_v7 = vpack.c.bf16 %v4649_v3, %v4648_v62  ;;  %v4596_v11 = vld [vmem:[%s8225_s15 + $0xa20] sm:$0xff]  ;;  %v4629_v46 = vld [vmem:[%s8225_s15 + $0xb28] sm:$0xff]  ;;  %v4610_v22 = vld [vmem:[%s8225_s15 + $0xa90] sm:$0xff] }
0x143d   :  { %3933 = vmatprep.mubr.bf16.mxu0 %v3752_v20  ;;  %3974 = vmatprep.mubr.bf16.mxu1 %v3754_v23  ;;  %v3465_v39 = vmax.f32 %v3239_v51, 0.0  ;;  %v3467_v57 = vmax.f32 %v3282_v8, 0.0  ;;  %v4614_v20 = vld [vmem:[%s8225_s15 + $0xab0] sm:$0xff]  ;;  %v4615_v23 = vld [vmem:[%s8225_s15 + $0xab8] sm:$0xff]  ;;  %v4612_v8 = vld [vmem:[%s8225_s15 + $0xaa0] sm:$0xff] }
0x143e   :  { %v3242_v40 = vpop.f32.mrf.mxu0  ;;  %v3285_v16 = vpop.f32.mrf.mxu1  ;;  %3934 = vmatmul.mubr.bf16.vlgmr.msra.gmra.mxu0 %v3751_v19  ;;  %3975 = vmatmul.mubr.bf16.vlgmr.msra.gmra.mxu1 %v3753_v21  ;;  %v3819_v21 = vpack.c.bf16 %v4633_v17, %v4632_v9  ;;  %v4631_v51 = vld [vmem:[%s8225_s15 + $0xb38] sm:$0xff]  ;;  %v4594_v3 = vld [vmem:[%s8225_s15 + $0xa10] sm:$0xff]  ;;  %v4609_v52 = vld [vmem:[%s8225_s15 + $0xa88] sm:$0xff] }
0x143f   :  { %v3243_v41 = vadd.f32 %v3242_v40, %v3056_v44  ;;  %v3286_v18 = vadd.f32 %v3285_v16, %v3064_v34  ;;  %5071 = vmatpush3.bf16.msra.mxu0 %v3806_v49  ;;  %5093 = vmatpush3.bf16.msra.mxu1 %v3822_v24  ;;  %v4616_v34 = vld [vmem:[%s8225_s15 + $0xac0] sm:$0xff]  ;;  %v4646_v49 = vld [vmem:[%s8225_s15 + $0xbb0] sm:$0xff]  ;;  %v4647_v24 = vld [vmem:[%s8225_s15 + $0xbb8] sm:$0xff] }
0x1440   :  { %5072 = vmatprep.subr.bf16.mxu0 %v3813_v32  ;;  %5094 = vmatprep.subr.bf16.mxu1 %v3829_v35  ;;  %v3811_v6 = vpack.c.bf16 %v4617_v60, %v4616_v34  ;;  %v7627_v25 = vpop.f32.mrf.mxu0  ;;  %v7629_v19 = vpop.f32.mrf.mxu1  ;;  %v3810_v32 = vpack.c.bf16 %v4615_v23, %v4614_v20  ;;  %v4598_v35 = vld [vmem:[%s8225_s15 + $0xa30] sm:$0xff]  ;;  %v3826_v33 = vpack.c.bf16 %v4647_v24, %v4646_v49  ;;  %v4611_v2 = vld [vmem:[%s8225_s15 + $0xa98] sm:$0xff]  ;;  %v4641_v17 = vld [vmem:[%s8225_s15 + $0xb88] sm:$0xff] }
0x1441   :  { %v3481_v58 = vmax.f32 %v3243_v41, 0.0  ;;  %v3483_v44 = vmax.f32 %v3286_v18, 0.0  ;;  %v3802_v16 = vpack.c.bf16 %v4599_v36, %v4598_v35  ;;  %v3818_v18 = vpack.c.bf16 %v4631_v51, %v4630_v14  ;;  %v7710_v9 = vld [vmem:[%s8226_s14 + $0x18] sm:$0xff]  ;;  %v4592_v36 = vld [vmem:[%s8225_s15 + $0xa00] sm:$0xff]  ;;  %v4625_v51 = vld [vmem:[%s8225_s15 + $0xb08] sm:$0xff] }
0x1442   :  { %v7655_v40 = vpop.f32.mrf.mxu0  ;;  %v7657_v41 = vpop.f32.mrf.mxu1  ;;  %v3808_v62 = vpack.c.bf16 %v4611_v2, %v4610_v22  ;;  %v3060_v20 = vrot.slane %v7509_v53, %v6411_v48  ;;  %v3072_v23 = vrot.slane %v7710_v9, %v6216_v54  ;;  %v4593_v53 = vld [vmem:[%s8225_s15 + $0xa08] sm:$0xff]  ;;  %v4624_v54 = vld [vmem:[%s8225_s15 + $0xb00] sm:$0xff] }
0x1443   :  { %v3756_v4 = vpack.c.bf16 %v3481_v58, %v3465_v39  ;;  %v3758_v61 = vpack.c.bf16 %v3483_v44, %v3467_v57  ;;  %5073 = vmatpush3.bf16.msra.mxu0 %v3805_v15  ;;  %5095 = vmatpush3.bf16.msra.mxu1 %v3821_v43  ;;  %v3809_v15 = vpack.c.bf16 %v4613_v31, %v4612_v8  ;;  %v4597_v43 = vld [vmem:[%s8225_s15 + $0xa28] sm:$0xff]  ;;  %v4642_v39 = vld [vmem:[%s8225_s15 + $0xb90] sm:$0xff]  ;;  %v4643_v57 = vld [vmem:[%s8225_s15 + $0xb98] sm:$0xff] }
0x1444   :  { %5074 = vmatprep.subr.bf16.mxu0 %v3812_v42  ;;  %5096 = vmatprep.subr.bf16.mxu1 %v3828_v56  ;;  %v4628_v42 = vld [vmem:[%s8225_s15 + $0xb20] sm:$0xff]  ;;  %v3825_v56 = vpack.c.bf16 %v4645_v38, %v4644_v37  ;;  %v7683_v58 = vpop.f32.mrf.mxu0  ;;  %v3801_v44 = vpack.c.bf16 %v4597_v43, %v4596_v11  ;;  %v7685_v34 = vpop.f32.mrf.mxu1  ;;  %v3284_v14 = vadd.f32 %v7559_v29, %v3060_v20  ;;  %v4686_v8 = vld [vmem:[%s8225_s15 + $0xcf0] sm:$0xff]  ;;  %v4687_v31 = vld [vmem:[%s8225_s15 + $0xcf8] sm:$0xff] }
0x1445   :  { %4015 = vmatprep.mubr.bf16.mxu0 %v3756_v4  ;;  %4056 = vmatprep.mubr.bf16.mxu1 %v3758_v61  ;;  %v3817_v60 = vpack.c.bf16 %v4629_v46, %v4628_v42  ;;  %v4595_v4 = vld [vmem:[%s8225_s15 + $0xa18] sm:$0xff]  ;;  %v4626_v61 = vld [vmem:[%s8225_s15 + $0xb10] sm:$0xff]  ;;  %v3237_v37 = vadd.f32 %v7528_v63, %v3052_v47  ;;  %v3325_v43 = vadd.f32 %v7655_v40, %v3072_v23 }
0x1446   :  { %v3328_v49 = vpop.f32.mrf.mxu0  ;;  %v3800_v24 = vpack.c.bf16 %v4595_v4, %v4594_v3  ;;  %v4719_v38 = vld [vmem:[%s8225_s15 + $0xdf8] sm:$0xff]  ;;  %v3815_v63 = vpack.c.bf16 %v4625_v51, %v4624_v54  ;;  %v3846_v42 = vpack.c.bf16 %v4687_v31, %v4686_v8  ;;  %v3482_v22 = vmax.f32 %v3284_v14, 0.0  ;;  %v4702_v40 = vld [vmem:[%s8225_s15 + $0xd70] sm:$0xff] }
0x1447   :  { %5075 = vmatpush3.bf16.msra.mxu0 %v3804_v1  ;;  %5097 = vmatpush3.bf16.msra.mxu1 %v3820_v30  ;;  %v3824_v1 = vpack.c.bf16 %v4643_v57, %v4642_v39  ;;  %v4627_v30 = vld [vmem:[%s8225_s15 + $0xb18] sm:$0xff]  ;;  %v3329_v29 = vadd.f32 %v3328_v49, %v3072_v23  ;;  %v3464_v57 = vmax.f32 %v3237_v37, 0.0  ;;  %v4666_v51 = vld [vmem:[%s8225_s15 + $0xc50] sm:$0xff] }
0x1448   :  { %5076 = vmatprep.subr.bf16.mxu0 %v3811_v6  ;;  %5098 = vmatprep.subr.bf16.mxu1 %v3827_v7  ;;  %v4608_v6 = vld [vmem:[%s8225_s15 + $0xa80] sm:$0xff]  ;;  %v4671_v46 = vld [vmem:[%s8225_s15 + $0xc78] sm:$0xff]  ;;  %v4698_v31 = vld [vmem:[%s8225_s15 + $0xd50] sm:$0xff] }
0x1449   :  { %v4640_v7 = vld [vmem:[%s8225_s15 + $0xb80] sm:$0xff]  ;;  %v3807_v35 = vpack.c.bf16 %v4609_v52, %v4608_v6  ;;  %v4703_v39 = vld [vmem:[%s8225_s15 + $0xd78] sm:$0xff]  ;;  %v3469_v6 = vmax.f32 %v3325_v43, 0.0 }
0x144a   :  { %v3854_v52 = vpack.c.bf16 %v4703_v39, %v4702_v40  ;;  %v4667_v8 = vld [vmem:[%s8225_s15 + $0xc58] sm:$0xff]  ;;  %v4710_v40 = vld [vmem:[%s8225_s15 + $0xdb0] sm:$0xff] }
0x144b   :  { %5077 = vmatpush3.bf16.msra.mxu0 %v3803_v13  ;;  %5099 = vmatpush3.bf16.msra.mxu1 %v3819_v21  ;;  %v3241_v13 = vadd.f32 %v7557_v55, %v3052_v47  ;;  %v3371_v21 = vpop.f32.mrf.mxu1  ;;  %v3080_v55 = vrot.slane %v7710_v9, %v6219_v50  ;;  %v4718_v50 = vld [vmem:[%s8225_s15 + $0xdf0] sm:$0xff]  ;;  %v4668_v47 = vld [vmem:[%s8225_s15 + $0xc60] sm:$0xff]  ;;  %v4711_v39 = vld [vmem:[%s8225_s15 + $0xdb8] sm:$0xff] }
0x144c   :  { %5078 = vmatprep.subr.bf16.mxu0 %v3810_v32  ;;  %5100 = vmatprep.subr.bf16.mxu1 %v3826_v33  ;;  %v3816_v32 = vpack.c.bf16 %v4627_v30, %v4626_v61  ;;  %v3823_v33 = vpack.c.bf16 %v4641_v17, %v4640_v7  ;;  %v3862_v2 = vpack.c.bf16 %v4719_v38, %v4718_v50  ;;  %v4716_v61 = vld [vmem:[%s8225_s15 + $0xde0] sm:$0xff]  ;;  %v4669_v7 = vld [vmem:[%s8225_s15 + $0xc68] sm:$0xff] }
0x144d   :  { %v3480_v11 = vmax.f32 %v3241_v13, 0.0  ;;  %v4700_v17 = vld [vmem:[%s8225_s15 + $0xd60] sm:$0xff]  ;;  %v4682_v13 = vld [vmem:[%s8225_s15 + $0xcd0] sm:$0xff]  ;;  %v3837_v14 = vpack.c.bf16 %v4669_v7, %v4668_v47  ;;  %v4681_v38 = vld [vmem:[%s8225_s15 + $0xcc8] sm:$0xff] }
0x144e   :  { %v4680_v50 = vld [vmem:[%s8225_s15 + $0xcc0] sm:$0xff]  ;;  %v4709_v7 = vld [vmem:[%s8225_s15 + $0xda8] sm:$0xff] }
0x144f   :  { %5079 = vmatpush3.bf16.msra.mxu0 %v3802_v16  ;;  %5101 = vmatpush3.bf16.msra.mxu1 %v3818_v18  ;;  %v3280_v16 = vadd.f32 %v7530_v59, %v3060_v20  ;;  %v3372_v18 = vadd.f32 %v3371_v21, %v3080_v55  ;;  %v3368_v59 = vadd.f32 %v7657_v41, %v3080_v55  ;;  %v4685_v41 = vld [vmem:[%s8225_s15 + $0xce8] sm:$0xff]  ;;  %v4683_v21 = vld [vmem:[%s8225_s15 + $0xcd8] sm:$0xff]  ;;  %v4708_v47 = vld [vmem:[%s8225_s15 + $0xda0] sm:$0xff] }
0x1450   :  { %5080 = vmatprep.subr.bf16.mxu0 %v3809_v15  ;;  %5102 = vmatprep.subr.bf16.mxu1 %v3825_v56  ;;  %v3799_v15 = vpack.c.bf16 %v4593_v53, %v4592_v36  ;;  %v4670_v56 = vld [vmem:[%s8225_s15 + $0xc70] sm:$0xff]  ;;  %v3755_v30 = vpack.c.bf16 %v3480_v11, %v3464_v57  ;;  %v4715_v53 = vld [vmem:[%s8225_s15 + $0xdd8] sm:$0xff]  ;;  %v3843_v43 = vpack.c.bf16 %v4681_v38, %v4680_v50  ;;  %v7850_v57 = vpop.f32.mrf.mxu0 }
0x1451   :  { %v3487_v3 = vmax.f32 %v3372_v18, 0.0  ;;  %v3838_v4 = vpack.c.bf16 %v4671_v46, %v4670_v56  ;;  %v3471_v23 = vmax.f32 %v3368_v59, 0.0  ;;  %v4714_v36 = vld [vmem:[%s8225_s15 + $0xdd0] sm:$0xff]  ;;  %v4713_v18 = vld [vmem:[%s8225_s15 + $0xdc8] sm:$0xff]  ;;  %v4696_v56 = vld [vmem:[%s8225_s15 + $0xd40] sm:$0xff] }
0x1452   :  { %v3860_v37 = vpack.c.bf16 %v4715_v53, %v4714_v36  ;;  %v4678_v59 = vld [vmem:[%s8225_s15 + $0xcb0] sm:$0xff]  ;;  %v4693_v36 = vld [vmem:[%s8225_s15 + $0xd28] sm:$0xff]  ;;  %v4659_v50 = vld [vmem:[%s8225_s15 + $0xc18] sm:$0xff] }
0x1453   :  { %5081 = vmatpush3.bf16.msra.mxu0 %v3801_v44  ;;  %5103 = vmatpush3.bf16.msra.mxu1 %v3817_v60  ;;  %v3485_v44 = vmax.f32 %v3329_v29, 0.0  ;;  %v4684_v60 = vld [vmem:[%s8225_s15 + $0xce0] sm:$0xff]  ;;  %v3762_v54 = vpack.c.bf16 %v3487_v3, %v3471_v23  ;;  %v4699_v29 = vld [vmem:[%s8225_s15 + $0xd58] sm:$0xff]  ;;  %v4662_v3 = vld [vmem:[%s8225_s15 + $0xc30] sm:$0xff] }
0x1454   :  { %5082 = vmatprep.subr.bf16.mxu0 %v3808_v62  ;;  %5104 = vmatprep.subr.bf16.mxu1 %v3824_v1  ;;  %v3466_v62 = vmax.f32 %v3280_v16, 0.0  ;;  %v4717_v1 = vld [vmem:[%s8225_s15 + $0xde8] sm:$0xff]  ;;  %v3845_v49 = vpack.c.bf16 %v4685_v41, %v4684_v60  ;;  %v4712_v16 = vld [vmem:[%s8225_s15 + $0xdc0] sm:$0xff]  ;;  %v3852_v11 = vpack.c.bf16 %v4699_v29, %v4698_v31  ;;  %v7852_v60 = vpop.f32.mrf.mxu1  ;;  %v4674_v53 = vld [vmem:[%s8225_s15 + $0xc90] sm:$0xff] }
0x1455   :  { %v3859_v46 = vpack.c.bf16 %v4713_v18, %v4712_v16  ;;  %v4658_v29 = vld [vmem:[%s8225_s15 + $0xc10] sm:$0xff]  ;;  %v4691_v18 = vld [vmem:[%s8225_s15 + $0xd18] sm:$0xff] }
0x1456   :  { %v3757_v20 = vpack.c.bf16 %v3482_v22, %v3466_v62  ;;  %v4697_v22 = vld [vmem:[%s8225_s15 + $0xd48] sm:$0xff]  ;;  %v7880_v23 = vpop.f32.mrf.mxu1  ;;  %v4690_v38 = vld [vmem:[%s8225_s15 + $0xd10] sm:$0xff] }
0x1457   :  { %5083 = vmatpush3.bf16.msra.mxu0 %v3800_v24  ;;  %5105 = vmatpush3.bf16.msra.mxu1 %v3816_v32  ;;  %v4701_v24 = vld [vmem:[%s8225_s15 + $0xd68] sm:$0xff]  ;;  %v3760_v32 = vpack.c.bf16 %v3485_v44, %v3469_v6  ;;  %v3851_v41 = vpack.c.bf16 %v4697_v22, %v4696_v56  ;;  %v4676_v6 = vld [vmem:[%s8225_s15 + $0xca0] sm:$0xff]  ;;  %v3076_v56 = vrot.slane %v7710_v9, %v6222_v10 }
0x1458   :  { %5084 = vmatprep.subr.bf16.mxu0 %v3807_v35  ;;  %5106 = vmatprep.subr.bf16.mxu1 %v3823_v33  ;;  %v3861_v35 = vpack.c.bf16 %v4717_v1, %v4716_v61  ;;  %v3853_v55 = vpack.c.bf16 %v4701_v24, %v4700_v17  ;;  %v3844_v33 = vpack.c.bf16 %v4683_v21, %v4682_v13  ;;  %v4694_v61 = vld [vmem:[%s8225_s15 + $0xd30] sm:$0xff]  ;;  %v7878_v17 = vpop.f32.mrf.mxu0  ;;  %v4660_v13 = vld [vmem:[%s8225_s15 + $0xc20] sm:$0xff]  ;;  %v4661_v21 = vld [vmem:[%s8225_s15 + $0xc28] sm:$0xff] }
0x1459   :  { %v3858_v1 = vpack.c.bf16 %v4711_v39, %v4710_v40  ;;  %v3848_v40 = vpack.c.bf16 %v4691_v18, %v4690_v38  ;;  %v4657_v10 = vld [vmem:[%s8225_s15 + $0xc08] sm:$0xff] }
0x145a   :  { %v4733_v18 = vld [vmem:[%s8225_s15 + $0xe68] sm:$0xff] }
0x145b   :  { %5085 = vmatpush3.bf16.msra.mxu0 %v3799_v15  ;;  %5107 = vmatpush3.bf16.msra.mxu1 %v3815_v63  ;;  %v3836_v15 = vpack.c.bf16 %v4667_v8, %v4666_v51  ;;  %v4664_v63 = vld [vmem:[%s8225_s15 + $0xc40] sm:$0xff]  ;;  %v3833_v51 = vpack.c.bf16 %v4661_v21, %v4660_v13  ;;  %v7908_v8 = vpop.f32.mrf.mxu1  ;;  %v4735_v13 = vld [vmem:[%s8225_s15 + $0xe78] sm:$0xff] }
0x145c   :  { %5114 = vmatprep.subr.bf16.mxu0 %v3846_v42  ;;  %5136 = vmatprep.subr.bf16.mxu1 %v3862_v2  ;;  %v4665_v42 = vld [vmem:[%s8225_s15 + $0xc48] sm:$0xff]  ;;  %v4679_v2 = vld [vmem:[%s8225_s15 + $0xcb8] sm:$0xff] }
0x145d   :  { %v3835_v44 = vpack.c.bf16 %v4665_v42, %v4664_v63  ;;  %v3842_v62 = vpack.c.bf16 %v4679_v2, %v4678_v59  ;;  %v4704_v63 = vld [vmem:[%s8225_s15 + $0xd80] sm:$0xff]  ;;  %v4705_v42 = vld [vmem:[%s8225_s15 + $0xd88] sm:$0xff]  ;;  %v3832_v59 = vpack.c.bf16 %v4659_v50, %v4658_v29 }
0x145e   :  { %4016 = vmatmul.mubr.bf16.vlgmr.msra.gmra.mxu0 %v3755_v30  ;;  %4057 = vmatmul.mubr.bf16.vlgmr.msra.gmra.mxu1 %v3757_v20  ;;  %v4695_v30 = vld [vmem:[%s8225_s15 + $0xd38] sm:$0xff] }
0x145f   :  { %5115 = vmatpush3.bf16.msra.mxu0 %v3838_v4  ;;  %4097 = vmatprep.mubr.bf16.mxu0 %v3760_v32  ;;  %v4663_v4 = vld [vmem:[%s8225_s15 + $0xc38] sm:$0xff]  ;;  %v4692_v32 = vld [vmem:[%s8225_s15 + $0xd20] sm:$0xff] }
0x1460   :  { %5137 = vmatpush3.bf16.msra.mxu1 %v3854_v52  ;;  %4138 = vmatprep.mubr.bf16.mxu1 %v3762_v54  ;;  %v4677_v52 = vld [vmem:[%s8225_s15 + $0xca8] sm:$0xff]  ;;  %v3834_v20 = vpack.c.bf16 %v4663_v4, %v4662_v3  ;;  %v4675_v54 = vld [vmem:[%s8225_s15 + $0xc98] sm:$0xff]  ;;  %v3849_v31 = vpack.c.bf16 %v4693_v36, %v4692_v32  ;;  %v4750_v4 = vld [vmem:[%s8225_s15 + $0xef0] sm:$0xff] }
0x1461   :  { %5116 = vmatprep.subr.bf16.mxu0 %v3845_v49  ;;  %5138 = vmatprep.subr.bf16.mxu1 %v3861_v35  ;;  %v3850_v49 = vpack.c.bf16 %v4695_v30, %v4694_v61  ;;  %v3841_v24 = vpack.c.bf16 %v4677_v52, %v4676_v6  ;;  %v3857_v35 = vpack.c.bf16 %v4709_v7, %v4708_v47  ;;  %v4689_v3 = vld [vmem:[%s8225_s15 + $0xd08] sm:$0xff]  ;;  %v4751_v61 = vld [vmem:[%s8225_s15 + $0xef8] sm:$0xff] }
0x1462   :  { %v4783_v30 = vld [vmem:[%s8225_s15 + $0xff8] sm:$0xff]  ;;  %v3366_v6 = vadd.f32 %v7629_v19, %v3076_v56 }
0x1463   :  { %5117 = vmatpush3.bf16.msra.mxu0 %v3837_v14  ;;  %v4706_v14 = vld [vmem:[%s8225_s15 + $0xd90] sm:$0xff] }
0x1464   :  { %5139 = vmatpush3.bf16.msra.mxu1 %v3853_v55  ;;  %5118 = vmatprep.subr.bf16.mxu0 %v3844_v33  ;;  %v4707_v55 = vld [vmem:[%s8225_s15 + $0xd98] sm:$0xff]  ;;  %v7906_v33 = vpop.f32.mrf.mxu0 }
0x1465   :  { %5140 = vmatprep.subr.bf16.mxu1 %v3860_v37  ;;  %v3840_v37 = vpack.c.bf16 %v4675_v54, %v4674_v53  ;;  %v3856_v16 = vpack.c.bf16 %v4707_v55, %v4706_v14  ;;  %v4748_v54 = vld [vmem:[%s8225_s15 + $0xee0] sm:$0xff]  ;;  %v3470_v14 = vmax.f32 %v3366_v6, 0.0 }
0x1466   :  { %v3414_v22 = vpop.f32.mrf.mxu0 }
0x1467   :  { %5119 = vmatpush3.bf16.msra.mxu0 %v3836_v15  ;;  %v4672_v15 = vld [vmem:[%s8225_s15 + $0xc80] sm:$0xff] }
0x1468   :  { %5141 = vmatpush3.bf16.msra.mxu1 %v3852_v11  ;;  %5120 = vmatprep.subr.bf16.mxu0 %v3843_v43  ;;  %v4673_v11 = vld [vmem:[%s8225_s15 + $0xc88] sm:$0xff]  ;;  %v3068_v43 = vrot.slane %v7710_v9, %v5686_v5  ;;  %v3457_v5 = vpop.f32.mrf.mxu1 }
0x1469   :  { %5142 = vmatprep.subr.bf16.mxu1 %v3859_v46  ;;  %v3088_v46 = vrot.slane %v7710_v9, %v6238_v26  ;;  %v3839_v39 = vpack.c.bf16 %v4673_v11, %v4672_v15  ;;  %v4688_v26 = vld [vmem:[%s8225_s15 + $0xd00] sm:$0xff] }
0x146a   :  { %v3327_v2 = vadd.f32 %v7683_v58, %v3068_v43  ;;  %v3096_v58 = vrot.slane %v7710_v9, %v6241_v27  ;;  %v4782_v27 = vld [vmem:[%s8225_s15 + $0xff0] sm:$0xff]  ;;  %v4764_v15 = vld [vmem:[%s8225_s15 + $0xf60] sm:$0xff] }
0x146b   :  { %5121 = vmatpush3.bf16.msra.mxu0 %v3835_v44  ;;  %v4656_v44 = vld [vmem:[%s8225_s15 + $0xc00] sm:$0xff]  ;;  %v3894_v32 = vpack.c.bf16 %v4783_v30, %v4782_v27 }
0x146c   :  { %5143 = vmatpush3.bf16.msra.mxu1 %v3851_v41  ;;  %5122 = vmatprep.subr.bf16.mxu0 %v3842_v62  ;;  %v3370_v41 = vadd.f32 %v7685_v34, %v3076_v56  ;;  %v3855_v62 = vpack.c.bf16 %v4705_v42, %v4704_v63  ;;  %v3415_v34 = vadd.f32 %v3414_v22, %v3088_v46  ;;  %v3484_v7 = vmax.f32 %v3327_v2, 0.0  ;;  %v4765_v42 = vld [vmem:[%s8225_s15 + $0xf68] sm:$0xff]  ;;  %v4746_v56 = vld [vmem:[%s8225_s15 + $0xed0] sm:$0xff] }
0x146d   :  { %5144 = vmatprep.subr.bf16.mxu1 %v3858_v1  ;;  %v3323_v1 = vadd.f32 %v7627_v25, %v3068_v43  ;;  %v3458_v52 = vadd.f32 %v3457_v5, %v3096_v58  ;;  %v3831_v47 = vpack.c.bf16 %v4657_v10, %v4656_v44  ;;  %v3847_v25 = vpack.c.bf16 %v4689_v3, %v4688_v26  ;;  %v4778_v2 = vld [vmem:[%s8225_s15 + $0xfd0] sm:$0xff]  ;;  %v4779_v5 = vld [vmem:[%s8225_s15 + $0xfd8] sm:$0xff] }
0x146e   :  { %v3486_v21 = vmax.f32 %v3370_v41, 0.0  ;;  %v3454_v19 = vadd.f32 %v7880_v23, %v3096_v58  ;;  %v3489_v53 = vmax.f32 %v3415_v34, 0.0  ;;  %v4749_v23 = vld [vmem:[%s8225_s15 + $0xee8] sm:$0xff]  ;;  %v3885_v44 = vpack.c.bf16 %v4765_v42, %v4764_v15  ;;  %v4730_v26 = vld [vmem:[%s8225_s15 + $0xe50] sm:$0xff]  ;;  %v4731_v41 = vld [vmem:[%s8225_s15 + $0xe58] sm:$0xff] }
0x146f   :  { %5123 = vmatpush3.bf16.msra.mxu0 %v3834_v20  ;;  %v3411_v20 = vadd.f32 %v7878_v17, %v3088_v46  ;;  %v4766_v17 = vld [vmem:[%s8225_s15 + $0xf70] sm:$0xff]  ;;  %v3468_v36 = vmax.f32 %v3323_v1, 0.0  ;;  %v3491_v55 = vmax.f32 %v3458_v52, 0.0  ;;  %v3877_v63 = vpack.c.bf16 %v4749_v23, %v4748_v54  ;;  %v4747_v46 = vld [vmem:[%s8225_s15 + $0xed8] sm:$0xff]  ;;  %v4776_v1 = vld [vmem:[%s8225_s15 + $0xfc0] sm:$0xff] }
0x1470   :  { %5145 = vmatpush3.bf16.msra.mxu1 %v3850_v49  ;;  %5124 = vmatprep.subr.bf16.mxu0 %v3841_v24  ;;  %v3878_v49 = vpack.c.bf16 %v4751_v61, %v4750_v4  ;;  %v4734_v24 = vld [vmem:[%s8225_s15 + $0xe70] sm:$0xff]  ;;  %v3761_v11 = vpack.c.bf16 %v3486_v21, %v3470_v14  ;;  %v3475_v43 = vmax.f32 %v3454_v19, 0.0  ;;  %v3876_v10 = vpack.c.bf16 %v4747_v46, %v4746_v56  ;;  %v4763_v3 = vld [vmem:[%s8225_s15 + $0xf58] sm:$0xff]  ;;  %v4744_v4 = vld [vmem:[%s8225_s15 + $0xec0] sm:$0xff] }
0x1471   :  { %5146 = vmatprep.subr.bf16.mxu1 %v3857_v35  ;;  %v4767_v35 = vld [vmem:[%s8225_s15 + $0xf78] sm:$0xff]  ;;  %v3759_v29 = vpack.c.bf16 %v3484_v7, %v3468_v36  ;;  %v3473_v50 = vmax.f32 %v3411_v20, 0.0  ;;  %v4762_v58 = vld [vmem:[%s8225_s15 + $0xf50] sm:$0xff]  ;;  %v4745_v61 = vld [vmem:[%s8225_s15 + $0xec8] sm:$0xff]  ;;  %v3868_v27 = vpack.c.bf16 %v4731_v41, %v4730_v26  ;;  %v3084_v41 = vrot.slane %v7710_v9, %v6402_v45 }
0x1472   :  { %v3886_v38 = vpack.c.bf16 %v4767_v35, %v4766_v17  ;;  %v4777_v34 = vld [vmem:[%s8225_s15 + $0xfc8] sm:$0xff]  ;;  %v3884_v30 = vpack.c.bf16 %v4763_v3, %v4762_v58  ;;  %v3875_v6 = vpack.c.bf16 %v4745_v61, %v4744_v4  ;;  %v4728_v52 = vld [vmem:[%s8225_s15 + $0xe40] sm:$0xff]  ;;  %v4775_v21 = vld [vmem:[%s8225_s15 + $0xfb8] sm:$0xff]  ;;  %v3092_v3 = vrot.slane %v7710_v9, %v6411_v48 }
0x1473   :  { %5125 = vmatpush3.bf16.msra.mxu0 %v3833_v51  ;;  %v3870_v51 = vpack.c.bf16 %v4735_v13, %v4734_v24  ;;  %v3764_v22 = vpack.c.bf16 %v3489_v53, %v3473_v50  ;;  %v4760_v7 = vld [vmem:[%s8225_s15 + $0xf40] sm:$0xff]  ;;  %v3891_v20 = vpack.c.bf16 %v4777_v34, %v4776_v1  ;;  %v4743_v24 = vld [vmem:[%s8225_s15 + $0xeb8] sm:$0xff]  ;;  %v4774_v13 = vld [vmem:[%s8225_s15 + $0xfb0] sm:$0xff]  ;;  %v3413_v61 = vadd.f32 %v7906_v33, %v3084_v41 }
0x1474   :  { %5147 = vmatpush3.bf16.msra.mxu1 %v3849_v31  ;;  %5126 = vmatprep.subr.bf16.mxu0 %v3840_v37  ;;  %v4780_v31 = vld [vmem:[%s8225_s15 + $0xfe0] sm:$0xff]  ;;  %v4781_v37 = vld [vmem:[%s8225_s15 + $0xfe8] sm:$0xff]  ;;  %v4726_v35 = vld [vmem:[%s8225_s15 + $0xe30] sm:$0xff]  ;;  %v3890_v54 = vpack.c.bf16 %v4775_v21, %v4774_v13 }
0x1475   :  { %5148 = vmatprep.subr.bf16.mxu1 %v3856_v16  ;;  %v4732_v16 = vld [vmem:[%s8225_s15 + $0xe60] sm:$0xff]  ;;  %v4727_v36 = vld [vmem:[%s8225_s15 + $0xe38] sm:$0xff]  ;;  %v4758_v53 = vld [vmem:[%s8225_s15 + $0xf30] sm:$0xff] }
0x1476   :  { %v4759_v23 = vld [vmem:[%s8225_s15 + $0xf38] sm:$0xff]  ;;  %v4740_v14 = vld [vmem:[%s8225_s15 + $0xea0] sm:$0xff]  ;;  %v4770_v42 = vld [vmem:[%s8225_s15 + $0xf90] sm:$0xff] }
0x1477   :  { %5127 = vmatpush3.bf16.msra.mxu0 %v3832_v59  ;;  %v3893_v59 = vpack.c.bf16 %v4781_v37, %v4780_v31  ;;  %v4773_v31 = vld [vmem:[%s8225_s15 + $0xfa8] sm:$0xff]  ;;  %v3866_v37 = vpack.c.bf16 %v4727_v36, %v4726_v35  ;;  %v4771_v56 = vld [vmem:[%s8225_s15 + $0xf98] sm:$0xff]  ;;  %v4768_v58 = vld [vmem:[%s8225_s15 + $0xf80] sm:$0xff] }
0x1478   :  { %5149 = vmatpush3.bf16.msra.mxu1 %v3848_v40  ;;  %5128 = vmatprep.subr.bf16.mxu0 %v3839_v39  ;;  %v3766_v40 = vpack.c.bf16 %v3491_v55, %v3475_v43  ;;  %v3869_v39 = vpack.c.bf16 %v4733_v18, %v4732_v16  ;;  %v4741_v55 = vld [vmem:[%s8225_s15 + $0xea8] sm:$0xff]  ;;  %v4756_v18 = vld [vmem:[%s8225_s15 + $0xf20] sm:$0xff]  ;;  %v4738_v43 = vld [vmem:[%s8225_s15 + $0xe90] sm:$0xff] }
0x1479   :  { %5150 = vmatprep.subr.bf16.mxu1 %v3855_v62  ;;  %v3892_v62 = vpack.c.bf16 %v4779_v5, %v4778_v2  ;;  %v3873_v50 = vpack.c.bf16 %v4741_v55, %v4740_v14  ;;  %v4725_v16 = vld [vmem:[%s8225_s15 + $0xe28] sm:$0xff]  ;;  %v4722_v2 = vld [vmem:[%s8225_s15 + $0xe10] sm:$0xff]  ;;  %v4723_v5 = vld [vmem:[%s8225_s15 + $0xe18] sm:$0xff] }
0x147a   :  { %v4737_v26 = vld [vmem:[%s8225_s15 + $0xe88] sm:$0xff]  ;;  %v3864_v4 = vpack.c.bf16 %v4723_v5, %v4722_v2  ;;  %v4720_v45 = vld [vmem:[%s8225_s15 + $0xe00] sm:$0xff] }
0x147b   :  { %5129 = vmatpush3.bf16.msra.mxu0 %v3831_v47  ;;  %v4729_v47 = vld [vmem:[%s8225_s15 + $0xe48] sm:$0xff]  ;;  %v4752_v9 = vld [vmem:[%s8225_s15 + $0xf00] sm:$0xff] }
0x147c   :  { %5151 = vmatpush3.bf16.msra.mxu1 %v3847_v25  ;;  %5158 = vmatprep.subr.bf16.mxu0 %v3878_v49  ;;  %v4761_v25 = vld [vmem:[%s8225_s15 + $0xf48] sm:$0xff]  ;;  %v4742_v49 = vld [vmem:[%s8225_s15 + $0xeb0] sm:$0xff]  ;;  %v3867_v19 = vpack.c.bf16 %v4729_v47, %v4728_v52  ;;  %v3452_v52 = vadd.f32 %v7852_v60, %v3092_v3 }
0x147d   :  { %5180 = vmatprep.subr.bf16.mxu1 %v3894_v32  ;;  %v3883_v32 = vpack.c.bf16 %v4761_v25, %v4760_v7  ;;  %v3874_v17 = vpack.c.bf16 %v4743_v24, %v4742_v49  ;;  %v4753_v33 = vld [vmem:[%s8225_s15 + $0xf08] sm:$0xff]  ;;  %v3488_v7 = vmax.f32 %v3413_v61, 0.0 }
0x147e   :  { %4098 = vmatmul.mubr.bf16.vlgmr.msra.gmra.mxu0 %v3759_v29  ;;  %v3882_v29 = vpack.c.bf16 %v4759_v23, %v4758_v53  ;;  %v3474_v49 = vmax.f32 %v3452_v52, 0.0 }
0x147f   :  { %4139 = vmatmul.mubr.bf16.vlgmr.msra.gmra.mxu1 %v3761_v11  ;;  %5159 = vmatpush3.bf16.msra.mxu0 %v3870_v51  ;;  %v4772_v51 = vld [vmem:[%s8225_s15 + $0xfa0] sm:$0xff]  ;;  %v4757_v11 = vld [vmem:[%s8225_s15 + $0xf28] sm:$0xff] }
0x1480   :  { %4179 = vmatprep.mubr.bf16.mxu0 %v3764_v22  ;;  %5181 = vmatpush3.bf16.msra.mxu1 %v3886_v38  ;;  %v4724_v38 = vld [vmem:[%s8225_s15 + $0xe20] sm:$0xff]  ;;  %v3889_v15 = vpack.c.bf16 %v4773_v31, %v4772_v51  ;;  %v3881_v22 = vpack.c.bf16 %v4757_v11, %v4756_v18 }
0x1481   :  { %4220 = vmatprep.mubr.bf16.mxu1 %v3766_v40  ;;  %5160 = vmatprep.subr.bf16.mxu0 %v3877_v63  ;;  %v4739_v63 = vld [vmem:[%s8225_s15 + $0xe98] sm:$0xff]  ;;  %v3865_v46 = vpack.c.bf16 %v4725_v16, %v4724_v38  ;;  %v4754_v40 = vld [vmem:[%s8225_s15 + $0xf10] sm:$0xff] }
0x1482   :  { %5182 = vmatprep.subr.bf16.mxu1 %v3893_v59  ;;  %v3872_v59 = vpack.c.bf16 %v4739_v63, %v4738_v43 }
0x1483   :  { %5161 = vmatpush3.bf16.msra.mxu0 %v3869_v39  ;;  %v3888_v39 = vpack.c.bf16 %v4771_v56, %v4770_v42 }
0x1484   :  { %5183 = vmatpush3.bf16.msra.mxu1 %v3885_v44  ;;  %5162 = vmatprep.subr.bf16.mxu0 %v3876_v10  ;;  %v4755_v44 = vld [vmem:[%s8225_s15 + $0xf18] sm:$0xff]  ;;  %v4736_v10 = vld [vmem:[%s8225_s15 + $0xe80] sm:$0xff] }
0x1485   :  { %5184 = vmatprep.subr.bf16.mxu1 %v3892_v62  ;;  %v4769_v62 = vld [vmem:[%s8225_s15 + $0xf88] sm:$0xff]  ;;  %v3880_v1 = vpack.c.bf16 %v4755_v44, %v4754_v40  ;;  %v3871_v34 = vpack.c.bf16 %v4737_v26, %v4736_v10 }
0x1486   :  { %v3887_v48 = vpack.c.bf16 %v4769_v62, %v4768_v58 }
0x1487   :  { %5163 = vmatpush3.bf16.msra.mxu0 %v3868_v27  ;;  %v4721_v27 = vld [vmem:[%s8225_s15 + $0xe08] sm:$0xff] }
0x1488   :  { %5185 = vmatpush3.bf16.msra.mxu1 %v3884_v30  ;;  %5164 = vmatprep.subr.bf16.mxu0 %v3875_v6  ;;  %v3456_v30 = vadd.f32 %v7908_v8, %v3092_v3  ;;  %v3409_v6 = vadd.f32 %v7850_v57, %v3084_v41  ;;  %v3863_v47 = vpack.c.bf16 %v4721_v27, %v4720_v45 }
0x1489   :  { %5186 = vmatprep.subr.bf16.mxu1 %v3891_v20  ;;  %v3879_v8 = vpack.c.bf16 %v4753_v33, %v4752_v9 }
0x148a   :  { %v3490_v20 = vmax.f32 %v3456_v30, 0.0  ;;  %v3472_v25 = vmax.f32 %v3409_v6, 0.0 }
0x148b   :  { %5165 = vmatpush3.bf16.msra.mxu0 %v3867_v19 }
0x148c   :  { %5187 = vmatpush3.bf16.msra.mxu1 %v3883_v32  ;;  %5166 = vmatprep.subr.bf16.mxu0 %v3874_v17  ;;  %v3763_v24 = vpack.c.bf16 %v3488_v7, %v3472_v25  ;;  %v3765_v13 = vpack.c.bf16 %v3490_v20, %v3474_v49 }
0x148d   :  { %5188 = vmatprep.subr.bf16.mxu1 %v3890_v54 }
0x148f   :  { %5167 = vmatpush3.bf16.msra.mxu0 %v3866_v37 }
0x1490   :  { %5189 = vmatpush3.bf16.msra.mxu1 %v3882_v29  ;;  %5168 = vmatprep.subr.bf16.mxu0 %v3873_v50  ;;  %v4785_v29 = vld [vmem:[%s8227_s16 + $0x1] ss:$0 sm:$0xff] }
0x1491   :  { %5190 = vmatprep.subr.bf16.mxu1 %v3889_v15 }
0x1493   :  { %5169 = vmatpush3.bf16.msra.mxu0 %v3865_v46 }
0x1494   :  { %5191 = vmatpush3.bf16.msra.mxu1 %v3881_v22  ;;  %5170 = vmatprep.subr.bf16.mxu0 %v3872_v59 }
0x1495   :  { %5192 = vmatprep.subr.bf16.mxu1 %v3888_v39 }
0x1497   :  { %5171 = vmatpush3.bf16.msra.mxu0 %v3864_v4 }
0x1498   :  { %5193 = vmatpush3.bf16.msra.mxu1 %v3880_v1  ;;  %5172 = vmatprep.subr.bf16.mxu0 %v3871_v34 }
0x1499   :  { %5194 = vmatprep.subr.bf16.mxu1 %v3887_v48 }
0x149b   :  { %5173 = vmatpush3.bf16.msra.mxu0 %v3863_v47 }
0x149c   :  { %5195 = vmatpush3.bf16.msra.mxu1 %v3879_v8  ;;  %5365 = vmatprep.subr.bf16.mxu0 %v5441_v0 }
0x149e   :  { %4180 = vmatmul.mubr.bf16.vlgmr.msra.gmra.mxu0 %v3763_v24 }
0x149f   :  { %4221 = vmatmul.mubr.bf16.vlgmr.msra.gmra.mxu1 %v3765_v13  ;;  %5369 = vmatprep.mubr.msk.bf16.mxu0 %vm5442_vm0, %v5441_v0 }
0x14fe   :  { %v5042_v57 = vpop.f32.mrf.mxu0  ;;  %v5064_v60 = vpop.f32.mrf.mxu1 }
0x1500   :  { %v5043_v21 = vpop.f32.mrf.mxu0  ;;  %v5065_v19 = vpop.f32.mrf.mxu1 }
0x1501   :  { %v5044_v37 = vadd.f32 %v5043_v21, %v5042_v57  ;;  %v5066_v43 = vadd.f32 %v5065_v19, %v5064_v60 }
0x1502   :  { %v5045_v32 = vpop.f32.mrf.mxu0  ;;  %v5067_v17 = vpop.f32.mrf.mxu1 }
0x1503   :  { %v3936_v16 = vadd.f32 %v5044_v37, %v4785_v29 }
0x1504   :  { %v5046_v35 = vpop.f32.mrf.mxu0  ;;  %v5068_v53 = vpop.f32.mrf.mxu1 }
0x1505   :  { %v5047_v18 = vadd.f32 %v5046_v35, %v5045_v32  ;;  %v3977_v42 = vadd.f32 %v5066_v43, %v3936_v16  ;;  %v5069_v59 = vadd.f32 %v5068_v53, %v5067_v17  ;;  %v4788_v43 = vld [vmem:[%s8228_s17 + $0x1] ss:$0 sm:$0xff] }
0x1507   :  { %v3939_v56 = vadd.f32 %v5047_v18, %v4785_v29 }
0x1509   :  { %v3980_v40 = vadd.f32 %v5069_v59, %v3939_v56 }
0x151e   :  { %v5086_v36 = vpop.f32.mrf.mxu0  ;;  %v5108_v54 = vpop.f32.mrf.mxu1 }
0x1520   :  { %v5087_v23 = vpop.f32.mrf.mxu0  ;;  %v5109_v14 = vpop.f32.mrf.mxu1 }
0x1521   :  { %v5088_v63 = vadd.f32 %v5087_v23, %v5086_v36  ;;  %v5110_v39 = vadd.f32 %v5109_v14, %v5108_v54 }
0x1522   :  { %v5089_v55 = vpop.f32.mrf.mxu0  ;;  %v5111_v51 = vpop.f32.mrf.mxu1 }
0x1523   :  { %v4018_v2 = vadd.f32 %v5088_v63, %v3977_v42  ;;  %v4789_v42 = vld [vmem:[%s8229_s18 + $0x1] ss:$0 sm:$0xff] }
0x1524   :  { %v5090_v31 = vpop.f32.mrf.mxu0  ;;  %v5112_v38 = vpop.f32.mrf.mxu1 }
0x1525   :  { %v5091_v5 = vadd.f32 %v5090_v31, %v5089_v55  ;;  %v4059_v41 = vadd.f32 %v5110_v39, %v4018_v2  ;;  %v5113_v62 = vadd.f32 %v5112_v38, %v5111_v51 }
0x1527   :  { %v4021_v58 = vadd.f32 %v5091_v5, %v3980_v40 }
0x1529   :  { %v4062_v34 = vadd.f32 %v5113_v62, %v4021_v58 }
0x153e   :  { %v5130_v50 = vpop.f32.mrf.mxu0 }
0x153f   :  { %v5152_v15 = vpop.f32.mrf.mxu1 }
0x1540   :  { %v5131_v11 = vpop.f32.mrf.mxu0 }
0x1541   :  { %v5153_v46 = vpop.f32.mrf.mxu1  ;;  %v5132_v44 = vadd.f32 %v5131_v11, %v5130_v50 }
0x1542   :  { %v5133_v22 = vpop.f32.mrf.mxu0  ;;  %v5154_v45 = vadd.f32 %v5153_v46, %v5152_v15 }
0x1543   :  { %v5155_v10 = vpop.f32.mrf.mxu1  ;;  %v4100_v3 = vadd.f32 %v5132_v44, %v4059_v41 }
0x1544   :  { %v5134_v26 = vpop.f32.mrf.mxu0 }
0x1545   :  { %v5135_v4 = vadd.f32 %v5134_v26, %v5133_v22  ;;  %v5156_v61 = vpop.f32.mrf.mxu1  ;;  %v4141_v48 = vadd.f32 %v5154_v45, %v4100_v3  ;;  %v4324_v45 = vld [vmem:[%s8230_s21 + $0x18] sm:$0xff] }
0x1546   :  { %v5157_v47 = vadd.f32 %v5156_v61, %v5155_v10 }
0x1547   :  { %v4103_v9 = vadd.f32 %v5135_v4, %v4062_v34  ;;  %v4323_v34 = vld [vmem:[%s8230_s21 + $0x10] sm:$0xff] }
0x1549   :  { %v4144_v49 = vadd.f32 %v5157_v47, %v4103_v9 }
0x155e   :  { %v5174_v1 = vpop.f32.mrf.mxu0 }
0x155f   :  { %v5196_v27 = vpop.f32.mrf.mxu1 }
0x1560   :  { %v5175_v30 = vpop.f32.mrf.mxu0 }
0x1561   :  { %v5176_v33 = vadd.f32 %v5175_v30, %v5174_v1  ;;  %v5197_v6 = vpop.f32.mrf.mxu1  ;;  %v4321_v30 = vld [vmem:[%s8230_s21] sm:$0xff] }
0x1562   :  { %v5177_v52 = vpop.f32.mrf.mxu0  ;;  %v5198_v8 = vadd.f32 %v5197_v6, %v5196_v27  ;;  %v4328_v27 = vpack.c.bf16 %v4324_v45, %v4323_v34 }
0x1563   :  { %v4182_v7 = vadd.f32 %v5176_v33, %v4141_v48  ;;  %v5199_v20 = vpop.f32.mrf.mxu1  ;;  %v4322_v48 = vld [vmem:[%s8230_s21 + $0x8] sm:$0xff] }
0x1564   :  { %v5178_v25 = vpop.f32.mrf.mxu0  ;;  %5366 = vmatpush3.bf16.msra.mxu0 %v4328_v27  ;;  %v4327_v9 = vpack.c.bf16 %v4322_v48, %v4321_v30 }
0x1565   :  { %v4223_v24 = vadd.f32 %v5198_v8, %v4182_v7  ;;  %v5179_v13 = vadd.f32 %v5178_v25, %v5177_v52  ;;  %v5200_v57 = vpop.f32.mrf.mxu1  ;;  %5367 = vmatprep.subr.bf16.mxu0 %v5441_v0  ;;  %v4790_v25 = vld [vmem:[%s8231_s19] ss:$0 sm:$0xff] }
0x1566   :  { %v5201_v21 = vadd.f32 %v5200_v57, %v5199_v20  ;;  %v4791_v57 = vld [vmem:[%s8232_s20] ss:$0 sm:$0xff] }
0x1567   :  { %v4185_v60 = vadd.f32 %v5179_v13, %v4144_v49  ;;  %v4229_v19 = vadd.f32 %v4223_v24, %v7164_v28 }
0x1568   :  { %5368 = vmatpush3.bf16.msra.mxu0 %v4327_v9 }
0x1569   :  { %v4226_v32 = vadd.f32 %v5201_v21, %v4185_v60  ;;  %v4235_v17 = vsel %vm122_vm1, %v4229_v19, 0.0 }
0x156a   :  { %4236 = vadd.xlane.f32.xlu0 %v4235_v17  ;;  %v4792_v17 = vld [vmem:[%s8266_s1] ss:$0 sm:$0xff] }
0x156b   :  { %v4230_v35 = vadd.f32 %v4226_v32, %v7166_v12 }
0x156d   :  { %v4238_v36 = vsel %vm122_vm1, %v4230_v35, 0.0 }
0x156e   :  { %4239 = vadd.xlane.f32.xlu1 %v4238_v36 }
0x15f3   :  { %v4237_v53 = vpop.xlane.xlu0 %4236 }
0x15f4   :  { %v4241_v54 = vmul.f32 0.03125, %v4237_v53 }
0x15f6   :  { %v4243_v23 = vsub.f32 %v4229_v19, %v4241_v54 }
0x15f7   :  { %v4240_v14 = vpop.xlane.xlu1 %4239 }
0x15f8   :  { %v4242_v55 = vmul.f32 0.03125, %v4240_v14  ;;  %v4245_v51 = vmul.f32 %v4243_v23, %v4243_v23 }
0x15fa   :  { %v4244_v31 = vsub.f32 %v4230_v35, %v4242_v55  ;;  %v4247_v37 = vsel %vm122_vm1, %v4245_v51, 0.0 }
0x15fb   :  { %4248 = vadd.xlane.f32.xlu0 %v4247_v37 }
0x15fc   :  { %v4246_v28 = vmul.f32 %v4244_v31, %v4244_v31 }
0x15fe   :  { %v4250_v29 = vsel %vm122_vm1, %v4246_v28, 0.0 }
0x15ff   :  { %4251 = vadd.xlane.f32.xlu1 %v4250_v29 }
0x1684   :  { %v4249_v50 = vpop.xlane.xlu0 %4248 }
0x1685   :  { %v4253_v38 = vmul.f32 0.03125, %v4249_v50 }
0x1687   :  { %v4255_v12 = vadd.f32 1e-05, %v4253_v38 }
0x1688   :  { %v4252_v16 = vpop.xlane.xlu1 %4251 }
0x1689   :  { %5433 = vrsqrt.f32 %v4255_v12  ;;  %v4254_v18 = vmul.f32 0.03125, %v4252_v16 }
0x168b   :  { %v4256_v15 = vadd.f32 1e-05, %v4254_v18 }
0x168d   :  { %5435 = vrsqrt.f32 %v4256_v15 }
0x1696   :  { %v5434_v11 = vpop.eup %5433 }
0x1697   :  { %v4259_v63 = vmul.f32 %v5434_v11, %v4243_v23 }
0x1699   :  { %v4267_v56 = vmul.f32 %v4788_v43, %v4259_v63 }
0x169a   :  { %v5436_v46 = vpop.eup %5435 }
0x169b   :  { %v4275_v22 = vadd.f32 %v4789_v42, %v4267_v56  ;;  %v4260_v59 = vmul.f32 %v5436_v46, %v4244_v31 }
0x169d   :  { %v4279_v2 = vsel %vm122_vm1, %v4275_v22, 0.0  ;;  %v4268_v5 = vmul.f32 %v4788_v43, %v4260_v59 }
0x169e   :  { %4280 = vadd.xlane.f32.xlu0 %v4279_v2 }
0x169f   :  { %v4276_v40 = vadd.f32 %v4789_v42, %v4268_v5 }
0x16a1   :  { %v4282_v39 = vsel %vm122_vm1, %v4276_v40, 0.0 }
0x16a2   :  { %4283 = vadd.xlane.f32.xlu1 %v4282_v39 }
0x1727   :  { %v4281_v44 = vpop.xlane.xlu0 %4280 }
0x1728   :  { %v4285_v10 = vmul.f32 0.03125, %v4281_v44 }
0x172a   :  { %v4287_v26 = vsub.f32 %v4275_v22, %v4285_v10 }
0x172b   :  { %v4284_v41 = vpop.xlane.xlu1 %4283 }
0x172c   :  { %v4286_v58 = vmul.f32 0.03125, %v4284_v41  ;;  %v4289_v62 = vmul.f32 %v4287_v26, %v4287_v26 }
0x172e   :  { %v4288_v3 = vsub.f32 %v4276_v40, %v4286_v58  ;;  %v4291_v4 = vsel %vm122_vm1, %v4289_v62, 0.0 }
0x172f   :  { %4292 = vadd.xlane.f32.xlu0 %v4291_v4 }
0x1730   :  { %v4290_v61 = vmul.f32 %v4288_v3, %v4288_v3 }
0x1732   :  { %v4294_v1 = vsel %vm122_vm1, %v4290_v61, 0.0 }
0x1733   :  { %4295 = vadd.xlane.f32.xlu1 %v4294_v1 }
0x17b8   :  { %v4293_v33 = vpop.xlane.xlu0 %4292 }
0x17b9   :  { %v4297_v6 = vmul.f32 0.03125, %v4293_v33 }
0x17bb   :  { %v4299_v52 = vadd.f32 1e-05, %v4297_v6 }
0x17bc   :  { %v4296_v47 = vpop.xlane.xlu1 %4295 }
0x17bd   :  { %5437 = vrsqrt.f32 %v4299_v52  ;;  %v4298_v7 = vmul.f32 0.03125, %v4296_v47 }
0x17bf   :  { %v4300_v8 = vadd.f32 1e-05, %v4298_v7 }
0x17c1   :  { %5439 = vrsqrt.f32 %v4300_v8 }
0x17ca   :  { %v5438_v20 = vpop.eup %5437 }
0x17cb   :  { %v4303_v0 = vmul.f32 %v5438_v20, %v4287_v26 }
0x17cd   :  { %v4311_v24 = vmul.f32 %v4790_v25, %v4303_v0 }
0x17ce   :  { %v5440_v49 = vpop.eup %5439 }
0x17cf   :  { %v4304_v13 = vmul.f32 %v5440_v49, %v4288_v3  ;;  %v4319_v21 = vadd.f32 %v4791_v57, %v4311_v24 }
0x17d1   :  { %v4312_v60 = vmul.f32 %v4790_v25, %v4304_v13 }
0x17d3   :  { %v4320_v19 = vadd.f32 %v4791_v57, %v4312_v60 }
0x17d5   :  { %v4326_v32 = vpack.c.bf16 %v4320_v19, %v4319_v21 }
0x17d7   :  { %5370 = vmatmul.mubr.msk.bf16.vlgmr.msra.gmra.mxu0 %vm122_vm1, %v4326_v32 }
0x1897   :  { %v4372_v35 = vpop.f32.mrf.mxu0 }
0x1898   :  { %v4373_v36 = vadd.f32 %v4792_v17, %v4372_v35 }
0x1899   :  { %v5371_v53 = vpop.f32.mrf.mxu0 }
0x189a   :  { %4379 = vst [vmem:[%s8267_s6] sm:$0xff] %v4373_v36 }
0x189b   :  { %v4375_v54 = vpop.f32.mrf.mxu0 }
0x189c   :  { %v4376_v23 = vadd.f32 %v4792_v17, %v4375_v54 }
0x189d   :  { %v5372_v14 = vpop.f32.mrf.mxu0 }
0x189e   :  { %4380 = vst [vmem:[%s8267_s6 + $0x8] sm:$0xff] %v4376_v23 }

</bundles_post_ra>
